<compile_context>
chip_gen: v5e
topology: v5e:2x2
jax: 0.10.0
libtpu: 0.0.40
codegen_flags: <defaults>
</compile_context>

<pallas_src>
import functools

import numpy as np

import jax
import jax.numpy as jnp
from jax.experimental import pallas as pl
from jax.experimental.pallas import tpu as pltpu

LANE = 128
EPS = 1e-5


def _round_up(x, m):
    return (x + m - 1) // m * m


def _vmem_limit_bytes():
    """~3/4 of physical VMEM (v5e/v6e: 128 MiB -> 96 MiB, v7x: 64 MiB -> 48 MiB)."""
    try:
        cap = getattr(pltpu.get_tpu_info(), "vmem_capacity_bytes", None)
        cap = int(cap) if cap else 64 * 1024 * 1024
    except Exception:  # pragma: no cover - conservative fallback
        cap = 64 * 1024 * 1024
    return int(min(cap * 3 // 4, 100 * 1024 * 1024))


VMEM_LIMIT = _vmem_limit_bytes()


# ----------------------------------------------------------------------------
# Pallas kernels
# ----------------------------------------------------------------------------
def _taps_matmul(x, w_ref, taps):
    """sum_t shift(x, d_t) @ W_t  with f32 accumulation (4-tap s2d conv)."""
    acc = None
    for t, d in enumerate(taps):
        if d == 0:
            xt = x
        else:
            # Rows [0, tm-d) get x[d:]; the wrapped tail only feeds junk rows.
            xt = jnp.concatenate([x[d:, :], x[:d, :]], axis=0)
        c = jnp.dot(xt, w_ref[t], preferred_element_type=jnp.float32)
        acc = c if acc is None else acc + c
    return acc


def _conv_taps_relu_kernel(x_ref, w_ref, o_ref, *, taps):
    """conv1: 4-tap s2d conv + ReLU (no BatchNorm)."""
    acc = _taps_matmul(x_ref[...], w_ref, taps)
    o_ref[...] = jnp.maximum(acc, 0.0).astype(o_ref.dtype)


def _conv_taps_stats_kernel(x_ref, w_ref, mask_ref, y_ref, stats_ref, *, taps):
    """conv2/3 pass 1: 4-tap s2d conv + per-tile masked channel sum / sumsq."""
    acc = _taps_matmul(x_ref[...], w_ref, taps)
    y_ref[...] = acc.astype(y_ref.dtype)
    mask = mask_ref[...]                                  # (tm, 1) 0/1, f32
    am = acc * mask                                       # exclude junk/pad rows
    s = jnp.sum(am, axis=0, keepdims=True)                # (1, C)
    ss = jnp.sum(am * acc, axis=0, keepdims=True)         # (1, C)
    stats_ref[...] = jnp.concatenate([s, ss], axis=0).reshape(1, 2, -1)


def _bn_relu_kernel(y_ref, stats_ref, g_ref, b_ref, o_ref, *, count, eps):
    """conv2/3 pass 2: apply exact batch-stats BN + ReLU, tiled over rows."""
    stats = stats_ref[...]
    mean = stats[0:1, :] / count
    var = stats[1:2, :] / count - mean * mean              # biased variance
    scale = g_ref[...] * jax.lax.rsqrt(var + eps)
    shift = b_ref[...] - mean * scale
    # NOTE: stats come from the f32 accumulator, normalization is applied to
    # the bf16-rounded y (tiny mismatch vs. PyTorch, documented).
    y = y_ref[...].astype(jnp.float32)
    o_ref[...] = jnp.maximum(y * scale + shift, 0.0).astype(o_ref.dtype)


def _tail_kernel(p_ref, w4_ref, g_ref, b_ref, fcw_ref, fcb_ref, o_ref, acc_ref,
                 *, eps):
    """K-tiled conv4 matmul -> BatchNorm (batch stats) -> ReLU -> Linear."""
    @pl.when(pl.program_id(0) == 0)
    def _():
        acc_ref[...] = jnp.zeros_like(acc_ref)

    acc_ref[...] += jnp.dot(p_ref[...], w4_ref[...],
                            preferred_element_type=jnp.float32)

    @pl.when(pl.program_id(0) == pl.num_programs(0) - 1)
    def _():
        y = acc_ref[...]
        mean = jnp.mean(y, axis=0, keepdims=True)
        var = jnp.mean(y * y, axis=0, keepdims=True) - mean * mean
        h = jnp.maximum(
            (y - mean) * jax.lax.rsqrt(var + eps) * g_ref[...] + b_ref[...], 0.0)
        out = jnp.dot(h.astype(fcw_ref.dtype), fcw_ref[...],
                      preferred_element_type=jnp.float32) + fcb_ref[...]
        o_ref[...] = out.astype(o_ref.dtype)


# ----------------------------------------------------------------------------
# Pallas wrappers
# ----------------------------------------------------------------------------
def _conv_pass(x_flat, w_taps, taps, *, tm, relu_only, mask_tile=None,
               out_dtype=jnp.bfloat16):
    M, c4 = x_flat.shape
    cout = w_taps.shape[2]
    assert M % tm == 0
    grid = (M // tm,)
    cp = pltpu.CompilerParams(dimension_semantics=("parallel",),
                              vmem_limit_bytes=VMEM_LIMIT)
    if relu_only:
        return pl.pallas_call(
            functools.partial(_conv_taps_relu_kernel, taps=taps),
            out_shape=jax.ShapeDtypeStruct((M, cout), out_dtype),
            grid=grid,
            in_specs=[pl.BlockSpec((tm, c4), lambda i: (i, 0)),
                      pl.BlockSpec((4, c4, cout), lambda i: (0, 0, 0))],
            out_specs=pl.BlockSpec((tm, cout), lambda i: (i, 0)),
            compiler_params=cp,
        )(x_flat, w_taps)

    n_tiles = M // tm
    y, stats_parts = pl.pallas_call(
        functools.partial(_conv_taps_stats_kernel, taps=taps),
        out_shape=(jax.ShapeDtypeStruct((M, cout), out_dtype),
                   jax.ShapeDtypeStruct((n_tiles, 2, cout), jnp.float32)),
        grid=grid,
        in_specs=[pl.BlockSpec((tm, c4), lambda i: (i, 0)),
                  pl.BlockSpec((4, c4, cout), lambda i: (0, 0, 0)),
                  pl.BlockSpec((tm, 1), lambda i: (0, 0))],
        out_specs=(pl.BlockSpec((tm, cout), lambda i: (i, 0)),
                   pl.BlockSpec((1, 2, cout), lambda i: (i, 0, 0))),
        compiler_params=cp,
    )(x_flat, w_taps, mask_tile)
    return y, stats_parts


def _bn_relu(y, stats, gamma, beta, *, tm, count, eps=EPS,
             out_dtype=jnp.bfloat16):
    M, C = y.shape
    assert M % tm == 0
    return pl.pallas_call(
        functools.partial(_bn_relu_kernel, count=float(count), eps=eps),
        out_shape=jax.ShapeDtypeStruct((M, C), out_dtype),
        grid=(M // tm,),
        in_specs=[pl.BlockSpec((tm, C), lambda i: (i, 0)),
                  pl.BlockSpec((2, C), lambda i: (0, 0)),
                  pl.BlockSpec((1, C), lambda i: (0, 0)),
                  pl.BlockSpec((1, C), lambda i: (0, 0))],
        out_specs=pl.BlockSpec((tm, C), lambda i: (i, 0)),
        compiler_params=pltpu.CompilerParams(
            dimension_semantics=("parallel",), vmem_limit_bytes=VMEM_LIMIT),
    )(y, stats, gamma, beta)


def fused_tail(p, w4, gamma, beta, fcw, fcb, *, tk=2048, eps=EPS):
    B, K = p.shape
    C = w4.shape[1]
    NZ = fcw.shape[1]
    tk = min(tk, K)
    assert K % tk == 0
    return pl.pallas_call(
        functools.partial(_tail_kernel, eps=eps),
        out_shape=jax.ShapeDtypeStruct((B, NZ), jnp.float32),
        grid=(K // tk,),
        in_specs=[pl.BlockSpec((B, tk), lambda k: (0, k)),
                  pl.BlockSpec((tk, C), lambda k: (k, 0)),
                  pl.BlockSpec((1, C), lambda k: (0, 0)),
                  pl.BlockSpec((1, C), lambda k: (0, 0)),
                  pl.BlockSpec((C, NZ), lambda k: (0, 0)),
                  pl.BlockSpec((1, NZ), lambda k: (0, 0))],
        out_specs=pl.BlockSpec((B, NZ), lambda k: (0, 0)),
        scratch_shapes=[pltpu.VMEM((B, C), jnp.float32)],
        compiler_params=pltpu.CompilerParams(
            dimension_semantics=("arbitrary",), vmem_limit_bytes=VMEM_LIMIT),
    )(p, w4, gamma, beta, fcw, fcb)


# ----------------------------------------------------------------------------
# JAX glue: pad + space-to-depth(2) (a 4x4/s2 conv becomes a 2x2/s1 conv),
# per-image row padding so Pallas tiles never straddle an image.
# ----------------------------------------------------------------------------
def _prep_s2d(x_nhwc):
    N, H, W, C = x_nhwc.shape
    assert H % 2 == 0 and W % 2 == 0, "s2d conv path assumes even spatial dims"
    Hs, Ws = H // 2 + 1, W // 2 + 1
    hw = Hs * Ws
    rpi = _round_up(hw, 8)                         # rows per image, sublane-aligned
    xp = jnp.pad(x_nhwc, ((0, 0), (1, 1), (1, 1), (0, 0)))
    xs = (xp.reshape(N, Hs, 2, Ws, 2, C)
            .transpose(0, 1, 3, 2, 4, 5)
            .reshape(N, hw, 4 * C))
    xs = jnp.pad(xs, ((0, 0), (0, rpi - hw), (0, 0))).reshape(N * rpi, 4 * C)
    taps = (0, 1, Ws, Ws + 1)                      # flat-row offsets of the 2x2 taps
    return xs, taps, Hs, Ws, rpi


def _extract_valid(y_ext, N, Hs, Ws, rpi):
    C = y_ext.shape[-1]
    y = y_ext.reshape(N, rpi, C)[:, :Hs * Ws, :].reshape(N, Hs, Ws, C)
    return y[:, :Hs - 1, :Ws - 1, :]               # drop the junk edge rows


def _row_mask(Hs, Ws, rpi, ipt):
    """(ipt*rpi, 1) f32 mask of rows that are real conv outputs."""
    idx = np.arange(rpi)
    valid = ((idx // Ws < Hs - 1) & (idx % Ws < Ws - 1)).astype(np.float32)
    return jnp.asarray(np.tile(valid, ipt).reshape(ipt * rpi, 1))


def _pick_ipt(N, rpi, target_rows):
    """Largest divisor of N with ipt*rpi <= target_rows (>= 1)."""
    cap = max(1, target_rows // rpi)
    for d in range(min(N, cap), 0, -1):
        if N % d == 0:
            return d
    return 1


def _conv_layer_relu(x, w_taps, N, block_rows):
    xs, taps, Hs, Ws, rpi = _prep_s2d(x)
    ipt = _pick_ipt(N, rpi, block_rows)
    y = _conv_pass(xs, w_taps, taps, tm=ipt * rpi, relu_only=True)
    return _extract_valid(y, N, Hs, Ws, rpi)


def _conv_layer_bn(x, w_taps, gamma, beta, N, block_rows, bn_block_rows):
    xs, taps, Hs, Ws, rpi = _prep_s2d(x)
    ipt = _pick_ipt(N, rpi, block_rows)
    mask = _row_mask(Hs, Ws, rpi, ipt)
    y, stats_parts = _conv_pass(xs, w_taps, taps, tm=ipt * rpi,
                                relu_only=False, mask_tile=mask)
    stats = jnp.sum(stats_parts, axis=0)           # (2, C): tiny cross-tile reduce
    count = N * (Hs - 1) * (Ws - 1)
    ipt2 = _pick_ipt(N, rpi, bn_block_rows)
    h = _bn_relu(y, stats, gamma, beta, tm=ipt2 * rpi, count=count)
    return _extract_valid(h, N, Hs, Ws, rpi)


# ----------------------------------------------------------------------------
# One-time weight preprocessing: repack into s2d tap layout, pad lane-dense,
# cast to bf16.  Done once, outside the hot path.
# ----------------------------------------------------------------------------
def _pack_conv_s2d(w, cin_pad, cout_pad):
    cout, cin, kh, kw = w.shape                     # PyTorch (Cout, Cin, 4, 4)
    wt = jnp.transpose(w, (2, 3, 1, 0))             # (kh, kw, Cin, Cout)
    wt = jnp.pad(wt, ((0, 0), (0, 0), (0, cin_pad - cin), (0, cout_pad - cout)))
    # kh = 2*bh + a, kw = 2*bw + b  ->  (bh, bw, a, b, c, o)
    wt = wt.reshape(2, 2, 2, 2, cin_pad, cout_pad).transpose(0, 2, 1, 3, 4, 5)
    return wt.reshape(4, 4 * cin_pad, cout_pad).astype(jnp.bfloat16)


def _pack_conv_flat(w, cin_pad, cout_pad):
    cout, cin, kh, kw = w.shape
    wt = jnp.transpose(w, (2, 3, 1, 0))
    wt = jnp.pad(wt, ((0, 0), (0, 0), (0, cin_pad - cin), (0, cout_pad - cout)))
    return wt.reshape(kh * kw * cin_pad, cout_pad).astype(jnp.bfloat16)


def prepare_params(params, n_channel, dim_h, n_z):
    cin1_pad = _round_up(n_channel, 8)
    chans = [dim_h, 2 * dim_h, 4 * dim_h, 8 * dim_h]
    cpad = [_round_up(c, LANE) for c in chans]
    nzp = _round_up(n_z, LANE)

    prep = {
        "w1": _pack_conv_s2d(params["w1"], cin1_pad, cpad[0]),
        "w2": _pack_conv_s2d(params["w2"], cpad[0], cpad[1]),
        "w3": _pack_conv_s2d(params["w3"], cpad[1], cpad[2]),
        "w4": _pack_conv_flat(params["w4"], cpad[2], cpad[3]),
    }
    for idx, (c, cp) in zip((2, 3, 4), zip(chans[1:], cpad[1:])):
        prep[f"g{idx}"] = jnp.pad(params[f"g{idx}"], (0, cp - c),
                                  constant_values=1.0).reshape(1, cp).astype(jnp.float32)
        prep[f"b{idx}"] = jnp.pad(params[f"b{idx}"], (0, cp - c)
                                  ).reshape(1, cp).astype(jnp.float32)

    fc_in = dim_h * 2 ** 3
    fcw = jnp.pad(params["fc_w"].T, ((0, cpad[3] - fc_in), (0, nzp - n_z)))
    prep["fc_w"] = fcw.astype(jnp.bfloat16)
    prep["fc_b"] = jnp.pad(params["fc_b"], (0, nzp - n_z)).reshape(1, nzp).astype(jnp.float32)
    return prep, {"cin1_pad": cin1_pad, "n_z": n_z}


# ----------------------------------------------------------------------------
# Encoder forward
# ----------------------------------------------------------------------------
def encoder_forward(x_nchw, prep, dims, *, conv1_rows=2048, conv_rows=512,
                    bn_rows=2048):
    N = x_nchw.shape[0]
    x = jnp.transpose(x_nchw, (0, 2, 3, 1))                      # NCHW -> NHWC
    x = jnp.pad(x, ((0, 0), (0, 0), (0, 0),
                    (0, dims["cin1_pad"] - x.shape[-1]))).astype(jnp.bfloat16)

    # conv1 + ReLU (no BN): bandwidth-bound, largest row tiles.
    x = _conv_layer_relu(x, prep["w1"], N, conv1_rows)

    # conv2 / conv3: fused conv + per-tile stats ("parallel"), then BN+ReLU.
    for idx in (2, 3):
        x = _conv_layer_bn(x, prep[f"w{idx}"], prep[f"g{idx}"], prep[f"b{idx}"],
                           N, conv_rows, bn_rows)

    # conv4 (1x1 spatial output: the 4x4 window covers the whole padded 4x4
    # input exactly once, so the "patch" is a free pad+reshape) + BN + ReLU +
    # squeeze + Linear, fused into one K-tiled kernel.
    assert x.shape[1] == 2 and x.shape[2] == 2, "expected 2x2 spatial before conv4"
    xp = jnp.pad(x, ((0, 0), (1, 1), (1, 1), (0, 0)))
    p = xp.reshape(N, -1)                                        # (B, 16*C) bf16
    out = fused_tail(p, prep["w4"], prep["g4"], prep["b4"],
                     prep["fc_w"], prep["fc_b"])
    return out[:, : dims["n_z"]]


# ----------------------------------------------------------------------------
# Deterministic parameter construction (PyTorch-like shapes)
# ----------------------------------------------------------------------------
def make_params(key, n_channel, dim_h, n_z):
    ks = jax.random.split(key, 6)
    chans = [n_channel, dim_h, dim_h * 2, dim_h * 4, dim_h * 8]
    params = {}
    for idx in range(4):
        c_in, c_out = chans[idx], chans[idx + 1]
        params[f"w{idx + 1}"] = (
            jax.random.normal(ks[idx], (c_out, c_in, 4, 4), jnp.float32) * 0.05)
    for idx, c in zip((2, 3, 4), (dim_h * 2, dim_h * 4, dim_h * 8)):
        params[f"g{idx}"] = jnp.ones((c,), jnp.float32)      # BatchNorm2d defaults
        params[f"b{idx}"] = jnp.zeros((c,), jnp.float32)
    fc_in = dim_h * 2 ** 3
    params["fc_w"] = jax.random.normal(ks[4], (n_z, fc_in), jnp.float32) * 0.05
    params["fc_b"] = jax.random.normal(ks[5], (n_z,), jnp.float32) * 0.05
    return params


if __name__ == "__main__":
    # Small shapes consistent with the module: 16x16 input so four stride-2
    # convs reduce spatial dims to 1x1 before squeeze(); dim_h scaled down.
    batch, n_channel_, dim_h_, n_z_, spatial = 2, 1, 16, 8, 16

    key = jax.random.PRNGKey(0)
    k_x, k_p = jax.random.split(key)
    x = jax.random.normal(k_x, (batch, n_channel_, spatial, spatial), jnp.float32)
    params = make_params(k_p, n_channel_, dim_h_, n_z_)
    prep, dims = prepare_params(params, n_channel_, dim_h_, n_z_)

    fwd = jax.jit(lambda xx: encoder_forward(xx, prep, dims))
    out = jax.block_until_ready(fwd(x))
    assert out.shape == (batch, n_z_), out.shape
    print("KERNEL_OK")
</pallas_src>

<mosaic_0001>
module attributes {stable_mosaic.version = 11 : i64} {
  func.func @_conv_taps_relu_kernel(%arg0: i32, %arg1: memref<176x32xbf16, #tpu.memory_space<vmem>>, %arg2: memref<4x32x128xbf16, #tpu.memory_space<vmem>>, %arg3: memref<176x128xbf16, #tpu.memory_space<vmem>>) attributes {dimension_semantics = [#tpu.dimension_semantics<parallel>], iteration_bounds = array<i64: 1>, scalar_prefetch = 0 : i64, scratch_operands = 0 : i64, tpu.core_type = #tpu.core_type<tc>, window_params = [{transform_indices = @transform_0, window_bounds = array<i64: 176, 32>}, {pipeline_mode = #tpu.pipeline_mode<synchronous>, transform_indices = @transform_1, window_bounds = array<i64: 4, 32, 128>}, {transform_indices = @transform_2, window_bounds = array<i64: 176, 128>}]} {
    %c0 = arith.constant 0 : index
    %c0_0 = arith.constant 0 : index
    %0 = vector.load %arg1[%c0, %c0_0] : memref<176x32xbf16, #tpu.memory_space<vmem>>, vector<176x32xbf16>
    %c0_1 = arith.constant 0 : index
    %c0_2 = arith.constant 0 : index
    %c0_3 = arith.constant 0 : index
    %1 = vector.load %arg2[%c0_1, %c0_2, %c0_3] : memref<4x32x128xbf16, #tpu.memory_space<vmem>>, vector<1x32x128xbf16>
    %2 = vector.shape_cast %1 : vector<1x32x128xbf16> to vector<32x128xbf16>
    %cst = arith.constant dense<0.000000e+00> : vector<176x128xf32>
    %3 = tpu.matmul %0, %2, %cst {dimension_numbers = #tpu.dot_dimension_numbers<[1], [0], [0], [1], [0, 0, 1, 1], [], []>} : vector<176x32xbf16>, vector<32x128xbf16>, vector<176x128xf32> -> vector<176x128xf32>
    %4 = vector.extract_strided_slice %0 {offsets = [1, 0], sizes = [175, 32], strides = [1, 1]} : vector<176x32xbf16> to vector<175x32xbf16>
    %5 = vector.extract_strided_slice %0 {offsets = [0, 0], sizes = [1, 32], strides = [1, 1]} : vector<176x32xbf16> to vector<1x32xbf16>
    %6 = tpu.concatenate %4, %5 in 0 : vector<175x32xbf16>, vector<1x32xbf16> -> vector<176x32xbf16>
    %c1 = arith.constant 1 : index
    %c0_4 = arith.constant 0 : index
    %c0_5 = arith.constant 0 : index
    %7 = vector.load %arg2[%c1, %c0_4, %c0_5] : memref<4x32x128xbf16, #tpu.memory_space<vmem>>, vector<1x32x128xbf16>
    %8 = vector.shape_cast %7 : vector<1x32x128xbf16> to vector<32x128xbf16>
    %cst_6 = arith.constant dense<0.000000e+00> : vector<176x128xf32>
    %9 = tpu.matmul %6, %8, %cst_6 {dimension_numbers = #tpu.dot_dimension_numbers<[1], [0], [0], [1], [0, 0, 1, 1], [], []>} : vector<176x32xbf16>, vector<32x128xbf16>, vector<176x128xf32> -> vector<176x128xf32>
    %10 = arith.addf %3, %9 : vector<176x128xf32>
    %11 = vector.extract_strided_slice %0 {offsets = [9, 0], sizes = [167, 32], strides = [1, 1]} : vector<176x32xbf16> to vector<167x32xbf16>
    %12 = vector.extract_strided_slice %0 {offsets = [0, 0], sizes = [9, 32], strides = [1, 1]} : vector<176x32xbf16> to vector<9x32xbf16>
    %13 = tpu.concatenate %11, %12 in 0 : vector<167x32xbf16>, vector<9x32xbf16> -> vector<176x32xbf16>
    %c2 = arith.constant 2 : index
    %c0_7 = arith.constant 0 : index
    %c0_8 = arith.constant 0 : index
    %14 = vector.load %arg2[%c2, %c0_7, %c0_8] : memref<4x32x128xbf16, #tpu.memory_space<vmem>>, vector<1x32x128xbf16>
    %15 = vector.shape_cast %14 : vector<1x32x128xbf16> to vector<32x128xbf16>
    %cst_9 = arith.constant dense<0.000000e+00> : vector<176x128xf32>
    %16 = tpu.matmul %13, %15, %cst_9 {dimension_numbers = #tpu.dot_dimension_numbers<[1], [0], [0], [1], [0, 0, 1, 1], [], []>} : vector<176x32xbf16>, vector<32x128xbf16>, vector<176x128xf32> -> vector<176x128xf32>
    %17 = arith.addf %10, %16 : vector<176x128xf32>
    %18 = vector.extract_strided_slice %0 {offsets = [10, 0], sizes = [166, 32], strides = [1, 1]} : vector<176x32xbf16> to vector<166x32xbf16>
    %19 = vector.extract_strided_slice %0 {offsets = [0, 0], sizes = [10, 32], strides = [1, 1]} : vector<176x32xbf16> to vector<10x32xbf16>
    %20 = tpu.concatenate %18, %19 in 0 : vector<166x32xbf16>, vector<10x32xbf16> -> vector<176x32xbf16>
    %c3 = arith.constant 3 : index
    %c0_10 = arith.constant 0 : index
    %c0_11 = arith.constant 0 : index
    %21 = vector.load %arg2[%c3, %c0_10, %c0_11] : memref<4x32x128xbf16, #tpu.memory_space<vmem>>, vector<1x32x128xbf16>
    %22 = vector.shape_cast %21 : vector<1x32x128xbf16> to vector<32x128xbf16>
    %cst_12 = arith.constant dense<0.000000e+00> : vector<176x128xf32>
    %23 = tpu.matmul %20, %22, %cst_12 {dimension_numbers = #tpu.dot_dimension_numbers<[1], [0], [0], [1], [0, 0, 1, 1], [], []>} : vector<176x32xbf16>, vector<32x128xbf16>, vector<176x128xf32> -> vector<176x128xf32>
    %24 = arith.addf %17, %23 : vector<176x128xf32>
    %cst_13 = arith.constant 0.000000e+00 : f32
    %25 = vector.broadcast %cst_13 : f32 to vector<176x128xf32>
    %26 = arith.maximumf %24, %25 : vector<176x128xf32>
    %27 = arith.truncf %26 : vector<176x128xf32> to vector<176x128xbf16>
    %c0_14 = arith.constant 0 : index
    %c0_15 = arith.constant 0 : index
    %28 = vector.load %arg3[%c0_14, %c0_15] : memref<176x128xbf16, #tpu.memory_space<vmem>>, vector<176x128xbf16>
    tpu.vector_store %arg3[%c0_14, %c0_15], %27 {strides = array<i32>} : memref<176x128xbf16, #tpu.memory_space<vmem>>, vector<176x128xbf16>,
    return
  }
  func.func @transform_0(%arg0: i32) -> (i32, i32) {
    %c0_i32 = arith.constant 0 : i32
    %c0_i32_0 = arith.constant 0 : i32
    return %arg0, %c0_i32 : i32, i32
  }
  func.func @transform_1(%arg0: i32) -> (i32, i32, i32) {
    %c0_i32 = arith.constant 0 : i32
    %c0_i32_0 = arith.constant 0 : i32
    %c0_i32_1 = arith.constant 0 : i32
    %c0_i32_2 = arith.constant 0 : i32
    return %c0_i32, %c0_i32_0, %c0_i32_1 : i32, i32, i32
  }
  func.func @transform_2(%arg0: i32) -> (i32, i32) {
    %c0_i32 = arith.constant 0 : i32
    %c0_i32_0 = arith.constant 0 : i32
    return %arg0, %c0_i32 : i32, i32
  }
}

module attributes {stable_mosaic.version = 11 : i64} {
  func.func @_conv_taps_stats_kernel(%arg0: i32, %arg1: memref<64x512xbf16, #tpu.memory_space<vmem>>, %arg2: memref<4x512x128xbf16, #tpu.memory_space<vmem>>, %arg3: memref<64x1xf32, #tpu.memory_space<vmem>>, %arg4: memref<64x128xbf16, #tpu.memory_space<vmem>>, %arg5: memref<1x2x128xf32, #tpu.memory_space<vmem>>) attributes {dimension_semantics = [#tpu.dimension_semantics<parallel>], iteration_bounds = array<i64: 1>, scalar_prefetch = 0 : i64, scratch_operands = 0 : i64, tpu.core_type = #tpu.core_type<tc>, window_params = [{transform_indices = @transform_0, window_bounds = array<i64: 64, 512>}, {pipeline_mode = #tpu.pipeline_mode<synchronous>, transform_indices = @transform_1, window_bounds = array<i64: 4, 512, 128>}, {pipeline_mode = #tpu.pipeline_mode<synchronous>, transform_indices = @transform_2, window_bounds = array<i64: 64, 1>}, {transform_indices = @transform_3, window_bounds = array<i64: 64, 128>}, {transform_indices = @transform_4, window_bounds = array<i64: 1, 2, 128>}]} {
    %c0 = arith.constant 0 : index
    %c0_0 = arith.constant 0 : index
    %0 = vector.load %arg1[%c0, %c0_0] : memref<64x512xbf16, #tpu.memory_space<vmem>>, vector<64x512xbf16>
    %c0_1 = arith.constant 0 : index
    %c0_2 = arith.constant 0 : index
    %c0_3 = arith.constant 0 : index
    %1 = vector.load %arg2[%c0_1, %c0_2, %c0_3] : memref<4x512x128xbf16, #tpu.memory_space<vmem>>, vector<1x512x128xbf16>
    %2 = vector.shape_cast %1 : vector<1x512x128xbf16> to vector<512x128xbf16>
    %cst = arith.constant dense<0.000000e+00> : vector<64x128xf32>
    %3 = tpu.matmul %0, %2, %cst {dimension_numbers = #tpu.dot_dimension_numbers<[1], [0], [0], [1], [0, 0, 1, 1], [], []>} : vector<64x512xbf16>, vector<512x128xbf16>, vector<64x128xf32> -> vector<64x128xf32>
    %4 = vector.extract_strided_slice %0 {offsets = [1, 0], sizes = [63, 512], strides = [1, 1]} : vector<64x512xbf16> to vector<63x512xbf16>
    %5 = vector.extract_strided_slice %0 {offsets = [0, 0], sizes = [1, 512], strides = [1, 1]} : vector<64x512xbf16> to vector<1x512xbf16>
    %6 = tpu.concatenate %4, %5 in 0 : vector<63x512xbf16>, vector<1x512xbf16> -> vector<64x512xbf16>
    %c1 = arith.constant 1 : index
    %c0_4 = arith.constant 0 : index
    %c0_5 = arith.constant 0 : index
    %7 = vector.load %arg2[%c1, %c0_4, %c0_5] : memref<4x512x128xbf16, #tpu.memory_space<vmem>>, vector<1x512x128xbf16>
    %8 = vector.shape_cast %7 : vector<1x512x128xbf16> to vector<512x128xbf16>
    %cst_6 = arith.constant dense<0.000000e+00> : vector<64x128xf32>
    %9 = tpu.matmul %6, %8, %cst_6 {dimension_numbers = #tpu.dot_dimension_numbers<[1], [0], [0], [1], [0, 0, 1, 1], [], []>} : vector<64x512xbf16>, vector<512x128xbf16>, vector<64x128xf32> -> vector<64x128xf32>
    %10 = arith.addf %3, %9 : vector<64x128xf32>
    %11 = vector.extract_strided_slice %0 {offsets = [5, 0], sizes = [59, 512], strides = [1, 1]} : vector<64x512xbf16> to vector<59x512xbf16>
    %12 = vector.extract_strided_slice %0 {offsets = [0, 0], sizes = [5, 512], strides = [1, 1]} : vector<64x512xbf16> to vector<5x512xbf16>
    %13 = tpu.concatenate %11, %12 in 0 : vector<59x512xbf16>, vector<5x512xbf16> -> vector<64x512xbf16>
    %c2 = arith.constant 2 : index
    %c0_7 = arith.constant 0 : index
    %c0_8 = arith.constant 0 : index
    %14 = vector.load %arg2[%c2, %c0_7, %c0_8] : memref<4x512x128xbf16, #tpu.memory_space<vmem>>, vector<1x512x128xbf16>
    %15 = vector.shape_cast %14 : vector<1x512x128xbf16> to vector<512x128xbf16>
    %cst_9 = arith.constant dense<0.000000e+00> : vector<64x128xf32>
    %16 = tpu.matmul %13, %15, %cst_9 {dimension_numbers = #tpu.dot_dimension_numbers<[1], [0], [0], [1], [0, 0, 1, 1], [], []>} : vector<64x512xbf16>, vector<512x128xbf16>, vector<64x128xf32> -> vector<64x128xf32>
    %17 = arith.addf %10, %16 : vector<64x128xf32>
    %18 = vector.extract_strided_slice %0 {offsets = [6, 0], sizes = [58, 512], strides = [1, 1]} : vector<64x512xbf16> to vector<58x512xbf16>
    %19 = vector.extract_strided_slice %0 {offsets = [0, 0], sizes = [6, 512], strides = [1, 1]} : vector<64x512xbf16> to vector<6x512xbf16>
    %20 = tpu.concatenate %18, %19 in 0 : vector<58x512xbf16>, vector<6x512xbf16> -> vector<64x512xbf16>
    %c3 = arith.constant 3 : index
    %c0_10 = arith.constant 0 : index
    %c0_11 = arith.constant 0 : index
    %21 = vector.load %arg2[%c3, %c0_10, %c0_11] : memref<4x512x128xbf16, #tpu.memory_space<vmem>>, vector<1x512x128xbf16>
    %22 = vector.shape_cast %21 : vector<1x512x128xbf16> to vector<512x128xbf16>
    %cst_12 = arith.constant dense<0.000000e+00> : vector<64x128xf32>
    %23 = tpu.matmul %20, %22, %cst_12 {dimension_numbers = #tpu.dot_dimension_numbers<[1], [0], [0], [1], [0, 0, 1, 1], [], []>} : vector<64x512xbf16>, vector<512x128xbf16>, vector<64x128xf32> -> vector<64x128xf32>
    %24 = arith.addf %17, %23 : vector<64x128xf32>
    %25 = arith.truncf %24 : vector<64x128xf32> to vector<64x128xbf16>
    %c0_13 = arith.constant 0 : index
    %c0_14 = arith.constant 0 : index
    %26 = vector.load %arg4[%c0_13, %c0_14] : memref<64x128xbf16, #tpu.memory_space<vmem>>, vector<64x128xbf16>
    tpu.vector_store %arg4[%c0_13, %c0_14], %25 {strides = array<i32>} : memref<64x128xbf16, #tpu.memory_space<vmem>>, vector<64x128xbf16>,
    %c0_15 = arith.constant 0 : index
    %c0_16 = arith.constant 0 : index
    %27 = vector.load %arg3[%c0_15, %c0_16] : memref<64x1xf32, #tpu.memory_space<vmem>>, vector<64x1xf32>
    %28 = vector.broadcast %27 : vector<64x1xf32> to vector<64x128xf32>
    %29 = arith.mulf %24, %28 : vector<64x128xf32>
    %cst_17 = arith.constant dense<0.000000e+00> : vector<128xf32>
    %30 = vector.multi_reduction <add>, %29, %cst_17 [0] : vector<64x128xf32> to vector<128xf32>
    %31 = vector.shape_cast %30 : vector<128xf32> to vector<1x128xf32>
    %32 = arith.mulf %29, %24 : vector<64x128xf32>
    %cst_18 = arith.constant dense<0.000000e+00> : vector<128xf32>
    %33 = vector.multi_reduction <add>, %32, %cst_18 [0] : vector<64x128xf32> to vector<128xf32>
    %34 = vector.shape_cast %33 : vector<128xf32> to vector<1x128xf32>
    %35 = tpu.concatenate %31, %34 in 0 : vector<1x128xf32>, vector<1x128xf32> -> vector<2x128xf32>
    %36 = vector.shape_cast %35 : vector<2x128xf32> to vector<1x2x128xf32>
    %c0_19 = arith.constant 0 : index
    %c0_20 = arith.constant 0 : index
    %c0_21 = arith.constant 0 : index
    %37 = vector.load %arg5[%c0_19, %c0_20, %c0_21] : memref<1x2x128xf32, #tpu.memory_space<vmem>>, vector<1x2x128xf32>
    tpu.vector_store %arg5[%c0_19, %c0_20, %c0_21], %36 {strides = array<i32>} : memref<1x2x128xf32, #tpu.memory_space<vmem>>, vector<1x2x128xf32>,
    return
  }
  func.func @transform_0(%arg0: i32) -> (i32, i32) {
    %c0_i32 = arith.constant 0 : i32
    %c0_i32_0 = arith.constant 0 : i32
    return %arg0, %c0_i32 : i32, i32
  }
  func.func @transform_1(%arg0: i32) -> (i32, i32, i32) {
    %c0_i32 = arith.constant 0 : i32
    %c0_i32_0 = arith.constant 0 : i32
    %c0_i32_1 = arith.constant 0 : i32
    %c0_i32_2 = arith.constant 0 : i32
    return %c0_i32, %c0_i32_0, %c0_i32_1 : i32, i32, i32
  }
  func.func @transform_2(%arg0: i32) -> (i32, i32) {
    %c0_i32 = arith.constant 0 : i32
    %c0_i32_0 = arith.constant 0 : i32
    %c0_i32_1 = arith.constant 0 : i32
    return %c0_i32, %c0_i32_0 : i32, i32
  }
  func.func @transform_3(%arg0: i32) -> (i32, i32) {
    %c0_i32 = arith.constant 0 : i32
    %c0_i32_0 = arith.constant 0 : i32
    return %arg0, %c0_i32 : i32, i32
  }
  func.func @transform_4(%arg0: i32) -> (i32, i32, i32) {
    %c0_i32 = arith.constant 0 : i32
    %c0_i32_0 = arith.constant 0 : i32
    %c0_i32_1 = arith.constant 0 : i32
    return %arg0, %c0_i32, %c0_i32_0 : i32, i32, i32
  }
}

module attributes {stable_mosaic.version = 11 : i64} {
  func.func @_bn_relu_kernel(%arg0: i32, %arg1: memref<64x128xbf16, #tpu.memory_space<vmem>>, %arg2: memref<2x128xf32, #tpu.memory_space<vmem>>, %arg3: memref<1x128xf32, #tpu.memory_space<vmem>>, %arg4: memref<1x128xf32, #tpu.memory_space<vmem>>, %arg5: memref<64x128xbf16, #tpu.memory_space<vmem>>) attributes {dimension_semantics = [#tpu.dimension_semantics<parallel>], iteration_bounds = array<i64: 1>, scalar_prefetch = 0 : i64, scratch_operands = 0 : i64, tpu.core_type = #tpu.core_type<tc>, window_params = [{transform_indices = @transform_0, window_bounds = array<i64: 64, 128>}, {pipeline_mode = #tpu.pipeline_mode<synchronous>, transform_indices = @transform_1, window_bounds = array<i64: 2, 128>}, {pipeline_mode = #tpu.pipeline_mode<synchronous>, transform_indices = @transform_2, window_bounds = array<i64: 1, 128>}, {pipeline_mode = #tpu.pipeline_mode<synchronous>, transform_indices = @transform_3, window_bounds = array<i64: 1, 128>}, {transform_indices = @transform_4, window_bounds = array<i64: 64, 128>}]} {
    %c0 = arith.constant 0 : index
    %c0_0 = arith.constant 0 : index
    %0 = vector.load %arg2[%c0, %c0_0] : memref<2x128xf32, #tpu.memory_space<vmem>>, vector<2x128xf32>
    %1 = vector.extract_strided_slice %0 {offsets = [0, 0], sizes = [1, 128], strides = [1, 1]} : vector<2x128xf32> to vector<1x128xf32>
    %cst = arith.constant 3.200000e+01 : f32
    %2 = vector.broadcast %cst : f32 to vector<1x128xf32>
    %3 = arith.divf %1, %2 : vector<1x128xf32>
    %4 = vector.extract_strided_slice %0 {offsets = [1, 0], sizes = [1, 128], strides = [1, 1]} : vector<2x128xf32> to vector<1x128xf32>
    %cst_1 = arith.constant 3.200000e+01 : f32
    %5 = vector.broadcast %cst_1 : f32 to vector<1x128xf32>
    %6 = arith.divf %4, %5 : vector<1x128xf32>
    %7 = arith.mulf %3, %3 : vector<1x128xf32>
    %8 = arith.subf %6, %7 : vector<1x128xf32>
    %c0_2 = arith.constant 0 : index
    %c0_3 = arith.constant 0 : index
    %9 = vector.load %arg3[%c0_2, %c0_3] : memref<1x128xf32, #tpu.memory_space<vmem>>, vector<1x128xf32>
    %cst_4 = arith.constant 9.99999974E-6 : f32
    %10 = vector.broadcast %cst_4 : f32 to vector<1x128xf32>
    %11 = arith.addf %8, %10 : vector<1x128xf32>
    %12 = math.rsqrt %11 : vector<1x128xf32>
    %13 = arith.mulf %9, %12 : vector<1x128xf32>
    %c0_5 = arith.constant 0 : index
    %c0_6 = arith.constant 0 : index
    %14 = vector.load %arg4[%c0_5, %c0_6] : memref<1x128xf32, #tpu.memory_space<vmem>>, vector<1x128xf32>
    %15 = arith.mulf %3, %13 : vector<1x128xf32>
    %16 = arith.subf %14, %15 : vector<1x128xf32>
    %c0_7 = arith.constant 0 : index
    %c0_8 = arith.constant 0 : index
    %17 = vector.load %arg1[%c0_7, %c0_8] : memref<64x128xbf16, #tpu.memory_space<vmem>>, vector<64x128xbf16>
    %18 = arith.extf %17 : vector<64x128xbf16> to vector<64x128xf32>
    %19 = vector.broadcast %13 : vector<1x128xf32> to vector<64x128xf32>
    %20 = arith.mulf %18, %19 : vector<64x128xf32>
    %21 = vector.broadcast %16 : vector<1x128xf32> to vector<64x128xf32>
    %22 = arith.addf %20, %21 : vector<64x128xf32>
    %cst_9 = arith.constant 0.000000e+00 : f32
    %23 = vector.broadcast %cst_9 : f32 to vector<64x128xf32>
    %24 = arith.maximumf %22, %23 : vector<64x128xf32>
    %25 = arith.truncf %24 : vector<64x128xf32> to vector<64x128xbf16>
    %c0_10 = arith.constant 0 : index
    %c0_11 = arith.constant 0 : index
    %26 = vector.load %arg5[%c0_10, %c0_11] : memref<64x128xbf16, #tpu.memory_space<vmem>>, vector<64x128xbf16>
    tpu.vector_store %arg5[%c0_10, %c0_11], %25 {strides = array<i32>} : memref<64x128xbf16, #tpu.memory_space<vmem>>, vector<64x128xbf16>,
    return
  }
  func.func @transform_0(%arg0: i32) -> (i32, i32) {
    %c0_i32 = arith.constant 0 : i32
    %c0_i32_0 = arith.constant 0 : i32
    return %arg0, %c0_i32 : i32, i32
  }
  func.func @transform_1(%arg0: i32) -> (i32, i32) {
    %c0_i32 = arith.constant 0 : i32
    %c0_i32_0 = arith.constant 0 : i32
    %c0_i32_1 = arith.constant 0 : i32
    return %c0_i32, %c0_i32_0 : i32, i32
  }
  func.func @transform_2(%arg0: i32) -> (i32, i32) {
    %c0_i32 = arith.constant 0 : i32
    %c0_i32_0 = arith.constant 0 : i32
    %c0_i32_1 = arith.constant 0 : i32
    return %c0_i32, %c0_i32_0 : i32, i32
  }
  func.func @transform_3(%arg0: i32) -> (i32, i32) {
    %c0_i32 = arith.constant 0 : i32
    %c0_i32_0 = arith.constant 0 : i32
    %c0_i32_1 = arith.constant 0 : i32
    return %c0_i32, %c0_i32_0 : i32, i32
  }
  func.func @transform_4(%arg0: i32) -> (i32, i32) {
    %c0_i32 = arith.constant 0 : i32
    %c0_i32_0 = arith.constant 0 : i32
    return %arg0, %c0_i32 : i32, i32
  }
}

module attributes {stable_mosaic.version = 11 : i64} {
  func.func @_bn_relu_kernel(%arg0: i32, %arg1: memref<32x128xbf16, #tpu.memory_space<vmem>>, %arg2: memref<2x128xf32, #tpu.memory_space<vmem>>, %arg3: memref<1x128xf32, #tpu.memory_space<vmem>>, %arg4: memref<1x128xf32, #tpu.memory_space<vmem>>, %arg5: memref<32x128xbf16, #tpu.memory_space<vmem>>) attributes {dimension_semantics = [#tpu.dimension_semantics<parallel>], iteration_bounds = array<i64: 1>, scalar_prefetch = 0 : i64, scratch_operands = 0 : i64, tpu.core_type = #tpu.core_type<tc>, window_params = [{transform_indices = @transform_0, window_bounds = array<i64: 32, 128>}, {pipeline_mode = #tpu.pipeline_mode<synchronous>, transform_indices = @transform_1, window_bounds = array<i64: 2, 128>}, {pipeline_mode = #tpu.pipeline_mode<synchronous>, transform_indices = @transform_2, window_bounds = array<i64: 1, 128>}, {pipeline_mode = #tpu.pipeline_mode<synchronous>, transform_indices = @transform_3, window_bounds = array<i64: 1, 128>}, {transform_indices = @transform_4, window_bounds = array<i64: 32, 128>}]} {
    %c0 = arith.constant 0 : index
    %c0_0 = arith.constant 0 : index
    %0 = vector.load %arg2[%c0, %c0_0] : memref<2x128xf32, #tpu.memory_space<vmem>>, vector<2x128xf32>
    %1 = vector.extract_strided_slice %0 {offsets = [0, 0], sizes = [1, 128], strides = [1, 1]} : vector<2x128xf32> to vector<1x128xf32>
    %cst = arith.constant 8.000000e+00 : f32
    %2 = vector.broadcast %cst : f32 to vector<1x128xf32>
    %3 = arith.divf %1, %2 : vector<1x128xf32>
    %4 = vector.extract_strided_slice %0 {offsets = [1, 0], sizes = [1, 128], strides = [1, 1]} : vector<2x128xf32> to vector<1x128xf32>
    %cst_1 = arith.constant 8.000000e+00 : f32
    %5 = vector.broadcast %cst_1 : f32 to vector<1x128xf32>
    %6 = arith.divf %4, %5 : vector<1x128xf32>
    %7 = arith.mulf %3, %3 : vector<1x128xf32>
    %8 = arith.subf %6, %7 : vector<1x128xf32>
    %c0_2 = arith.constant 0 : index
    %c0_3 = arith.constant 0 : index
    %9 = vector.load %arg3[%c0_2, %c0_3] : memref<1x128xf32, #tpu.memory_space<vmem>>, vector<1x128xf32>
    %cst_4 = arith.constant 9.99999974E-6 : f32
    %10 = vector.broadcast %cst_4 : f32 to vector<1x128xf32>
    %11 = arith.addf %8, %10 : vector<1x128xf32>
    %12 = math.rsqrt %11 : vector<1x128xf32>
    %13 = arith.mulf %9, %12 : vector<1x128xf32>
    %c0_5 = arith.constant 0 : index
    %c0_6 = arith.constant 0 : index
    %14 = vector.load %arg4[%c0_5, %c0_6] : memref<1x128xf32, #tpu.memory_space<vmem>>, vector<1x128xf32>
    %15 = arith.mulf %3, %13 : vector<1x128xf32>
    %16 = arith.subf %14, %15 : vector<1x128xf32>
    %c0_7 = arith.constant 0 : index
    %c0_8 = arith.constant 0 : index
    %17 = vector.load %arg1[%c0_7, %c0_8] : memref<32x128xbf16, #tpu.memory_space<vmem>>, vector<32x128xbf16>
    %18 = arith.extf %17 : vector<32x128xbf16> to vector<32x128xf32>
    %19 = vector.broadcast %13 : vector<1x128xf32> to vector<32x128xf32>
    %20 = arith.mulf %18, %19 : vector<32x128xf32>
    %21 = vector.broadcast %16 : vector<1x128xf32> to vector<32x128xf32>
    %22 = arith.addf %20, %21 : vector<32x128xf32>
    %cst_9 = arith.constant 0.000000e+00 : f32
    %23 = vector.broadcast %cst_9 : f32 to vector<32x128xf32>
    %24 = arith.maximumf %22, %23 : vector<32x128xf32>
    %25 = arith.truncf %24 : vector<32x128xf32> to vector<32x128xbf16>
    %c0_10 = arith.constant 0 : index
    %c0_11 = arith.constant 0 : index
    %26 = vector.load %arg5[%c0_10, %c0_11] : memref<32x128xbf16, #tpu.memory_space<vmem>>, vector<32x128xbf16>
    tpu.vector_store %arg5[%c0_10, %c0_11], %25 {strides = array<i32>} : memref<32x128xbf16, #tpu.memory_space<vmem>>, vector<32x128xbf16>,
    return
  }
  func.func @transform_0(%arg0: i32) -> (i32, i32) {
    %c0_i32 = arith.constant 0 : i32
    %c0_i32_0 = arith.constant 0 : i32
    return %arg0, %c0_i32 : i32, i32
  }
  func.func @transform_1(%arg0: i32) -> (i32, i32) {
    %c0_i32 = arith.constant 0 : i32
    %c0_i32_0 = arith.constant 0 : i32
    %c0_i32_1 = arith.constant 0 : i32
    return %c0_i32, %c0_i32_0 : i32, i32
  }
  func.func @transform_2(%arg0: i32) -> (i32, i32) {
    %c0_i32 = arith.constant 0 : i32
    %c0_i32_0 = arith.constant 0 : i32
    %c0_i32_1 = arith.constant 0 : i32
    return %c0_i32, %c0_i32_0 : i32, i32
  }
  func.func @transform_3(%arg0: i32) -> (i32, i32) {
    %c0_i32 = arith.constant 0 : i32
    %c0_i32_0 = arith.constant 0 : i32
    %c0_i32_1 = arith.constant 0 : i32
    return %c0_i32, %c0_i32_0 : i32, i32
  }
  func.func @transform_4(%arg0: i32) -> (i32, i32) {
    %c0_i32 = arith.constant 0 : i32
    %c0_i32_0 = arith.constant 0 : i32
    return %arg0, %c0_i32 : i32, i32
  }
}

module attributes {stable_mosaic.version = 11 : i64} {
  func.func @_tail_kernel(%arg0: i32, %arg1: memref<2x2048xbf16, #tpu.memory_space<vmem>>, %arg2: memref<2048x128xbf16, #tpu.memory_space<vmem>>, %arg3: memref<1x128xf32, #tpu.memory_space<vmem>>, %arg4: memref<1x128xf32, #tpu.memory_space<vmem>>, %arg5: memref<128x128xbf16, #tpu.memory_space<vmem>>, %arg6: memref<1x128xf32, #tpu.memory_space<vmem>>, %arg7: memref<2x128xf32, #tpu.memory_space<vmem>>, %arg8: memref<2x128xf32, #tpu.memory_space<vmem>>) attributes {dimension_semantics = [#tpu.dimension_semantics<arbitrary>], iteration_bounds = array<i64: 1>, scalar_prefetch = 0 : i64, scratch_operands = 1 : i64, tpu.core_type = #tpu.core_type<tc>, window_params = [{transform_indices = @transform_0, window_bounds = array<i64: 2, 2048>}, {transform_indices = @transform_1, window_bounds = array<i64: 2048, 128>}, {pipeline_mode = #tpu.pipeline_mode<synchronous>, transform_indices = @transform_2, window_bounds = array<i64: 1, 128>}, {pipeline_mode = #tpu.pipeline_mode<synchronous>, transform_indices = @transform_3, window_bounds = array<i64: 1, 128>}, {pipeline_mode = #tpu.pipeline_mode<synchronous>, transform_indices = @transform_4, window_bounds = array<i64: 128, 128>}, {pipeline_mode = #tpu.pipeline_mode<synchronous>, transform_indices = @transform_5, window_bounds = array<i64: 1, 128>}, {pipeline_mode = #tpu.pipeline_mode<synchronous>, transform_indices = @transform_6, window_bounds = array<i64: 2, 128>}]} {
    %c0_i32 = arith.constant 0 : i32
    %0 = arith.cmpi eq, %arg0, %c0_i32 : i32
    %1 = arith.extui %0 : i1 to i32
    %c0_i32_0 = arith.constant 0 : i32
    %2 = arith.cmpi ne, %1, %c0_i32_0 : i32
    scf.if %2 {
      %cst_10 = arith.constant 0.000000e+00 : f32
      %12 = vector.broadcast %cst_10 : f32 to vector<2x128xf32>
      %c0_11 = arith.constant 0 : index
      %c0_12 = arith.constant 0 : index
      %13 = vector.load %arg8[%c0_11, %c0_12] : memref<2x128xf32, #tpu.memory_space<vmem>>, vector<2x128xf32>
      tpu.vector_store %arg8[%c0_11, %c0_12], %12 {strides = array<i32>} : memref<2x128xf32, #tpu.memory_space<vmem>>, vector<2x128xf32>,
    } else {
    }
    %c0 = arith.constant 0 : index
    %c0_1 = arith.constant 0 : index
    %3 = vector.load %arg8[%c0, %c0_1] : memref<2x128xf32, #tpu.memory_space<vmem>>, vector<2x128xf32>
    %c0_2 = arith.constant 0 : index
    %c0_3 = arith.constant 0 : index
    %4 = vector.load %arg1[%c0_2, %c0_3] : memref<2x2048xbf16, #tpu.memory_space<vmem>>, vector<2x2048xbf16>
    %c0_4 = arith.constant 0 : index
    %c0_5 = arith.constant 0 : index
    %5 = vector.load %arg2[%c0_4, %c0_5] : memref<2048x128xbf16, #tpu.memory_space<vmem>>, vector<2048x128xbf16>
    %cst = arith.constant dense<0.000000e+00> : vector<2x128xf32>
    %6 = tpu.matmul %4, %5, %cst {dimension_numbers = #tpu.dot_dimension_numbers<[1], [0], [0], [1], [0, 0, 1, 1], [], []>} : vector<2x2048xbf16>, vector<2048x128xbf16>, vector<2x128xf32> -> vector<2x128xf32>
    %7 = arith.addf %3, %6 : vector<2x128xf32>
    %c0_6 = arith.constant 0 : index
    %c0_7 = arith.constant 0 : index
    %8 = vector.load %arg8[%c0_6, %c0_7] : memref<2x128xf32, #tpu.memory_space<vmem>>, vector<2x128xf32>
    tpu.vector_store %arg8[%c0_6, %c0_7], %7 {strides = array<i32>} : memref<2x128xf32, #tpu.memory_space<vmem>>, vector<2x128xf32>,
    %c0_i32_8 = arith.constant 0 : i32
    %9 = arith.cmpi eq, %arg0, %c0_i32_8 : i32
    %10 = arith.extui %9 : i1 to i32
    %c0_i32_9 = arith.constant 0 : i32
    %11 = arith.cmpi ne, %10, %c0_i32_9 : i32
    scf.if %11 {
      %c0_10 = arith.constant 0 : index
      %c0_11 = arith.constant 0 : index
      %12 = vector.load %arg8[%c0_10, %c0_11] : memref<2x128xf32, #tpu.memory_space<vmem>>, vector<2x128xf32>
      %cst_12 = arith.constant dense<0.000000e+00> : vector<128xf32>
      %13 = vector.multi_reduction <add>, %12, %cst_12 [0] : vector<2x128xf32> to vector<128xf32>
      %14 = vector.shape_cast %13 : vector<128xf32> to vector<1x128xf32>
      %cst_13 = arith.constant 2.000000e+00 : f32
      %15 = vector.broadcast %cst_13 : f32 to vector<1x128xf32>
      %16 = arith.divf %14, %15 : vector<1x128xf32>
      %17 = arith.mulf %12, %12 : vector<2x128xf32>
      %cst_14 = arith.constant dense<0.000000e+00> : vector<128xf32>
      %18 = vector.multi_reduction <add>, %17, %cst_14 [0] : vector<2x128xf32> to vector<128xf32>
      %19 = vector.shape_cast %18 : vector<128xf32> to vector<1x128xf32>
      %cst_15 = arith.constant 2.000000e+00 : f32
      %20 = vector.broadcast %cst_15 : f32 to vector<1x128xf32>
      %21 = arith.divf %19, %20 : vector<1x128xf32>
      %22 = arith.mulf %16, %16 : vector<1x128xf32>
      %23 = arith.subf %21, %22 : vector<1x128xf32>
      %24 = vector.broadcast %16 : vector<1x128xf32> to vector<2x128xf32>
      %25 = arith.subf %12, %24 : vector<2x128xf32>
      %cst_16 = arith.constant 9.99999974E-6 : f32
      %26 = vector.broadcast %cst_16 : f32 to vector<1x128xf32>
      %27 = arith.addf %23, %26 : vector<1x128xf32>
      %28 = math.rsqrt %27 : vector<1x128xf32>
      %29 = vector.broadcast %28 : vector<1x128xf32> to vector<2x128xf32>
      %30 = arith.mulf %25, %29 : vector<2x128xf32>
      %c0_17 = arith.constant 0 : index
      %c0_18 = arith.constant 0 : index
      %31 = vector.load %arg3[%c0_17, %c0_18] : memref<1x128xf32, #tpu.memory_space<vmem>>, vector<1x128xf32>
      %32 = vector.broadcast %31 : vector<1x128xf32> to vector<2x128xf32>
      %33 = arith.mulf %30, %32 : vector<2x128xf32>
      %c0_19 = arith.constant 0 : index
      %c0_20 = arith.constant 0 : index
      %34 = vector.load %arg4[%c0_19, %c0_20] : memref<1x128xf32, #tpu.memory_space<vmem>>, vector<1x128xf32>
      %35 = vector.broadcast %34 : vector<1x128xf32> to vector<2x128xf32>
      %36 = arith.addf %33, %35 : vector<2x128xf32>
      %cst_21 = arith.constant 0.000000e+00 : f32
      %37 = vector.broadcast %cst_21 : f32 to vector<2x128xf32>
      %38 = arith.maximumf %36, %37 : vector<2x128xf32>
      %39 = arith.truncf %38 : vector<2x128xf32> to vector<2x128xbf16>
      %c0_22 = arith.constant 0 : index
      %c0_23 = arith.constant 0 : index
      %40 = vector.load %arg5[%c0_22, %c0_23] : memref<128x128xbf16, #tpu.memory_space<vmem>>, vector<128x128xbf16>
      %cst_24 = arith.constant dense<0.000000e+00> : vector<2x128xf32>
      %41 = tpu.matmul %39, %40, %cst_24 {dimension_numbers = #tpu.dot_dimension_numbers<[1], [0], [0], [1], [0, 0, 1, 1], [], []>} : vector<2x128xbf16>, vector<128x128xbf16>, vector<2x128xf32> -> vector<2x128xf32>
      %c0_25 = arith.constant 0 : index
      %c0_26 = arith.constant 0 : index
      %42 = vector.load %arg6[%c0_25, %c0_26] : memref<1x128xf32, #tpu.memory_space<vmem>>, vector<1x128xf32>
      %43 = vector.broadcast %42 : vector<1x128xf32> to vector<2x128xf32>
      %44 = arith.addf %41, %43 : vector<2x128xf32>
      %c0_27 = arith.constant 0 : index
      %c0_28 = arith.constant 0 : index
      %45 = vector.load %arg7[%c0_27, %c0_28] : memref<2x128xf32, #tpu.memory_space<vmem>>, vector<2x128xf32>
      tpu.vector_store %arg7[%c0_27, %c0_28], %44 {strides = array<i32>} : memref<2x128xf32, #tpu.memory_space<vmem>>, vector<2x128xf32>,
    } else {
    }
    return
  }
  func.func @transform_0(%arg0: i32) -> (i32, i32) {
    %c0_i32 = arith.constant 0 : i32
    %c0_i32_0 = arith.constant 0 : i32
    return %c0_i32, %arg0 : i32, i32
  }
  func.func @transform_1(%arg0: i32) -> (i32, i32) {
    %c0_i32 = arith.constant 0 : i32
    %c0_i32_0 = arith.constant 0 : i32
    return %arg0, %c0_i32 : i32, i32
  }
  func.func @transform_2(%arg0: i32) -> (i32, i32) {
    %c0_i32 = arith.constant 0 : i32
    %c0_i32_0 = arith.constant 0 : i32
    %c0_i32_1 = arith.constant 0 : i32
    return %c0_i32, %c0_i32_0 : i32, i32
  }
  func.func @transform_3(%arg0: i32) -> (i32, i32) {
    %c0_i32 = arith.constant 0 : i32
    %c0_i32_0 = arith.constant 0 : i32
    %c0_i32_1 = arith.constant 0 : i32
    return %c0_i32, %c0_i32_0 : i32, i32
  }
  func.func @transform_4(%arg0: i32) -> (i32, i32) {
    %c0_i32 = arith.constant 0 : i32
    %c0_i32_0 = arith.constant 0 : i32
    %c0_i32_1 = arith.constant 0 : i32
    return %c0_i32, %c0_i32_0 : i32, i32
  }
  func.func @transform_5(%arg0: i32) -> (i32, i32) {
    %c0_i32 = arith.constant 0 : i32
    %c0_i32_0 = arith.constant 0 : i32
    %c0_i32_1 = arith.constant 0 : i32
    return %c0_i32, %c0_i32_0 : i32, i32
  }
  func.func @transform_6(%arg0: i32) -> (i32, i32) {
    %c0_i32 = arith.constant 0 : i32
    %c0_i32_0 = arith.constant 0 : i32
    %c0_i32_1 = arith.constant 0 : i32
    return %c0_i32, %c0_i32_0 : i32, i32
  }
}

module attributes {stable_mosaic.version = 11 : i64} {
  func.func @_conv_taps_stats_kernel(%arg0: i32, %arg1: memref<32x512xbf16, #tpu.memory_space<vmem>>, %arg2: memref<4x512x128xbf16, #tpu.memory_space<vmem>>, %arg3: memref<32x1xf32, #tpu.memory_space<vmem>>, %arg4: memref<32x128xbf16, #tpu.memory_space<vmem>>, %arg5: memref<1x2x128xf32, #tpu.memory_space<vmem>>) attributes {dimension_semantics = [#tpu.dimension_semantics<parallel>], iteration_bounds = array<i64: 1>, scalar_prefetch = 0 : i64, scratch_operands = 0 : i64, tpu.core_type = #tpu.core_type<tc>, window_params = [{transform_indices = @transform_0, window_bounds = array<i64: 32, 512>}, {pipeline_mode = #tpu.pipeline_mode<synchronous>, transform_indices = @transform_1, window_bounds = array<i64: 4, 512, 128>}, {pipeline_mode = #tpu.pipeline_mode<synchronous>, transform_indices = @transform_2, window_bounds = array<i64: 32, 1>}, {transform_indices = @transform_3, window_bounds = array<i64: 32, 128>}, {transform_indices = @transform_4, window_bounds = array<i64: 1, 2, 128>}]} {
    %c0 = arith.constant 0 : index
    %c0_0 = arith.constant 0 : index
    %0 = vector.load %arg1[%c0, %c0_0] : memref<32x512xbf16, #tpu.memory_space<vmem>>, vector<32x512xbf16>
    %c0_1 = arith.constant 0 : index
    %c0_2 = arith.constant 0 : index
    %c0_3 = arith.constant 0 : index
    %1 = vector.load %arg2[%c0_1, %c0_2, %c0_3] : memref<4x512x128xbf16, #tpu.memory_space<vmem>>, vector<1x512x128xbf16>
    %2 = vector.shape_cast %1 : vector<1x512x128xbf16> to vector<512x128xbf16>
    %cst = arith.constant dense<0.000000e+00> : vector<32x128xf32>
    %3 = tpu.matmul %0, %2, %cst {dimension_numbers = #tpu.dot_dimension_numbers<[1], [0], [0], [1], [0, 0, 1, 1], [], []>} : vector<32x512xbf16>, vector<512x128xbf16>, vector<32x128xf32> -> vector<32x128xf32>
    %4 = vector.extract_strided_slice %0 {offsets = [1, 0], sizes = [31, 512], strides = [1, 1]} : vector<32x512xbf16> to vector<31x512xbf16>
    %5 = vector.extract_strided_slice %0 {offsets = [0, 0], sizes = [1, 512], strides = [1, 1]} : vector<32x512xbf16> to vector<1x512xbf16>
    %6 = tpu.concatenate %4, %5 in 0 : vector<31x512xbf16>, vector<1x512xbf16> -> vector<32x512xbf16>
    %c1 = arith.constant 1 : index
    %c0_4 = arith.constant 0 : index
    %c0_5 = arith.constant 0 : index
    %7 = vector.load %arg2[%c1, %c0_4, %c0_5] : memref<4x512x128xbf16, #tpu.memory_space<vmem>>, vector<1x512x128xbf16>
    %8 = vector.shape_cast %7 : vector<1x512x128xbf16> to vector<512x128xbf16>
    %cst_6 = arith.constant dense<0.000000e+00> : vector<32x128xf32>
    %9 = tpu.matmul %6, %8, %cst_6 {dimension_numbers = #tpu.dot_dimension_numbers<[1], [0], [0], [1], [0, 0, 1, 1], [], []>} : vector<32x512xbf16>, vector<512x128xbf16>, vector<32x128xf32> -> vector<32x128xf32>
    %10 = arith.addf %3, %9 : vector<32x128xf32>
    %11 = vector.extract_strided_slice %0 {offsets = [3, 0], sizes = [29, 512], strides = [1, 1]} : vector<32x512xbf16> to vector<29x512xbf16>
    %12 = vector.extract_strided_slice %0 {offsets = [0, 0], sizes = [3, 512], strides = [1, 1]} : vector<32x512xbf16> to vector<3x512xbf16>
    %13 = tpu.concatenate %11, %12 in 0 : vector<29x512xbf16>, vector<3x512xbf16> -> vector<32x512xbf16>
    %c2 = arith.constant 2 : index
    %c0_7 = arith.constant 0 : index
    %c0_8 = arith.constant 0 : index
    %14 = vector.load %arg2[%c2, %c0_7, %c0_8] : memref<4x512x128xbf16, #tpu.memory_space<vmem>>, vector<1x512x128xbf16>
    %15 = vector.shape_cast %14 : vector<1x512x128xbf16> to vector<512x128xbf16>
    %cst_9 = arith.constant dense<0.000000e+00> : vector<32x128xf32>
    %16 = tpu.matmul %13, %15, %cst_9 {dimension_numbers = #tpu.dot_dimension_numbers<[1], [0], [0], [1], [0, 0, 1, 1], [], []>} : vector<32x512xbf16>, vector<512x128xbf16>, vector<32x128xf32> -> vector<32x128xf32>
    %17 = arith.addf %10, %16 : vector<32x128xf32>
    %18 = vector.extract_strided_slice %0 {offsets = [4, 0], sizes = [28, 512], strides = [1, 1]} : vector<32x512xbf16> to vector<28x512xbf16>
    %19 = vector.extract_strided_slice %0 {offsets = [0, 0], sizes = [4, 512], strides = [1, 1]} : vector<32x512xbf16> to vector<4x512xbf16>
    %20 = tpu.concatenate %18, %19 in 0 : vector<28x512xbf16>, vector<4x512xbf16> -> vector<32x512xbf16>
    %c3 = arith.constant 3 : index
    %c0_10 = arith.constant 0 : index
    %c0_11 = arith.constant 0 : index
    %21 = vector.load %arg2[%c3, %c0_10, %c0_11] : memref<4x512x128xbf16, #tpu.memory_space<vmem>>, vector<1x512x128xbf16>
    %22 = vector.shape_cast %21 : vector<1x512x128xbf16> to vector<512x128xbf16>
    %cst_12 = arith.constant dense<0.000000e+00> : vector<32x128xf32>
    %23 = tpu.matmul %20, %22, %cst_12 {dimension_numbers = #tpu.dot_dimension_numbers<[1], [0], [0], [1], [0, 0, 1, 1], [], []>} : vector<32x512xbf16>, vector<512x128xbf16>, vector<32x128xf32> -> vector<32x128xf32>
    %24 = arith.addf %17, %23 : vector<32x128xf32>
    %25 = arith.truncf %24 : vector<32x128xf32> to vector<32x128xbf16>
    %c0_13 = arith.constant 0 : index
    %c0_14 = arith.constant 0 : index
    %26 = vector.load %arg4[%c0_13, %c0_14] : memref<32x128xbf16, #tpu.memory_space<vmem>>, vector<32x128xbf16>
    tpu.vector_store %arg4[%c0_13, %c0_14], %25 {strides = array<i32>} : memref<32x128xbf16, #tpu.memory_space<vmem>>, vector<32x128xbf16>,
    %c0_15 = arith.constant 0 : index
    %c0_16 = arith.constant 0 : index
    %27 = vector.load %arg3[%c0_15, %c0_16] : memref<32x1xf32, #tpu.memory_space<vmem>>, vector<32x1xf32>
    %28 = vector.broadcast %27 : vector<32x1xf32> to vector<32x128xf32>
    %29 = arith.mulf %24, %28 : vector<32x128xf32>
    %cst_17 = arith.constant dense<0.000000e+00> : vector<128xf32>
    %30 = vector.multi_reduction <add>, %29, %cst_17 [0] : vector<32x128xf32> to vector<128xf32>
    %31 = vector.shape_cast %30 : vector<128xf32> to vector<1x128xf32>
    %32 = arith.mulf %29, %24 : vector<32x128xf32>
    %cst_18 = arith.constant dense<0.000000e+00> : vector<128xf32>
    %33 = vector.multi_reduction <add>, %32, %cst_18 [0] : vector<32x128xf32> to vector<128xf32>
    %34 = vector.shape_cast %33 : vector<128xf32> to vector<1x128xf32>
    %35 = tpu.concatenate %31, %34 in 0 : vector<1x128xf32>, vector<1x128xf32> -> vector<2x128xf32>
    %36 = vector.shape_cast %35 : vector<2x128xf32> to vector<1x2x128xf32>
    %c0_19 = arith.constant 0 : index
    %c0_20 = arith.constant 0 : index
    %c0_21 = arith.constant 0 : index
    %37 = vector.load %arg5[%c0_19, %c0_20, %c0_21] : memref<1x2x128xf32, #tpu.memory_space<vmem>>, vector<1x2x128xf32>
    tpu.vector_store %arg5[%c0_19, %c0_20, %c0_21], %36 {strides = array<i32>} : memref<1x2x128xf32, #tpu.memory_space<vmem>>, vector<1x2x128xf32>,
    return
  }
  func.func @transform_0(%arg0: i32) -> (i32, i32) {
    %c0_i32 = arith.constant 0 : i32
    %c0_i32_0 = arith.constant 0 : i32
    return %arg0, %c0_i32 : i32, i32
  }
  func.func @transform_1(%arg0: i32) -> (i32, i32, i32) {
    %c0_i32 = arith.constant 0 : i32
    %c0_i32_0 = arith.constant 0 : i32
    %c0_i32_1 = arith.constant 0 : i32
    %c0_i32_2 = arith.constant 0 : i32
    return %c0_i32, %c0_i32_0, %c0_i32_1 : i32, i32, i32
  }
  func.func @transform_2(%arg0: i32) -> (i32, i32) {
    %c0_i32 = arith.constant 0 : i32
    %c0_i32_0 = arith.constant 0 : i32
    %c0_i32_1 = arith.constant 0 : i32
    return %c0_i32, %c0_i32_0 : i32, i32
  }
  func.func @transform_3(%arg0: i32) -> (i32, i32) {
    %c0_i32 = arith.constant 0 : i32
    %c0_i32_0 = arith.constant 0 : i32
    return %arg0, %c0_i32 : i32, i32
  }
  func.func @transform_4(%arg0: i32) -> (i32, i32, i32) {
    %c0_i32 = arith.constant 0 : i32
    %c0_i32_0 = arith.constant 0 : i32
    %c0_i32_1 = arith.constant 0 : i32
    return %arg0, %c0_i32, %c0_i32_0 : i32, i32, i32
  }
}

</mosaic_0001>

<bundles_post_ra>
// kernel: _lambda_.8
= control target key start
LH: loop header
LB: loop body
LE: loop exit
PB: predicated region body
PF: predicated region fallthrough
CT: control target
= control target key end

     0   :  { %v165_v0 = vmov 32.0   ;;  %s224_s1 = inlined_call_operand.vmem [shape: f32[2,128], index: 1, kind: input, shape index: {}]   ;;  %s225_s2 = inlined_call_operand.vmem [shape: f32[1,128], index: 2, kind: input, shape index: {}]   ;;  %s226_s0 = inlined_call_operand.vmem [shape: bf16[64,128], index: 0, kind: input, shape index: {}]   ;;  %s227_s3 = inlined_call_operand.vmem [shape: f32[1,128], index: 3, kind: input, shape index: {}]   ;;  %s228_s4 = inlined_call_operand.vmem [shape: bf16[64,128], index: 4, kind: output, shape index: {}]  }
   0x1   :  { %161 = vrcp.f32 %v165_v0  ;;  %v17_v5 = vld [vmem:[%s224_s1] sm:$0x3]  ;;  %v154_v23 = vld [vmem:[%s226_s0 + $0x8] sm:$0xff]   ;;  %v155_v25 = vld [vmem:[%s226_s0 + $0x10] sm:$0xff]  }
   0x2   :  { %v31_v20 = vld [vmem:[%s225_s2] sm:$0x1]  ;;  %v156_v26 = vld [vmem:[%s226_s0 + $0x18] sm:$0xff]   ;;  %v124_v32 = vunpack.c.l.bf16 %v154_v23  ;;  %v125_v33 = vunpack.c.h.bf16 %v154_v23  ;;  %v128_v34 = vunpack.c.l.bf16 %v155_v25  ;;  %v129_v35 = vunpack.c.h.bf16 %v155_v25 }
   0x3   :  { %v119_v21 = vld [vmem:[%s226_s0] sm:$0xff]   ;;  %v132_v36 = vunpack.c.l.bf16 %v156_v26  ;;  %v133_v37 = vunpack.c.h.bf16 %v156_v26 }
   0x4   :  { %v49_v27 = vld [vmem:[%s227_s3] sm:$0x1]  ;;  %v120_v28 = vunpack.c.l.bf16 %v119_v21  ;;  %v121_v29 = vunpack.c.h.bf16 %v119_v21 }
   0x7   :  { %v162_v1 = vpop.eup %161 }
   0x8   :  { %v19_v2 = vmul.f32 32.0, %v162_v1  ;;  %vm23_vm0 = vweird.f32 %v162_v1 }
   0xa   :  { %v20_v3 = vsub.f32 1.0, %v19_v2 }
   0xc   :  { %v21_v4 = vmul.f32 %v162_v1, %v20_v3 }
   0xe   :  { %v22_v6 = vadd.f32 %v162_v1, %v21_v4 }
  0x10   :  { %v24_v7 = vsel %vm23_vm0, %v162_v1, %v22_v6 }
  0x11   :  { %v25_v8 = vmul.f32 %v24_v7, %v17_v5 }
  0x13   :  { %v26_v9 = vmul.f32 %v25_v8, %v25_v8 }
  0x15   :  { %v28_v10 = vrot.slane %v26_v9, 7 }
  0x17   :  { %v30_v11 = vsub.f32 %v25_v8, %v28_v10 }
  0x19   :  { %v32_v12 = vadd.f32 1e-05, %v30_v11 }
  0x1b   :  { %163 = vrsqrt.f32 %v32_v12  ;;  %vm39_vm1 = vweird.f32 %v32_v12 }
  0x21   :  { %v164_v13 = vpop.eup %163 }
  0x22   :  { %v34_v14 = vmul.f32 %v164_v13, %v32_v12  ;;  %vm40_vm2 = vweird.f32 %v164_v13 }
  0x23   :  { %vm41_vm3 = vmor %vm39_vm1, %vm40_vm2 }
  0x24   :  { %v35_v15 = vmul.f32 %v164_v13, %v34_v14 }
  0x26   :  { %v36_v16 = vmul.f32 0.5, %v35_v15 }
  0x28   :  { %v37_v17 = vsub.f32 1.5, %v36_v16 }
  0x2a   :  { %v38_v18 = vmul.f32 %v164_v13, %v37_v17 }
  0x2c   :  { %v42_v19 = vsel %vm41_vm3, %v164_v13, %v38_v18 }
  0x2d   :  { %44 = vst [vmem:[#allocation1] sm:$0xff] %v42_v19 }
  0x34   :  { %v46_v22 = vld [vmem:[#allocation1 + $0x1] ss:$9 sm:$0xff] }
  0x35   :  { %v48_v24 = vmul.f32 %v46_v22, %v31_v20 }
  0x37   :  { %v50_v30 = vmul.f32 %v48_v24, %v25_v8  ;;  %v69_v31 = vperm.slane %v48_v24, 0 }
  0x39   :  { %v51_v38 = vsub.f32 %v49_v27, %v50_v30  ;;  %v71_v39 = vmul.f32 %v120_v28, %v69_v31  ;;  %v72_v41 = vmul.f32 %v121_v29, %v69_v31  ;;  %v73_v42 = vmul.f32 %v124_v32, %v69_v31 }
  0x3a   :  { %v74_v43 = vmul.f32 %v125_v33, %v69_v31  ;;  %v75_v44 = vmul.f32 %v128_v34, %v69_v31  ;;  %v76_v45 = vmul.f32 %v129_v35, %v69_v31  ;;  %v77_v46 = vmul.f32 %v132_v36, %v69_v31 }
  0x3b   :  { %v80_v40 = vperm.slane %v51_v38, 0  ;;  %v78_v47 = vmul.f32 %v133_v37, %v69_v31 }
  0x3d   :  { %v82_v48 = vadd.f32 %v80_v40, %v71_v39  ;;  %v83_v49 = vadd.f32 %v80_v40, %v72_v41  ;;  %v84_v50 = vadd.f32 %v80_v40, %v73_v42  ;;  %v85_v51 = vadd.f32 %v80_v40, %v74_v43 }
  0x3e   :  { %v86_v52 = vadd.f32 %v80_v40, %v75_v44  ;;  %v87_v53 = vadd.f32 %v80_v40, %v76_v45  ;;  %v88_v54 = vadd.f32 %v80_v40, %v77_v46  ;;  %v89_v55 = vadd.f32 %v80_v40, %v78_v47 }
  0x3f   :  { %v90_v56 = vmax.f32 %v82_v48, 0.0  ;;  %v91_v57 = vmax.f32 %v83_v49, 0.0  ;;  %v92_v58 = vmax.f32 %v84_v50, 0.0  ;;  %v93_v59 = vmax.f32 %v85_v51, 0.0 }
  0x40   :  { %v94_v60 = vmax.f32 %v86_v52, 0.0  ;;  %v95_v61 = vmax.f32 %v87_v53, 0.0  ;;  %v96_v62 = vmax.f32 %v88_v54, 0.0  ;;  %v97_v63 = vmax.f32 %v89_v55, 0.0 }
  0x41   :  { %v137_v0 = vpack.c.bf16 %v91_v57, %v90_v56  ;;  %v142_v1 = vpack.c.bf16 %v93_v59, %v92_v58 }
  0x42   :  { %v147_v2 = vpack.c.bf16 %v95_v61, %v94_v60  ;;  %v152_v3 = vpack.c.bf16 %v97_v63, %v96_v62 }
  0x43   :  { %138 = vst [vmem:[%s228_s4] sm:$0xff] %v137_v0  }
  0x44   :  { %157 = vst [vmem:[%s228_s4 + $0x8] sm:$0xff] %v142_v1  }
  0x45   :  { %158 = vst [vmem:[%s228_s4 + $0x10] sm:$0xff] %v147_v2  }
  0x46   :  { %159 = vst [vmem:[%s228_s4 + $0x18] sm:$0xff] %v152_v3  }

// kernel: _lambda_.6
= control target key start
LH: loop header
LB: loop body
LE: loop exit
PB: predicated region body
PF: predicated region fallthrough
CT: control target
= control target key end

     0   :  { %vm93_vm0 = vsmask.f32 7424  ;;  %vm647_vm1 = vcmask 1046528   ;;  %vm208_vm2 = vcmask 261120   ;;  %vm188_vm3 = vcmask 1047552   ;;  %s1406_s1 = inlined_call_operand.vmem [shape: bf16[4,32,128], index: 1, kind: input, shape index: {}]   ;;  %s1407_s0 = inlined_call_operand.vmem [shape: bf16[176,32], index: 0, kind: input, shape index: {}]   ;;  %s1408_s2 = inlined_call_operand.vmem [shape: bf16[176,128], index: 2, kind: output, shape index: {}]  }
   0x1   :  { %v970_v0 = vld [vmem:[%s1406_s1 + $0x18] sm:$0xff]  ;;  %v968_v1 = vld [vmem:[%s1406_s1 + $0x8] sm:$0xff]  ;;  %v969_v4 = vld [vmem:[%s1406_s1 + $0x10] sm:$0xff]  ;;  %vm507_vm4 = vcmask 1043456   ;;  %vm508_vm5 = vsmask.f32 3328 }
   0x2   :  { %v972_v2 = vld [vmem:[%s1406_s1 + $0x28] sm:$0xff]  ;;  %v974_v3 = vld [vmem:[%s1406_s1 + $0x38] sm:$0xff]  ;;  %v967_v5 = vld [vmem:[%s1406_s1] sm:$0xff]  ;;  %248 = vmatpush.bf16.msra.mxu0 %v970_v0  ;;  %346 = vmatpush.bf16.msra.mxu1 %v968_v1  ;;  %vm670_vm7 = vcmask 1042432  }
   0x3   :  { %v971_v6 = vld [vmem:[%s1406_s1 + $0x20] sm:$0xff]  ;;  %v973_v7 = vld [vmem:[%s1406_s1 + $0x30] sm:$0xff]  ;;  %567 = vmatpush.bf16.msra.mxu2 %v972_v2  ;;  %729 = vmatpush.bf16.msra.mxu3 %v974_v3  ;;  %v1074_v9 = vld [vmem:[%s1407_s0 + $0x8] sm:$0xff]  }
   0x4   :  { %v1206_v8 = vld [vmem:[%s1407_s0] sm:$0xff]   ;;  %v1148_v13 = vld [vmem:[%s1407_s0 + $0xc] sm:$0xff]   ;;  %v102_v14 = vshll.u32 %v1074_v9, 16  ;;  %v1150_v30 = vld [vmem:[%s1407_s0 + $0x14] sm:$0xff]   ;;  %v106_v31 = vshrl.u32 %v1074_v9, 16 }
   0x5   :  { %v95_v10 = vshrl.u32 %v1206_v8, 16  ;;  %v97_v11 = vshll.u32 %v1206_v8, 16  ;;  %v1146_v12 = vld [vmem:[%s1407_s0 + $0x4] sm:$0xff]   ;;  %v423_v18 = vshll.u32 %v1148_v13, 16  ;;  %v649_v21 = vrot.slane %v1148_v13, 1  ;;  %v1075_v29 = vld [vmem:[%s1407_s0 + $0x10] sm:$0xff]   ;;  %vm1365_vm6 = vmand %vm188_vm3, %vm93_vm0 }
   0x6   :  { %v416_v16 = vshrl.u32 %v1146_v12, 16  ;;  %v418_v17 = vshll.u32 %v1146_v12, 16  ;;  %249 = vmatpush.bf16.msra.mxu0 %v969_v4  ;;  %347 = vmatpush.bf16.msra.mxu1 %v967_v5  ;;  %v104_v19 = vrot.slane %v102_v14, 1  ;;  %v648_v20 = vrot.slane %v1146_v12, 1  ;;  %v1076_v43 = vld [vmem:[%s1407_s0 + $0x18] sm:$0xff]   ;;  %v1077_v57 = vld [vmem:[%s1407_s0 + $0x20] sm:$0xff]   ;;  %vm509_vm8 = vmand %vm507_vm4, %vm508_vm5 }
   0x7   :  { %v99_v15 = vrot.slane %v97_v11, 1  ;;  %568 = vmatpush.bf16.msra.mxu2 %v971_v6  ;;  %730 = vmatpush.bf16.msra.mxu3 %v973_v7  ;;  %v425_v24 = vrot.slane %v423_v18, 1  ;;  %v110_v32 = vshll.u32 %v1075_v29, 16  ;;  %v427_v33 = vshrl.u32 %v1148_v13, 16  ;;  %v1152_v44 = vld [vmem:[%s1407_s0 + $0x1c] sm:$0xff]   ;;  %v1154_v58 = vld [vmem:[%s1407_s0 + $0x24] sm:$0xff]  }
   0x8   :  { %v420_v23 = vrot.slane %v418_v17, 1  ;;  %v650_v25 = vsel %vm647_vm1, %v648_v20, %v649_v21  ;;  %v431_v34 = vshll.u32 %v1150_v30, 16  ;;  %v108_v35 = vor.u32 %v106_v31, %v104_v19  ;;  %v1078_v7 = vld [vmem:[%s1407_s0 + $0x28] sm:$0xff]  }
   0x9   :  { %v100_v22 = vor.u32 %v99_v15, %v95_v10  ;;  %910 = vmatmul.msk.bf16.vlgmr.msra.gmra.mxu1 %vm208_vm2, %v1206_v8  ;;  %v112_v36 = vrot.slane %v110_v32, 1  ;;  %v651_v37 = vrot.slane %v1150_v30, 1  ;;  %v429_v38 = vor.u32 %v427_v33, %v425_v24 }
   0xa   :  { %v421_v27 = vor.u32 %v420_v23, %v416_v16  ;;  %956 = vmatmul.msk.bf16.vlgmr.msra.gmra.mxu3 %vm208_vm2, %v650_v25  ;;  %v433_v39 = vrot.slane %v431_v34, 1  ;;  %v114_v45 = vshrl.u32 %v1075_v29, 16  ;;  %v118_v46 = vshll.u32 %v1076_v43, 16  ;;  %v1158_v25 = vld [vmem:[%s1407_s0 + $0x34] sm:$0xff]  }
   0xb   :  { %v105_v26 = vsel %vm93_vm0, %v100_v22, %v104_v19  ;;  %v113_v40 = vsel %vm93_vm0, %v108_v35, %v112_v36  ;;  %v652_v41 = vsel %vm647_vm1, %v649_v21, %v651_v37  ;;  %v435_v47 = vshrl.u32 %v1150_v30, 16 }
   0xc   :  { %891 = vmatmul.msk.bf16.vlgmr.msra.gmra.mxu0 %vm208_vm2, %v105_v26  ;;  %v426_v28 = vsel %vm93_vm0, %v421_v27, %v425_v24  ;;  %v434_v42 = vsel %vm93_vm0, %v429_v38, %v433_v39  ;;  %v439_v48 = vshll.u32 %v1152_v44, 16  ;;  %v116_v49 = vor.u32 %v114_v45, %v112_v36  ;;  %v1079_v24 = vld [vmem:[%s1407_s0 + $0x30] sm:$0xff]   ;;  %v1080_v38 = vld [vmem:[%s1407_s0 + $0x38] sm:$0xff]  }
   0xd   :  { %933 = vmatmul.msk.bf16.vlgmr.msra.gmra.mxu2 %vm208_vm2, %v426_v28  ;;  %v120_v50 = vrot.slane %v118_v46, 1  ;;  %v653_v51 = vrot.slane %v1152_v44, 1  ;;  %v437_v52 = vor.u32 %v435_v47, %v433_v39  ;;  %v122_v59 = vshrl.u32 %v1076_v43, 16  ;;  %v1160_v39 = vld [vmem:[%s1407_s0 + $0x3c] sm:$0xff]  }
   0xe   :  { %v441_v53 = vrot.slane %v439_v48, 1  ;;  %v126_v60 = vshll.u32 %v1077_v57, 16  ;;  %v443_v61 = vshrl.u32 %v1152_v44, 16  ;;  %v447_v62 = vshll.u32 %v1154_v58, 16 }
   0xf   :  { %v121_v54 = vsel %vm93_vm0, %v116_v49, %v120_v50  ;;  %v654_v55 = vsel %vm647_vm1, %v651_v37, %v653_v51  ;;  %v124_v63 = vor.u32 %v122_v59, %v120_v50  ;;  %v655_v1 = vrot.slane %v1154_v58, 1 }
  0x10   :  { %v442_v56 = vsel %vm93_vm0, %v437_v52, %v441_v53  ;;  %v128_v0 = vrot.slane %v126_v60, 1  ;;  %v445_v2 = vor.u32 %v443_v61, %v441_v53  ;;  %v449_v3 = vrot.slane %v447_v62, 1  ;;  %v1081_v52 = vld [vmem:[%s1407_s0 + $0x40] sm:$0xff]  }
  0x11   :  { %v656_v5 = vsel %vm647_vm1, %v653_v51, %v655_v1  ;;  %v130_v12 = vshrl.u32 %v1077_v57, 16  ;;  %v134_v13 = vshll.u32 %v1078_v7, 16  ;;  %v451_v14 = vshrl.u32 %v1154_v58, 16  ;;  %v1162_v53 = vld [vmem:[%s1407_s0 + $0x44] sm:$0xff]  }
  0x12   :  { %v129_v4 = vsel %vm93_vm0, %v124_v63, %v128_v0  ;;  %v450_v6 = vsel %vm93_vm0, %v445_v2, %v449_v3  ;;  %v138_v26 = vshrl.u32 %v1078_v7, 16  ;;  %v142_v27 = vshll.u32 %v1079_v24, 16  ;;  %v1082_v2 = vld [vmem:[%s1407_s0 + $0x48] sm:$0xff]  }
  0x13   :  { %v132_v16 = vor.u32 %v130_v12, %v128_v0  ;;  %v136_v17 = vrot.slane %v134_v13, 1  ;;  %v453_v19 = vor.u32 %v451_v14, %v449_v3  ;;  %v659_v32 = vrot.slane %v1158_v25, 1  ;;  %v1163_v3 = vld [vmem:[%s1407_s0 + $0x4c] sm:$0xff]  }
  0x14   :  { %v144_v31 = vrot.slane %v142_v27, 1  ;;  %v661_v46 = vrot.slane %v1160_v39, 1  ;;  %v663_v60 = vrot.slane %v1162_v53, 1  ;;  %v665_v13 = vrot.slane %v1163_v3, 1 }
  0x15   :  { %v137_v21 = vsel %vm93_vm0, %v132_v16, %v136_v17  ;;  %v140_v30 = vor.u32 %v138_v26, %v136_v17  ;;  %v1331_v17 = vld [vmem:[%s1407_s0 + $0x50] sm:$0xff]  }
  0x16   :  { %v662_v50 = vsel %vm647_vm1, %v659_v32, %v661_v46  ;;  %v664_v0 = vsel %vm647_vm1, %v661_v46, %v663_v60  ;;  %v977_v46 = vunpack.c.l.b16 %v1206_v8 }
  0x17   :  { %v145_v35 = vsel %vm93_vm0, %v140_v30, %v144_v31 }
  0x19   :  { %911 = vmatmul.msk.bf16.gmra.mxu1 %vm208_vm2, %v1074_v9  ;;  %v1156_v9 = vld [vmem:[%s1407_s0 + $0x2c] sm:$0xff]  }
  0x1a   :  { %957 = vmatmul.msk.bf16.gmra.mxu3 %vm208_vm2, %v652_v41  ;;  %v455_v15 = vshll.u32 %v1156_v9, 16  ;;  %v657_v18 = vrot.slane %v1156_v9, 1  ;;  %v459_v28 = vshrl.u32 %v1156_v9, 16  ;;  %v150_v41 = vshll.u32 %v1080_v38, 16 }
  0x1c   :  { %892 = vmatmul.msk.bf16.gmra.mxu0 %vm208_vm2, %v113_v40  ;;  %v457_v20 = vrot.slane %v455_v15, 1  ;;  %v658_v22 = vsel %vm647_vm1, %v655_v1, %v657_v18  ;;  %v660_v36 = vsel %vm647_vm1, %v657_v18, %v659_v32  ;;  %v146_v40 = vshrl.u32 %v1079_v24, 16 }
  0x1d   :  { %934 = vmatmul.msk.bf16.gmra.mxu2 %vm208_vm2, %v434_v42  ;;  %v467_v42 = vshrl.u32 %v1158_v25, 16  ;;  %v152_v45 = vrot.slane %v150_v41, 1 }
  0x1e   :  { %v458_v23 = vsel %vm93_vm0, %v453_v19, %v457_v20  ;;  %v461_v33 = vor.u32 %v459_v28, %v457_v20  ;;  %v148_v44 = vor.u32 %v146_v40, %v144_v31  ;;  %v666_v20 = vsel %vm647_vm1, %v663_v60, %v665_v13 }
  0x1f   :  { %v170_v28 = vshrl.u32 %v1082_v2, 16  ;;  %v491_v31 = vshrl.u32 %v1163_v3, 16 }
  0x20   :  { %v153_v49 = vsel %vm93_vm0, %v148_v44, %v152_v45 }
  0x29   :  { %912 = vmatmul.msk.bf16.gmra.mxu1 %vm208_vm2, %v1075_v29  ;;  %v463_v29 = vshll.u32 %v1158_v25, 16 }
  0x2a   :  { %958 = vmatmul.msk.bf16.gmra.mxu3 %vm208_vm2, %v654_v55  ;;  %v158_v55 = vshll.u32 %v1081_v52, 16 }
  0x2b   :  { %v465_v34 = vrot.slane %v463_v29, 1  ;;  %v174_v29 = vshll.u32 %v1331_v17, 16 }
  0x2c   :  { %893 = vmatmul.msk.bf16.gmra.mxu0 %vm208_vm2, %v121_v54  ;;  %v154_v54 = vshrl.u32 %v1080_v38, 16  ;;  %v160_v59 = vrot.slane %v158_v55, 1 }
  0x2d   :  { %935 = vmatmul.msk.bf16.gmra.mxu2 %vm208_vm2, %v442_v56  ;;  %v466_v37 = vsel %vm93_vm0, %v461_v33, %v465_v34  ;;  %v469_v47 = vor.u32 %v467_v42, %v465_v34  ;;  %v475_v56 = vshrl.u32 %v1160_v39, 16  ;;  %v176_v34 = vrot.slane %v174_v29, 1 }
  0x2e   :  { %v156_v58 = vor.u32 %v154_v54, %v152_v45 }
  0x30   :  { %v161_v63 = vsel %vm93_vm0, %v156_v58, %v160_v59 }
  0x39   :  { %913 = vmatmul.msk.bf16.gmra.mxu1 %vm208_vm2, %v1076_v43  ;;  %v471_v43 = vshll.u32 %v1160_v39, 16 }
  0x3a   :  { %959 = vmatmul.msk.bf16.gmra.mxu3 %vm208_vm2, %v656_v5  ;;  %v166_v5 = vshll.u32 %v1082_v2, 16 }
  0x3b   :  { %v473_v48 = vrot.slane %v471_v43, 1 }
  0x3c   :  { %894 = vmatmul.msk.bf16.gmra.mxu0 %vm208_vm2, %v129_v4  ;;  %v162_v4 = vshrl.u32 %v1081_v52, 16  ;;  %v168_v12 = vrot.slane %v166_v5, 1 }
  0x3d   :  { %936 = vmatmul.msk.bf16.gmra.mxu2 %vm208_vm2, %v450_v6  ;;  %v474_v51 = vsel %vm93_vm0, %v469_v47, %v473_v48  ;;  %v477_v61 = vor.u32 %v475_v56, %v473_v48  ;;  %v483_v6 = vshrl.u32 %v1162_v53, 16 }
  0x3e   :  { %v164_v9 = vor.u32 %v162_v4, %v160_v59  ;;  %v172_v33 = vor.u32 %v170_v28, %v168_v12 }
  0x40   :  { %v169_v19 = vsel %vm93_vm0, %v164_v9, %v168_v12  ;;  %v177_v44 = vsel %vm93_vm0, %v172_v33, %v176_v34 }
  0x49   :  { %914 = vmatmul.msk.bf16.gmra.mxu1 %vm208_vm2, %v1077_v57  ;;  %v479_v57 = vshll.u32 %v1162_v53, 16 }
  0x4a   :  { %960 = vmatmul.msk.bf16.gmra.mxu3 %vm208_vm2, %v658_v22  ;;  %v1018_v22 = vunpack.c.h.b16 %v1331_v17 }
  0x4b   :  { %v481_v62 = vrot.slane %v479_v57, 1  ;;  %v178_v57 = vshrl.u32 %v1331_v17, 16 }
  0x4c   :  { %895 = vmatmul.msk.bf16.gmra.mxu0 %vm208_vm2, %v137_v21 }
  0x4d   :  { %937 = vmatmul.msk.bf16.gmra.mxu2 %vm208_vm2, %v458_v23  ;;  %v482_v1 = vsel %vm93_vm0, %v477_v61, %v481_v62  ;;  %v485_v14 = vor.u32 %v483_v6, %v481_v62 }
  0x59   :  { %915 = vmatmul.msk.bf16.gmra.mxu1 %vm208_vm2, %v1078_v7  ;;  %v487_v7 = vshll.u32 %v1163_v3, 16  ;;  %v669_v3 = vrot.slane %v1206_v8, 5 }
  0x5a   :  { %961 = vmatmul.msk.bf16.gmra.mxu3 %vm208_vm2, %v660_v36 }
  0x5b   :  { %v489_v15 = vrot.slane %v487_v7, 1 }
  0x5c   :  { %896 = vmatmul.msk.bf16.gmra.mxu0 %vm208_vm2, %v145_v35 }
  0x5d   :  { %938 = vmatmul.msk.bf16.gmra.mxu2 %vm208_vm2, %v466_v37  ;;  %v490_v21 = vsel %vm93_vm0, %v485_v14, %v489_v15 }
  0x69   :  { %916 = vmatmul.msk.bf16.gmra.mxu1 %vm208_vm2, %v1079_v24  ;;  %v1341_v24 = vpack.c.b16 %v1018_v22, %v1018_v22 }
  0x6a   :  { %962 = vmatmul.msk.bf16.gmra.mxu3 %vm208_vm2, %v662_v50 }
  0x6b   :  { %v495_v32 = vshll.u32 %v1341_v24, 16  ;;  %v667_v35 = vrot.slane %v1341_v24, 1  ;;  %v499_v62 = vshrl.u32 %v1341_v24, 16 }
  0x6c   :  { %897 = vmatmul.msk.bf16.gmra.mxu0 %vm208_vm2, %v153_v49 }
  0x6d   :  { %939 = vmatmul.msk.bf16.gmra.mxu2 %vm208_vm2, %v474_v51  ;;  %v497_v39 = vrot.slane %v495_v32, 1  ;;  %v668_v45 = vsel %vm647_vm1, %v665_v13, %v667_v35  ;;  %v182_v51 = vpack.c.b16 %v977_v46, %v977_v46 }
  0x6f   :  { %v184_v60 = vshll.u32 %v182_v51, 16  ;;  %v501_v7 = vor.u32 %v499_v62, %v497_v39 }
  0x79   :  { %917 = vmatmul.msk.bf16.gmra.mxu1 %vm208_vm2, %v1080_v38  ;;  %v493_v38 = vor.u32 %v491_v31, %v489_v15  ;;  %v673_v15 = vsel %vm670_vm7, %v667_v35, %v669_v3 }
  0x7a   :  { %963 = vmatmul.msk.bf16.gmra.mxu3 %vm208_vm2, %v664_v0  ;;  %v504_v0 = vrot.slane %v97_v11, 5 }
  0x7b   :  { %v498_v49 = vsel %vm93_vm0, %v493_v38, %v497_v39 }
  0x7c   :  { %898 = vmatmul.msk.bf16.gmra.mxu0 %vm208_vm2, %v161_v63  ;;  %v503_v63 = vrot.slane %v95_v10, 4 }
  0x7d   :  { %940 = vmatmul.msk.bf16.gmra.mxu2 %vm208_vm2, %v482_v1  ;;  %v180_v1 = vor.u32 %v178_v57, %v176_v34 }
  0x7e   :  { %v505_v9 = vor.u32 %v504_v0, %v503_v63 }
  0x86   :  { %v349_v16 = vpop.f32.mrf.mxu1 }
  0x89   :  { %v251_v18 = vpop.f32.mrf.mxu0  ;;  %918 = vmatmul.msk.bf16.gmra.mxu1 %vm208_vm2, %v1081_v52 }
  0x8a   :  { %964 = vmatmul.msk.bf16.gmra.mxu3 %vm208_vm2, %v666_v20  ;;  %v350_v30 = vadd.f32 %v349_v16, %v251_v18  ;;  %v510_v18 = vsel %vm509_vm8, %v501_v7, %v505_v9 }
  0x8c   :  { %899 = vmatmul.msk.bf16.gmra.mxu0 %vm208_vm2, %v169_v19 }
  0x8d   :  { %941 = vmatmul.msk.bf16.gmra.mxu2 %vm208_vm2, %v490_v21  ;;  %v732_v23 = vpop.f32.mrf.mxu3 }
  0x8e   :  { %v351_v25 = vpop.f32.mrf.mxu1 }
  0x90   :  { %v570_v26 = vpop.f32.mrf.mxu2 }
  0x91   :  { %v253_v27 = vpop.f32.mrf.mxu0  ;;  %v625_v36 = vadd.f32 %v570_v26, %v350_v30 }
  0x92   :  { %v352_v40 = vadd.f32 %v351_v25, %v253_v27 }
  0x93   :  { %v787_v47 = vadd.f32 %v732_v23, %v625_v36 }
  0x95   :  { %v734_v37 = vpop.f32.mrf.mxu3  ;;  %v809_v52 = vmax.f32 %v787_v47, 0.0 }
  0x96   :  { %v354_v41 = vpop.f32.mrf.mxu1 }
  0x98   :  { %v572_v42 = vpop.f32.mrf.mxu2 }
  0x99   :  { %v256_v43 = vpop.f32.mrf.mxu0  ;;  %v626_v48 = vadd.f32 %v572_v42, %v352_v40  ;;  %919 = vmatmul.msk.bf16.gmra.mxu1 %vm208_vm2, %v1082_v2  ;;  %v186_v2 = vrot.slane %v184_v60, 1 }
  0x9a   :  { %965 = vmatmul.msk.bf16.gmra.mxu3 %vm208_vm2, %v668_v45  ;;  %v355_v61 = vadd.f32 %v354_v41, %v256_v43 }
  0x9b   :  { %v788_v50 = vadd.f32 %v734_v37, %v626_v48  ;;  %v190_v14 = vsel %vm1365_vm6, %v180_v1, %v186_v2 }
  0x9c   :  { %900 = vmatmul.msk.bf16.gmra.mxu0 %vm208_vm2, %v177_v44 }
  0x9d   :  { %v810_v53 = vmax.f32 %v788_v50, 0.0  ;;  %942 = vmatmul.msk.bf16.gmra.mxu2 %vm208_vm2, %v498_v49  ;;  %v737_v54 = vpop.f32.mrf.mxu3 }
  0x9e   :  { %v356_v56 = vpop.f32.mrf.mxu1 }
  0x9f   :  { %v1022_v55 = vpack.c.bf16 %v810_v53, %v809_v52 }
  0xa0   :  { %v575_v58 = vpop.f32.mrf.mxu2 }
  0xa1   :  { %v258_v59 = vpop.f32.mrf.mxu0  ;;  %1023 = vst [vmem:[%s1408_s2] sm:$0xff] %v1022_v55   ;;  %v627_v4 = vadd.f32 %v575_v58, %v355_v61 }
  0xa2   :  { %v357_v10 = vadd.f32 %v356_v56, %v258_v59 }
  0xa3   :  { %v789_v8 = vadd.f32 %v737_v54, %v627_v4 }
  0xa5   :  { %v739_v6 = vpop.f32.mrf.mxu3  ;;  %v811_v20 = vmax.f32 %v789_v8, 0.0 }
  0xa6   :  { %v359_v12 = vpop.f32.mrf.mxu1 }
  0xa8   :  { %v577_v11 = vpop.f32.mrf.mxu2 }
  0xa9   :  { %v261_v13 = vpop.f32.mrf.mxu0  ;;  %v628_v16 = vadd.f32 %v577_v11, %v357_v10  ;;  %920 = vmatmul.msk.bf16.gmra.mxu1 %vm208_vm2, %v1331_v17 }
  0xaa   :  { %966 = vmatmul.msk.bf16.gmra.mxu3 %vm208_vm2, %v673_v15  ;;  %v360_v17 = vadd.f32 %v359_v12, %v261_v13 }
  0xab   :  { %v790_v19 = vadd.f32 %v739_v6, %v628_v16 }
  0xac   :  { %901 = vmatmul.msk.bf16.gmra.mxu0 %vm208_vm2, %v190_v14 }
  0xad   :  { %v812_v21 = vmax.f32 %v790_v19, 0.0  ;;  %943 = vmatmul.msk.bf16.gmra.mxu2 %vm208_vm2, %v510_v18  ;;  %v742_v22 = vpop.f32.mrf.mxu3 }
  0xae   :  { %v361_v24 = vpop.f32.mrf.mxu1 }
  0xaf   :  { %v1027_v23 = vpack.c.bf16 %v812_v21, %v811_v20 }
  0xb0   :  { %v580_v25 = vpop.f32.mrf.mxu2 }
  0xb1   :  { %v263_v26 = vpop.f32.mrf.mxu0  ;;  %1134 = vst [vmem:[%s1408_s2 + $0x8] sm:$0xff] %v1027_v23   ;;  %v629_v27 = vadd.f32 %v580_v25, %v360_v17 }
  0xb2   :  { %v362_v29 = vadd.f32 %v361_v24, %v263_v26 }
  0xb3   :  { %v791_v33 = vadd.f32 %v742_v22, %v629_v27 }
  0xb5   :  { %v744_v28 = vpop.f32.mrf.mxu3  ;;  %v813_v36 = vmax.f32 %v791_v33, 0.0 }
  0xb6   :  { %v364_v30 = vpop.f32.mrf.mxu1 }
  0xb8   :  { %v582_v31 = vpop.f32.mrf.mxu2 }
  0xb9   :  { %v266_v32 = vpop.f32.mrf.mxu0  ;;  %v630_v34 = vadd.f32 %v582_v31, %v362_v29 }
  0xba   :  { %v365_v43 = vadd.f32 %v364_v30, %v266_v32 }
  0xbb   :  { %v792_v35 = vadd.f32 %v744_v28, %v630_v34 }
  0xbd   :  { %v814_v37 = vmax.f32 %v792_v35, 0.0  ;;  %v747_v38 = vpop.f32.mrf.mxu3 }
  0xbe   :  { %v366_v40 = vpop.f32.mrf.mxu1 }
  0xbf   :  { %v1032_v39 = vpack.c.bf16 %v814_v37, %v813_v36 }
  0xc0   :  { %v585_v41 = vpop.f32.mrf.mxu2 }
  0xc1   :  { %v268_v42 = vpop.f32.mrf.mxu0  ;;  %1135 = vst [vmem:[%s1408_s2 + $0x10] sm:$0xff] %v1032_v39   ;;  %v631_v44 = vadd.f32 %v585_v41, %v365_v43 }
  0xc2   :  { %v367_v46 = vadd.f32 %v366_v40, %v268_v42 }
  0xc3   :  { %v793_v50 = vadd.f32 %v747_v38, %v631_v44 }
  0xc5   :  { %v749_v45 = vpop.f32.mrf.mxu3  ;;  %v815_v53 = vmax.f32 %v793_v50, 0.0 }
  0xc6   :  { %v369_v47 = vpop.f32.mrf.mxu1 }
  0xc8   :  { %v587_v48 = vpop.f32.mrf.mxu2 }
  0xc9   :  { %v271_v49 = vpop.f32.mrf.mxu0  ;;  %v632_v51 = vadd.f32 %v587_v48, %v367_v46 }
  0xca   :  { %v370_v60 = vadd.f32 %v369_v47, %v271_v49 }
  0xcb   :  { %v794_v52 = vadd.f32 %v749_v45, %v632_v51 }
  0xcd   :  { %v816_v54 = vmax.f32 %v794_v52, 0.0  ;;  %v752_v55 = vpop.f32.mrf.mxu3 }
  0xce   :  { %v371_v57 = vpop.f32.mrf.mxu1 }
  0xcf   :  { %v1037_v56 = vpack.c.bf16 %v816_v54, %v815_v53 }
  0xd0   :  { %v590_v58 = vpop.f32.mrf.mxu2 }
  0xd1   :  { %v273_v59 = vpop.f32.mrf.mxu0  ;;  %1136 = vst [vmem:[%s1408_s2 + $0x18] sm:$0xff] %v1037_v56   ;;  %v633_v61 = vadd.f32 %v590_v58, %v370_v60 }
  0xd2   :  { %v372_v63 = vadd.f32 %v371_v57, %v273_v59 }
  0xd3   :  { %v795_v3 = vadd.f32 %v752_v55, %v633_v61 }
  0xd5   :  { %v754_v62 = vpop.f32.mrf.mxu3  ;;  %v817_v6 = vmax.f32 %v795_v3, 0.0 }
  0xd6   :  { %v374_v0 = vpop.f32.mrf.mxu1 }
  0xd8   :  { %v592_v1 = vpop.f32.mrf.mxu2 }
  0xd9   :  { %v276_v2 = vpop.f32.mrf.mxu0  ;;  %v634_v4 = vadd.f32 %v592_v1, %v372_v63 }
  0xda   :  { %v375_v14 = vadd.f32 %v374_v0, %v276_v2 }
  0xdb   :  { %v796_v5 = vadd.f32 %v754_v62, %v634_v4 }
  0xdd   :  { %v818_v7 = vmax.f32 %v796_v5, 0.0  ;;  %v757_v9 = vpop.f32.mrf.mxu3 }
  0xde   :  { %v376_v12 = vpop.f32.mrf.mxu1 }
  0xdf   :  { %v1042_v10 = vpack.c.bf16 %v818_v7, %v817_v6 }
  0xe0   :  { %v595_v11 = vpop.f32.mrf.mxu2 }
  0xe1   :  { %v278_v13 = vpop.f32.mrf.mxu0  ;;  %1137 = vst [vmem:[%s1408_s2 + $0x20] sm:$0xff] %v1042_v10   ;;  %v635_v15 = vadd.f32 %v595_v11, %v375_v14 }
  0xe2   :  { %v377_v16 = vadd.f32 %v376_v12, %v278_v13 }
  0xe3   :  { %v797_v21 = vadd.f32 %v757_v9, %v635_v15 }
  0xe5   :  { %v759_v8 = vpop.f32.mrf.mxu3  ;;  %v819_v24 = vmax.f32 %v797_v21, 0.0 }
  0xe6   :  { %v379_v18 = vpop.f32.mrf.mxu1 }
  0xe8   :  { %v597_v19 = vpop.f32.mrf.mxu2 }
  0xe9   :  { %v281_v20 = vpop.f32.mrf.mxu0  ;;  %v636_v22 = vadd.f32 %v597_v19, %v377_v16 }
  0xea   :  { %v380_v30 = vadd.f32 %v379_v18, %v281_v20 }
  0xeb   :  { %v798_v23 = vadd.f32 %v759_v8, %v636_v22 }
  0xed   :  { %v820_v25 = vmax.f32 %v798_v23, 0.0  ;;  %v762_v26 = vpop.f32.mrf.mxu3 }
  0xee   :  { %v381_v27 = vpop.f32.mrf.mxu1 }
  0xef   :  { %v1047_v17 = vpack.c.bf16 %v820_v25, %v819_v24 }
  0xf0   :  { %v600_v28 = vpop.f32.mrf.mxu2 }
  0xf1   :  { %v283_v29 = vpop.f32.mrf.mxu0  ;;  %1138 = vst [vmem:[%s1408_s2 + $0x28] sm:$0xff] %v1047_v17   ;;  %v637_v31 = vadd.f32 %v600_v28, %v380_v30 }
  0xf2   :  { %v382_v33 = vadd.f32 %v381_v27, %v283_v29 }
  0xf3   :  { %v799_v37 = vadd.f32 %v762_v26, %v637_v31 }
  0xf5   :  { %v764_v32 = vpop.f32.mrf.mxu3  ;;  %v821_v40 = vmax.f32 %v799_v37, 0.0 }
  0xf6   :  { %v384_v34 = vpop.f32.mrf.mxu1 }
  0xf8   :  { %v602_v35 = vpop.f32.mrf.mxu2 }
  0xf9   :  { %v286_v36 = vpop.f32.mrf.mxu0  ;;  %v638_v38 = vadd.f32 %v602_v35, %v382_v33 }
  0xfa   :  { %v385_v47 = vadd.f32 %v384_v34, %v286_v36 }
  0xfb   :  { %v800_v39 = vadd.f32 %v764_v32, %v638_v38 }
  0xfd   :  { %v822_v41 = vmax.f32 %v800_v39, 0.0  ;;  %v767_v42 = vpop.f32.mrf.mxu3 }
  0xfe   :  { %v386_v44 = vpop.f32.mrf.mxu1 }
  0xff   :  { %v1052_v43 = vpack.c.bf16 %v822_v41, %v821_v40 }
 0x100   :  { %v605_v45 = vpop.f32.mrf.mxu2 }
 0x101   :  { %v288_v46 = vpop.f32.mrf.mxu0  ;;  %1139 = vst [vmem:[%s1408_s2 + $0x30] sm:$0xff] %v1052_v43   ;;  %v639_v48 = vadd.f32 %v605_v45, %v385_v47 }
 0x102   :  { %v387_v50 = vadd.f32 %v386_v44, %v288_v46 }
 0x103   :  { %v801_v54 = vadd.f32 %v767_v42, %v639_v48 }
 0x105   :  { %v769_v49 = vpop.f32.mrf.mxu3  ;;  %v823_v57 = vmax.f32 %v801_v54, 0.0 }
 0x106   :  { %v389_v51 = vpop.f32.mrf.mxu1 }
 0x108   :  { %v607_v52 = vpop.f32.mrf.mxu2 }
 0x109   :  { %v291_v53 = vpop.f32.mrf.mxu0  ;;  %v640_v55 = vadd.f32 %v607_v52, %v387_v50 }
 0x10a   :  { %v390_v0 = vadd.f32 %v389_v51, %v291_v53 }
 0x10b   :  { %v802_v56 = vadd.f32 %v769_v49, %v640_v55 }
 0x10d   :  { %v824_v58 = vmax.f32 %v802_v56, 0.0  ;;  %v772_v59 = vpop.f32.mrf.mxu3 }
 0x10e   :  { %v391_v61 = vpop.f32.mrf.mxu1 }
 0x10f   :  { %v1057_v60 = vpack.c.bf16 %v824_v58, %v823_v57 }
 0x110   :  { %v610_v62 = vpop.f32.mrf.mxu2 }
 0x111   :  { %v293_v63 = vpop.f32.mrf.mxu0  ;;  %1140 = vst [vmem:[%s1408_s2 + $0x38] sm:$0xff] %v1057_v60   ;;  %v641_v1 = vadd.f32 %v610_v62, %v390_v0 }
 0x112   :  { %v392_v3 = vadd.f32 %v391_v61, %v293_v63 }
 0x113   :  { %v803_v7 = vadd.f32 %v772_v59, %v641_v1 }
 0x115   :  { %v774_v2 = vpop.f32.mrf.mxu3  ;;  %v825_v12 = vmax.f32 %v803_v7, 0.0 }
 0x116   :  { %v394_v4 = vpop.f32.mrf.mxu1 }
 0x118   :  { %v612_v5 = vpop.f32.mrf.mxu2 }
 0x119   :  { %v296_v6 = vpop.f32.mrf.mxu0  ;;  %v642_v9 = vadd.f32 %v612_v5, %v392_v3 }
 0x11a   :  { %v395_v18 = vadd.f32 %v394_v4, %v296_v6 }
 0x11b   :  { %v804_v10 = vadd.f32 %v774_v2, %v642_v9 }
 0x11d   :  { %v826_v11 = vmax.f32 %v804_v10, 0.0  ;;  %v777_v13 = vpop.f32.mrf.mxu3 }
 0x11e   :  { %v396_v15 = vpop.f32.mrf.mxu1 }
 0x11f   :  { %v1062_v14 = vpack.c.bf16 %v826_v11, %v825_v12 }
 0x120   :  { %v615_v8 = vpop.f32.mrf.mxu2 }
 0x121   :  { %v298_v16 = vpop.f32.mrf.mxu0  ;;  %1141 = vst [vmem:[%s1408_s2 + $0x40] sm:$0xff] %v1062_v14   ;;  %v643_v19 = vadd.f32 %v615_v8, %v395_v18 }
 0x122   :  { %v397_v21 = vadd.f32 %v396_v15, %v298_v16 }
 0x123   :  { %v805_v23 = vadd.f32 %v777_v13, %v643_v19 }
 0x125   :  { %v779_v20 = vpop.f32.mrf.mxu3  ;;  %v827_v27 = vmax.f32 %v805_v23, 0.0 }
 0x126   :  { %v399_v26 = vpop.f32.mrf.mxu1 }
 0x128   :  { %v617_v22 = vpop.f32.mrf.mxu2 }
 0x129   :  { %v644_v24 = vadd.f32 %v617_v22, %v397_v21  ;;  %v301_v25 = vpop.f32.mrf.mxu0 }
 0x12a   :  { %v400_v32 = vadd.f32 %v399_v26, %v301_v25 }
 0x12b   :  { %v806_v17 = vadd.f32 %v779_v20, %v644_v24 }
 0x12d   :  { %v828_v28 = vmax.f32 %v806_v17, 0.0  ;;  %v782_v31 = vpop.f32.mrf.mxu3 }
 0x12e   :  { %v401_v34 = vpop.f32.mrf.mxu1 }
 0x12f   :  { %v1067_v29 = vpack.c.bf16 %v828_v28, %v827_v27 }
 0x130   :  { %v620_v30 = vpop.f32.mrf.mxu2 }
 0x131   :  { %1142 = vst [vmem:[%s1408_s2 + $0x48] sm:$0xff] %v1067_v29   ;;  %v303_v33 = vpop.f32.mrf.mxu0  ;;  %v645_v35 = vadd.f32 %v620_v30, %v400_v32 }
 0x132   :  { %v402_v36 = vadd.f32 %v401_v34, %v303_v33 }
 0x133   :  { %v807_v38 = vadd.f32 %v782_v31, %v645_v35 }
 0x135   :  { %v784_v40 = vpop.f32.mrf.mxu3  ;;  %v829_v42 = vmax.f32 %v807_v38, 0.0 }
 0x138   :  { %v622_v37 = vpop.f32.mrf.mxu2 }
 0x139   :  { %v646_v39 = vadd.f32 %v622_v37, %v402_v36 }
 0x13b   :  { %v808_v41 = vadd.f32 %v784_v40, %v646_v39 }
 0x13d   :  { %v830_v43 = vmax.f32 %v808_v41, 0.0 }
 0x13f   :  { %v1072_v44 = vpack.c.bf16 %v830_v43, %v829_v42 }
 0x141   :  { %1143 = vst [vmem:[%s1408_s2 + $0x50] sm:$0xff] %v1072_v44  }

// kernel: _lambda_.10
= control target key start
LH: loop header
LB: loop body
LE: loop exit
PB: predicated region body
PF: predicated region fallthrough
CT: control target
= control target key end

     0   :  { %v115_v0 = vmov 8.0   ;;  %s162_s1 = inlined_call_operand.vmem [shape: f32[2,128], index: 1, kind: input, shape index: {}]   ;;  %s163_s2 = inlined_call_operand.vmem [shape: f32[1,128], index: 2, kind: input, shape index: {}]   ;;  %s164_s0 = inlined_call_operand.vmem [shape: bf16[32,128], index: 0, kind: input, shape index: {}]   ;;  %s165_s3 = inlined_call_operand.vmem [shape: f32[1,128], index: 3, kind: input, shape index: {}]   ;;  %s166_s4 = inlined_call_operand.vmem [shape: bf16[32,128], index: 4, kind: output, shape index: {}]  }
   0x1   :  { %111 = vrcp.f32 %v115_v0  ;;  %v17_v5 = vld [vmem:[%s162_s1] sm:$0x3]  ;;  %v108_v23 = vld [vmem:[%s164_s0 + $0x8] sm:$0xff]  }
   0x2   :  { %v31_v20 = vld [vmem:[%s163_s2] sm:$0x1]  ;;  %v96_v30 = vunpack.c.l.bf16 %v108_v23  ;;  %v97_v31 = vunpack.c.h.bf16 %v108_v23 }
   0x3   :  { %v91_v21 = vld [vmem:[%s164_s0] sm:$0xff]  }
   0x4   :  { %v49_v25 = vld [vmem:[%s165_s3] sm:$0x1]  ;;  %v92_v26 = vunpack.c.l.bf16 %v91_v21  ;;  %v93_v27 = vunpack.c.h.bf16 %v91_v21 }
   0x7   :  { %v112_v1 = vpop.eup %111 }
   0x8   :  { %v19_v2 = vmul.f32 8.0, %v112_v1  ;;  %vm23_vm0 = vweird.f32 %v112_v1 }
   0xa   :  { %v20_v3 = vsub.f32 1.0, %v19_v2 }
   0xc   :  { %v21_v4 = vmul.f32 %v112_v1, %v20_v3 }
   0xe   :  { %v22_v6 = vadd.f32 %v112_v1, %v21_v4 }
  0x10   :  { %v24_v7 = vsel %vm23_vm0, %v112_v1, %v22_v6 }
  0x11   :  { %v25_v8 = vmul.f32 %v24_v7, %v17_v5 }
  0x13   :  { %v26_v9 = vmul.f32 %v25_v8, %v25_v8 }
  0x15   :  { %v28_v10 = vrot.slane %v26_v9, 7 }
  0x17   :  { %v30_v11 = vsub.f32 %v25_v8, %v28_v10 }
  0x19   :  { %v32_v12 = vadd.f32 1e-05, %v30_v11 }
  0x1b   :  { %113 = vrsqrt.f32 %v32_v12  ;;  %vm39_vm1 = vweird.f32 %v32_v12 }
  0x21   :  { %v114_v13 = vpop.eup %113 }
  0x22   :  { %v34_v14 = vmul.f32 %v114_v13, %v32_v12  ;;  %vm40_vm2 = vweird.f32 %v114_v13 }
  0x23   :  { %vm41_vm3 = vmor %vm39_vm1, %vm40_vm2 }
  0x24   :  { %v35_v15 = vmul.f32 %v114_v13, %v34_v14 }
  0x26   :  { %v36_v16 = vmul.f32 0.5, %v35_v15 }
  0x28   :  { %v37_v17 = vsub.f32 1.5, %v36_v16 }
  0x2a   :  { %v38_v18 = vmul.f32 %v114_v13, %v37_v17 }
  0x2c   :  { %v42_v19 = vsel %vm41_vm3, %v114_v13, %v38_v18 }
  0x2d   :  { %44 = vst [vmem:[#allocation1] sm:$0xff] %v42_v19 }
  0x34   :  { %v46_v22 = vld [vmem:[#allocation1 + $0x1] ss:$9 sm:$0xff] }
  0x35   :  { %v48_v24 = vmul.f32 %v46_v22, %v31_v20 }
  0x37   :  { %v50_v28 = vmul.f32 %v48_v24, %v25_v8  ;;  %v61_v29 = vperm.slane %v48_v24, 0 }
  0x39   :  { %v51_v32 = vsub.f32 %v49_v25, %v50_v28  ;;  %v63_v33 = vmul.f32 %v92_v26, %v61_v29  ;;  %v64_v34 = vmul.f32 %v93_v27, %v61_v29  ;;  %v65_v36 = vmul.f32 %v96_v30, %v61_v29 }
  0x3a   :  { %v66_v37 = vmul.f32 %v97_v31, %v61_v29 }
  0x3b   :  { %v68_v35 = vperm.slane %v51_v32, 0 }
  0x3d   :  { %v70_v38 = vadd.f32 %v68_v35, %v63_v33  ;;  %v71_v39 = vadd.f32 %v68_v35, %v64_v34  ;;  %v72_v40 = vadd.f32 %v68_v35, %v65_v36  ;;  %v73_v41 = vadd.f32 %v68_v35, %v66_v37 }
  0x3f   :  { %v74_v42 = vmax.f32 %v70_v38, 0.0  ;;  %v75_v43 = vmax.f32 %v71_v39, 0.0  ;;  %v76_v44 = vmax.f32 %v72_v40, 0.0  ;;  %v77_v45 = vmax.f32 %v73_v41, 0.0 }
  0x41   :  { %v101_v46 = vpack.c.bf16 %v75_v43, %v74_v42  ;;  %v106_v47 = vpack.c.bf16 %v77_v45, %v76_v44 }
  0x43   :  { %102 = vst [vmem:[%s166_s4] sm:$0xff] %v101_v46  }
  0x44   :  { %109 = vst [vmem:[%s166_s4 + $0x8] sm:$0xff] %v106_v47  }

// kernel: _lambda_.7
= control target key start
LH: loop header
LB: loop body
LE: loop exit
PB: predicated region body
PF: predicated region fallthrough
CT: control target
= control target key end

     0   :  { %vm160_vm0 = vsmask.f32 7424  ;;  %vm325_vm1 = vcmask 1047552   ;;  %vm1028_vm3 = vsmask.f32 5376  ;;  %vm1129_vm4 = vcmask 1045504   ;;  %s3998_s1 = inlined_call_operand.vmem [shape: bf16[4,512,128], index: 1, kind: input, shape index: {}]   ;;  %s3999_s0 = inlined_call_operand.vmem [shape: bf16[64,512], index: 0, kind: input, shape index: {}]   ;;  %s4000_s2 = inlined_call_operand.vmem [shape: f32[64,1], index: 2, kind: input, shape index: {}]   ;;  %s4001_s3 = inlined_call_operand.vmem [shape: bf16[64,128], index: 3, kind: output, shape index: {0}]   ;;  %s4002_s4 = inlined_call_operand.vmem [shape: f32[1,2,128], index: 4, kind: output, shape index: {1}]  }
   0x1   :  { %v2879_v0 = vld [vmem:[%s3998_s1 + $0x138] sm:$0xff]  ;;  %v2878_v4 = vld [vmem:[%s3998_s1 + $0x130] sm:$0xff]  ;;  %v2877_v8 = vld [vmem:[%s3998_s1 + $0x128] sm:$0xff]  ;;  %vm1516_vm6 = vcmask 1044480   ;;  %vm2065_vm7 = vcmask 1040384  }
   0x2   :  { %v2887_v1 = vld [vmem:[%s3998_s1 + $0x178] sm:$0xff]  ;;  %588 = vmatpush.bf16.msra.mxu0 %v2879_v0  ;;  %v2886_v5 = vld [vmem:[%s3998_s1 + $0x170] sm:$0xff]  ;;  %v2885_v9 = vld [vmem:[%s3998_s1 + $0x168] sm:$0xff] }
   0x3   :  { %v2895_v2 = vld [vmem:[%s3998_s1 + $0x1b8] sm:$0xff]  ;;  %617 = vmatpush.bf16.msra.mxu1 %v2887_v1  ;;  %v2894_v6 = vld [vmem:[%s3998_s1 + $0x1b0] sm:$0xff]  ;;  %v2893_v10 = vld [vmem:[%s3998_s1 + $0x1a8] sm:$0xff] }
   0x4   :  { %v2903_v3 = vld [vmem:[%s3998_s1 + $0x1f8] sm:$0xff]  ;;  %646 = vmatpush.bf16.msra.mxu2 %v2895_v2  ;;  %v2902_v7 = vld [vmem:[%s3998_s1 + $0x1f0] sm:$0xff]  ;;  %v2901_v11 = vld [vmem:[%s3998_s1 + $0x1e8] sm:$0xff] }
   0x5   :  { %675 = vmatpush.bf16.msra.mxu3 %v2903_v3  ;;  %v2876_v12 = vld [vmem:[%s3998_s1 + $0x120] sm:$0xff]  ;;  %v18_v17 = vld [vmem:[%s3999_s0 + $0x10] sm:$0xff]  ;;  %v2875_v20 = vld [vmem:[%s3998_s1 + $0x118] sm:$0xff] }
   0x6   :  { %589 = vmatpush.bf16.msra.mxu0 %v2878_v4  ;;  %v2884_v13 = vld [vmem:[%s3998_s1 + $0x160] sm:$0xff]  ;;  %v2883_v21 = vld [vmem:[%s3998_s1 + $0x158] sm:$0xff]  ;;  %v116_v23 = vunpack.c.l.b16 %v18_v17  ;;  %v117_v24 = vunpack.c.h.b16 %v18_v17  ;;  %v17_v25 = vld [vmem:[%s3999_s0 + $0x8] sm:$0xff] }
   0x7   :  { %618 = vmatpush.bf16.msra.mxu1 %v2886_v5  ;;  %v16_v14 = vld [vmem:[%s3999_s0] sm:$0xff]  ;;  %v2891_v26 = vld [vmem:[%s3998_s1 + $0x198] sm:$0xff]  ;;  %v2830_v27 = vld [vmem:[%s3999_s0 + $0x2c] sm:$0xf0]  ;;  %v3118_v35 = vunpack.c.l.b16 %v17_v25  ;;  %v3129_v40 = vunpack.c.h.b16 %v17_v25 }
   0x8   :  { %647 = vmatpush.bf16.msra.mxu2 %v2894_v6  ;;  %v2892_v15 = vld [vmem:[%s3998_s1 + $0x1a0] sm:$0xff]  ;;  %v3075_v18 = vunpack.c.l.b16 %v16_v14  ;;  %v3077_v19 = vunpack.c.h.b16 %v16_v14  ;;  %v19_v29 = vld [vmem:[%s3999_s0 + $0x18] sm:$0xff]  ;;  %v2080_v31 = vld [vmem:[%s3999_s0 + $0x30] sm:$0xf0] }
   0x9   :  { %676 = vmatpush.bf16.msra.mxu3 %v2902_v7  ;;  %v2900_v16 = vld [vmem:[%s3998_s1 + $0x1e0] sm:$0xff]  ;;  %v2086_v33 = vld [vmem:[%s3999_s0 + $0x28] sm:$0xf]  ;;  %v2831_v34 = vld [vmem:[%s3999_s0 + $0x34] sm:$0xf0]  ;;  %v118_v36 = vunpack.c.l.b16 %v19_v29  ;;  %v119_v41 = vunpack.c.h.b16 %v19_v29 }
   0xa   :  { %590 = vmatpush.bf16.msra.mxu0 %v2877_v8  ;;  %v2078_v22 = vld [vmem:[%s3999_s0 + $0x20] sm:$0xf]  ;;  %v2828_v28 = vld [vmem:[%s3999_s0 + $0x24] sm:$0xf]  ;;  %v3104_v30 = vpack.c.b16 %v116_v23, %v3075_v18  ;;  %v3110_v32 = vpack.c.b16 %v117_v24, %v3077_v19  ;;  %v2899_v37 = vld [vmem:[%s3998_s1 + $0x1d8] sm:$0xff]  ;;  %v3135_v44 = vor.u32 %v2831_v34, %v2086_v33 }
   0xb   :  { %619 = vmatpush.bf16.msra.mxu1 %v2885_v9  ;;  %v2829_v38 = vld [vmem:[%s3999_s0 + $0x2c] sm:$0xf]  ;;  %v2088_v39 = vld [vmem:[%s3999_s0 + $0x38] sm:$0xf0]  ;;  %v3131_v42 = vor.u32 %v2830_v27, %v2078_v22  ;;  %v3133_v43 = vor.u32 %v2828_v28, %v2080_v31  ;;  %v2874_v45 = vld [vmem:[%s3998_s1 + $0x110] sm:$0xff]  ;;  %v3146_v49 = vpack.c.b16 %v118_v36, %v3118_v35  ;;  %v3157_v53 = vpack.c.b16 %v119_v41, %v3129_v40 }
   0xc   :  { %648 = vmatpush.bf16.msra.mxu2 %v2893_v10  ;;  %v2882_v46 = vld [vmem:[%s3998_s1 + $0x150] sm:$0xff]  ;;  %v164_v47 = vshll.u32 %v3104_v30, 16  ;;  %v176_v48 = vshll.u32 %v3110_v32, 16  ;;  %v3148_v50 = vor.u32 %v2829_v38, %v2088_v39  ;;  %v162_v56 = vshrl.u32 %v3104_v30, 16  ;;  %v2873_v60 = vld [vmem:[%s3998_s1 + $0x108] sm:$0xff]  ;;  %v2872_v8 = vld [vmem:[%s3998_s1 + $0x100] sm:$0xff] }
   0xd   :  { %677 = vmatpush.bf16.msra.mxu3 %v2901_v11  ;;  %v2890_v51 = vld [vmem:[%s3998_s1 + $0x190] sm:$0xff]  ;;  %v169_v54 = vshll.u32 %v3131_v42, 16  ;;  %v188_v55 = vshll.u32 %v3146_v49, 16  ;;  %v174_v57 = vshrl.u32 %v3110_v32, 16  ;;  %v181_v58 = vshll.u32 %v3133_v43, 16  ;;  %v2881_v61 = vld [vmem:[%s3998_s1 + $0x148] sm:$0xff]  ;;  %vm326_vm2 = vmand %vm325_vm1, %vm160_vm0 }
   0xe   :  { %591 = vmatpush.bf16.msra.mxu0 %v2876_v12  ;;  %v2898_v52 = vld [vmem:[%s3998_s1 + $0x1d0] sm:$0xff]  ;;  %v200_v59 = vshll.u32 %v3157_v53, 16  ;;  %v166_v62 = vrot.slane %v164_v47, 1  ;;  %v178_v63 = vrot.slane %v176_v48, 1  ;;  %v193_v0 = vshll.u32 %v3135_v44, 16  ;;  %v2889_v2 = vld [vmem:[%s3998_s1 + $0x188] sm:$0xff]  ;;  %vm1130_vm5 = vmand %vm1129_vm4, %vm1028_vm3 }
   0xf   :  { %620 = vmatpush.bf16.msra.mxu1 %v2884_v13  ;;  %v205_v1 = vshll.u32 %v3148_v50, 16  ;;  %v2897_v3 = vld [vmem:[%s3998_s1 + $0x1c8] sm:$0xff]  ;;  %v186_v4 = vshrl.u32 %v3146_v49, 16  ;;  %v190_v5 = vrot.slane %v188_v55, 1  ;;  %v198_v6 = vshrl.u32 %v3157_v53, 16  ;;  %v2880_v9 = vld [vmem:[%s3998_s1 + $0x140] sm:$0xff] }
  0x10   :  { %649 = vmatpush.bf16.msra.mxu2 %v2892_v15  ;;  %v202_v7 = vrot.slane %v200_v59, 1  ;;  %v167_v10 = vor.u32 %v166_v62, %v162_v56  ;;  %v3199_v11 = vrot.slane %v169_v54, 1  ;;  %v179_v12 = vor.u32 %v178_v63, %v174_v57  ;;  %v2888_v14 = vld [vmem:[%s3998_s1 + $0x180] sm:$0xff]  ;;  %v2863_v22 = vld [vmem:[%s3998_s1 + $0xb8] sm:$0xff]  ;;  %v2862_v28 = vld [vmem:[%s3998_s1 + $0xb0] sm:$0xff] }
  0x11   :  { %678 = vmatpush.bf16.msra.mxu3 %v2900_v16  ;;  %v3205_v13 = vrot.slane %v181_v58, 1  ;;  %v2896_v15 = vld [vmem:[%s3998_s1 + $0x1c0] sm:$0xff]  ;;  %v191_v16 = vor.u32 %v190_v5, %v186_v4  ;;  %v3217_v17 = vrot.slane %v193_v0, 1  ;;  %v2871_v23 = vld [vmem:[%s3998_s1 + $0xf8] sm:$0xff]  ;;  %v2870_v29 = vld [vmem:[%s3998_s1 + $0xf0] sm:$0xff]  ;;  %v209_v5 = vshrl.u32 %v3131_v42, 16 }
  0x12   :  { %592 = vmatpush.bf16.msra.mxu0 %v2875_v20  ;;  %v203_v20 = vor.u32 %v202_v7, %v198_v6  ;;  %v2847_v24 = vld [vmem:[%s3998_s1 + $0x38] sm:$0xff]  ;;  %v2094_v31 = vld [vmem:[%s3999_s0 + $0x40] sm:$0xf]  ;;  %v2834_v33 = vld [vmem:[%s3999_s0 + $0x4c] sm:$0xf0] }
  0x13   :  { %621 = vmatpush.bf16.msra.mxu1 %v2883_v21  ;;  %v3223_v21 = vrot.slane %v205_v1, 1  ;;  %v2855_v25 = vld [vmem:[%s3998_s1 + $0x78] sm:$0xff]  ;;  %v184_v27 = vsel %vm160_vm0, %v179_v12, %v3205_v13  ;;  %v196_v34 = vsel %vm160_vm0, %v191_v16, %v3217_v17  ;;  %v2096_v38 = vld [vmem:[%s3999_s0 + $0x50] sm:$0xf0]  ;;  %v2102_v39 = vld [vmem:[%s3999_s0 + $0x48] sm:$0xf] }
  0x14   :  { %650 = vmatpush.bf16.msra.mxu2 %v2891_v26  ;;  %v172_v26 = vsel %vm160_vm0, %v167_v10, %v3199_v11  ;;  %v2835_v41 = vld [vmem:[%s3999_s0 + $0x54] sm:$0xf0]  ;;  %v225_v10 = vshrl.u32 %v3135_v44, 16  ;;  %v2845_v16 = vld [vmem:[%s3998_s1 + $0x28] sm:$0xff] }
  0x15   :  { %679 = vmatpush.bf16.msra.mxu3 %v2899_v37  ;;  %v208_v36 = vsel %vm160_vm0, %v203_v20, %v3223_v21  ;;  %v2832_v37 = vld [vmem:[%s3999_s0 + $0x44] sm:$0xf]  ;;  %v3285_v62 = vor.u32 %v2835_v41, %v2102_v39  ;;  %v2853_v20 = vld [vmem:[%s3998_s1 + $0x68] sm:$0xff]  ;;  %v2112_v41 = vld [vmem:[%s3999_s0 + $0x70] sm:$0xf0] }
  0x16   :  { %593 = vmatpush.bf16.msra.mxu0 %v2874_v45  ;;  %v2833_v45 = vld [vmem:[%s3999_s0 + $0x4c] sm:$0xf] }
  0x17   :  { %622 = vmatpush.bf16.msra.mxu1 %v2882_v46  ;;  %v2104_v46 = vld [vmem:[%s3999_s0 + $0x58] sm:$0xf0]  ;;  %v229_v12 = vshll.u32 %v3285_v62, 16 }
  0x18   :  { %651 = vmatpush.bf16.msra.mxu2 %v2890_v51  ;;  %v3275_v51 = vor.u32 %v2834_v33, %v2094_v31  ;;  %v3287_v63 = vor.u32 %v2833_v45, %v2104_v46  ;;  %v2867_v33 = vld [vmem:[%s3998_s1 + $0xd8] sm:$0xff]  ;;  %v2118_v45 = vld [vmem:[%s3999_s0 + $0x68] sm:$0xf] }
  0x19   :  { %680 = vmatpush.bf16.msra.mxu3 %v2898_v52  ;;  %v3277_v52 = vor.u32 %v2832_v37, %v2096_v38  ;;  %v2836_v37 = vld [vmem:[%s3999_s0 + $0x64] sm:$0xf]  ;;  %v2839_v46 = vld [vmem:[%s3999_s0 + $0x74] sm:$0xf0] }
  0x1a   :  { %594 = vmatpush.bf16.msra.mxu0 %v2873_v60  ;;  %v2846_v60 = vld [vmem:[%s3998_s1 + $0x30] sm:$0xff]  ;;  %v213_v7 = vshll.u32 %v3275_v51, 16 }
  0x1b   :  { %623 = vmatpush.bf16.msra.mxu1 %v2881_v61  ;;  %v2854_v61 = vld [vmem:[%s3998_s1 + $0x70] sm:$0xff] }
  0x1c   :  { %652 = vmatpush.bf16.msra.mxu2 %v2889_v2  ;;  %v2861_v2 = vld [vmem:[%s3998_s1 + $0xa8] sm:$0xff] }
  0x1d   :  { %681 = vmatpush.bf16.msra.mxu3 %v2897_v3  ;;  %v2869_v3 = vld [vmem:[%s3998_s1 + $0xe8] sm:$0xff] }
  0x1e   :  { %595 = vmatpush.bf16.msra.mxu0 %v2872_v8  ;;  %v217_v8 = vshrl.u32 %v3133_v43, 16 }
  0x1f   :  { %624 = vmatpush.bf16.msra.mxu1 %v2880_v9  ;;  %v221_v9 = vshll.u32 %v3277_v52, 16 }
  0x20   :  { %653 = vmatpush.bf16.msra.mxu2 %v2888_v14  ;;  %v233_v14 = vshrl.u32 %v3148_v50, 16 }
  0x21   :  { %682 = vmatpush.bf16.msra.mxu3 %v2896_v15  ;;  %596 = vmatmul.bf16.vlgmr.msra.gmra.mxu0 %v172_v26  ;;  %v237_v15 = vshll.u32 %v3287_v63, 16  ;;  %v219_v26 = vor.u32 %v217_v8, %v3205_v13  ;;  %v2844_v13 = vld [vmem:[%s3998_s1 + $0x20] sm:$0xff] }
  0x22   :  { %625 = vmatmul.bf16.vlgmr.msra.gmra.mxu1 %v184_v27  ;;  %912 = vmatpush.bf16.msrb.mxu0 %v2847_v24  ;;  %v211_v24 = vor.u32 %v209_v5, %v3199_v11  ;;  %v3327_v27 = vrot.slane %v221_v9, 1  ;;  %v235_v11 = vor.u32 %v233_v14, %v3223_v21  ;;  %v2859_v21 = vld [vmem:[%s3998_s1 + $0x98] sm:$0xff] }
  0x23   :  { %654 = vmatmul.bf16.vlgmr.msra.gmra.mxu2 %v196_v34  ;;  %941 = vmatpush.bf16.msrb.mxu1 %v2855_v25  ;;  %v3320_v25 = vrot.slane %v213_v7, 1  ;;  %v3341_v31 = vrot.slane %v237_v15, 1  ;;  %v2110_v34 = vld [vmem:[%s3999_s0 + $0x60] sm:$0xf] }
  0x24   :  { %970 = vmatpush.bf16.msrb.mxu2 %v2863_v22  ;;  %683 = vmatmul.bf16.vlgmr.msra.gmra.mxu3 %v208_v36  ;;  %v2860_v22 = vld [vmem:[%s3998_s1 + $0xa0] sm:$0xff]  ;;  %v2838_v36 = vld [vmem:[%s3999_s0 + $0x6c] sm:$0xf0]  ;;  %v224_v39 = vsel %vm160_vm0, %v219_v26, %v3327_v27  ;;  %v3401_v26 = vor.u32 %v2836_v37, %v2112_v41  ;;  %v249_v37 = vshrl.u32 %v3277_v52, 16 }
  0x25   :  { %999 = vmatpush.bf16.msrb.mxu3 %v2871_v23  ;;  %v2868_v23 = vld [vmem:[%s3998_s1 + $0xe0] sm:$0xff]  ;;  %v216_v38 = vsel %vm160_vm0, %v211_v24, %v3320_v25  ;;  %v3399_v24 = vor.u32 %v2838_v36, %v2110_v34  ;;  %v241_v34 = vshrl.u32 %v3275_v51, 16 }
  0x26   :  { %913 = vmatpush.bf16.msrb.mxu0 %v2846_v60 }
  0x27   :  { %942 = vmatpush.bf16.msrb.mxu1 %v2854_v61  ;;  %v240_v61 = vsel %vm160_vm0, %v235_v11, %v3341_v31  ;;  %v4006_v36 = vshll.u32 %v3399_v24, 16 }
  0x28   :  { %971 = vmatpush.bf16.msrb.mxu2 %v2862_v28  ;;  %v227_v28 = vor.u32 %v225_v10, %v3217_v17  ;;  %v2852_v17 = vld [vmem:[%s3998_s1 + $0x60] sm:$0xff] }
  0x29   :  { %1000 = vmatpush.bf16.msrb.mxu3 %v2870_v29  ;;  %v3334_v29 = vrot.slane %v229_v12, 1 }
  0x2a   :  { %914 = vmatpush.bf16.msrb.mxu0 %v2845_v16  ;;  %v2851_v16 = vld [vmem:[%s3998_s1 + $0x58] sm:$0xff] }
  0x2b   :  { %943 = vmatpush.bf16.msrb.mxu1 %v2853_v20  ;;  %v232_v60 = vsel %vm160_vm0, %v227_v28, %v3334_v29  ;;  %v2120_v20 = vld [vmem:[%s3999_s0 + $0x78] sm:$0xf0]  ;;  %v3403_v28 = vor.u32 %v2839_v46, %v2118_v45  ;;  %v265_v45 = vshrl.u32 %v3287_v63, 16 }
  0x2c   :  { %972 = vmatpush.bf16.msrb.mxu2 %v2861_v2  ;;  %v2837_v2 = vld [vmem:[%s3999_s0 + $0x6c] sm:$0xf] }
  0x2d   :  { %1001 = vmatpush.bf16.msrb.mxu3 %v2869_v3  ;;  %v2843_v3 = vld [vmem:[%s3998_s1 + $0x18] sm:$0xff]  ;;  %v3405_v11 = vor.u32 %v2837_v2, %v2120_v20  ;;  %v4003_v41 = vshll.u32 %v3403_v28, 16  ;;  %v2856_v2 = vld [vmem:[%s3998_s1 + $0x80] sm:$0xff]  ;;  %v247_v20 = vrot.slane %v4006_v36, 1 }
  0x2e   :  { %915 = vmatpush.bf16.msrb.mxu0 %v2844_v13  ;;  %v2842_v13 = vld [vmem:[%s3998_s1 + $0x10] sm:$0xff] }
  0x2f   :  { %944 = vmatpush.bf16.msrb.mxu1 %v2852_v17  ;;  %v2850_v17 = vld [vmem:[%s3998_s1 + $0x50] sm:$0xff]  ;;  %v4004_v46 = vshll.u32 %v3405_v11, 16 }
  0x30   :  { %973 = vmatpush.bf16.msrb.mxu2 %v2860_v22  ;;  %v2858_v22 = vld [vmem:[%s3998_s1 + $0x90] sm:$0xff] }
  0x31   :  { %1002 = vmatpush.bf16.msrb.mxu3 %v2868_v23  ;;  %v2866_v23 = vld [vmem:[%s3998_s1 + $0xd0] sm:$0xff]  ;;  %601 = vmatmul.bf16.gmra.mxu0 %v216_v38  ;;  %v4005_v38 = vshll.u32 %v3401_v26, 16 }
  0x32   :  { %630 = vmatmul.bf16.gmra.mxu1 %v224_v39  ;;  %916 = vmatpush.bf16.msrb.mxu0 %v2843_v3  ;;  %v257_v39 = vshrl.u32 %v3285_v62, 16  ;;  %v2864_v3 = vld [vmem:[%s3998_s1 + $0xc0] sm:$0xff] }
  0x33   :  { %659 = vmatmul.bf16.gmra.mxu2 %v232_v60  ;;  %945 = vmatpush.bf16.msrb.mxu1 %v2851_v16  ;;  %v2841_v60 = vld [vmem:[%s3998_s1 + $0x8] sm:$0xff]  ;;  %v243_v16 = vor.u32 %v241_v34, %v3320_v25  ;;  %v267_v25 = vor.u32 %v265_v45, %v3341_v31 }
  0x34   :  { %974 = vmatpush.bf16.msrb.mxu2 %v2859_v21  ;;  %688 = vmatmul.bf16.gmra.mxu3 %v240_v61  ;;  %v2857_v21 = vld [vmem:[%s3998_s1 + $0x88] sm:$0xff] }
  0x35   :  { %1003 = vmatpush.bf16.msrb.mxu3 %v2867_v33  ;;  %v2865_v33 = vld [vmem:[%s3998_s1 + $0xc8] sm:$0xff] }
  0x36   :  { %917 = vmatpush.bf16.msrb.mxu0 %v2842_v13  ;;  %v2849_v61 = vld [vmem:[%s3998_s1 + $0x48] sm:$0xff]  ;;  %v259_v13 = vor.u32 %v257_v39, %v3334_v29  ;;  %v2848_v29 = vld [vmem:[%s3998_s1 + $0x40] sm:$0xff] }
  0x37   :  { %946 = vmatpush.bf16.msrb.mxu1 %v2850_v17  ;;  %v263_v17 = vrot.slane %v4003_v41, 1 }
  0x38   :  { %975 = vmatpush.bf16.msrb.mxu2 %v2858_v22  ;;  %v251_v22 = vor.u32 %v249_v37, %v3327_v27  ;;  %v2840_v27 = vld [vmem:[%s3998_s1] sm:$0xff] }
  0x39   :  { %1004 = vmatpush.bf16.msrb.mxu3 %v2866_v23  ;;  %v255_v23 = vrot.slane %v4005_v38, 1  ;;  %v264_v31 = vsel %vm160_vm0, %v259_v13, %v263_v17  ;;  %v273_v13 = vshrl.u32 %v3399_v24, 16 }
  0x3a   :  { %918 = vmatpush.bf16.msrb.mxu0 %v2841_v60  ;;  %v3471_v60 = vpack.c.b16 %v3075_v18, %v3075_v18  ;;  %v3488_v18 = vpack.c.b16 %v3118_v35, %v3118_v35  ;;  %v2910_v35 = vld [vmem:[%s3998_s1 + $0x230] sm:$0xff] }
  0x3b   :  { %947 = vmatpush.bf16.msrb.mxu1 %v2849_v61  ;;  %v256_v41 = vsel %vm160_vm0, %v251_v22, %v255_v23  ;;  %v3475_v61 = vpack.c.b16 %v3077_v19, %v3077_v19  ;;  %v3492_v19 = vpack.c.b16 %v3129_v40, %v3129_v40  ;;  %v2934_v22 = vld [vmem:[%s3998_s1 + $0x2f0] sm:$0xff] }
  0x3c   :  { %976 = vmatpush.bf16.msrb.mxu2 %v2857_v21  ;;  %v271_v21 = vrot.slane %v4004_v46, 1  ;;  %v2918_v40 = vld [vmem:[%s3998_s1 + $0x270] sm:$0xff] }
  0x3d   :  { %1005 = vmatpush.bf16.msrb.mxu3 %v2865_v33  ;;  %v248_v33 = vsel %vm160_vm0, %v243_v16, %v247_v20  ;;  %v2926_v16 = vld [vmem:[%s3998_s1 + $0x2b0] sm:$0xff] }
  0x3e   :  { %v272_v46 = vsel %vm160_vm0, %v267_v25, %v271_v21  ;;  %919 = vmatpush.bf16.msrb.mxu0 %v2840_v27  ;;  %v4007_v25 = vshll.u32 %v3471_v60, 16  ;;  %v4008_v27 = vshrl.u32 %v3401_v26, 16 }
  0x3f   :  { %948 = vmatpush.bf16.msrb.mxu1 %v2848_v29  ;;  %v310_v29 = vshll.u32 %v3475_v61, 16 }
  0x40   :  { %977 = vmatpush.bf16.msrb.mxu2 %v2856_v2  ;;  %v2927_v2 = vld [vmem:[%s3998_s1 + $0x2b8] sm:$0xff]  ;;  %v278_v38 = vor.u32 %v4008_v27, %v255_v23 }
  0x41   :  { %1006 = vmatpush.bf16.msrb.mxu3 %v2864_v3  ;;  %606 = vmatmul.bf16.gmra.mxu0 %v248_v33  ;;  %v2935_v3 = vld [vmem:[%s3998_s1 + $0x2f8] sm:$0xff]  ;;  %v279_v33 = vshrl.u32 %v3403_v28, 16  ;;  %v312_v36 = vrot.slane %v310_v29, 1 }
  0x42   :  { %635 = vmatmul.bf16.gmra.mxu1 %v256_v41  ;;  %v2911_v41 = vld [vmem:[%s3998_s1 + $0x238] sm:$0xff] }
  0x43   :  { %664 = vmatmul.bf16.gmra.mxu2 %v264_v31  ;;  %1392 = vmatpush.bf16.msra.mxu0 %v2911_v41  ;;  %v4009_v31 = vshll.u32 %v3488_v18, 16  ;;  %v275_v41 = vor.u32 %v273_v13, %v247_v20 }
  0x44   :  { %693 = vmatmul.bf16.gmra.mxu3 %v272_v46  ;;  %v2919_v46 = vld [vmem:[%s3998_s1 + $0x278] sm:$0xff]  ;;  %1450 = vmatpush.bf16.msra.mxu2 %v2927_v2  ;;  %v282_v2 = vshrl.u32 %v3405_v11, 16 }
  0x45   :  { %1479 = vmatpush.bf16.msra.mxu3 %v2935_v3  ;;  %1421 = vmatpush.bf16.msra.mxu1 %v2919_v46  ;;  %v318_v3 = vshll.u32 %v3492_v19, 16  ;;  %v308_v46 = vrot.slane %v4007_v25, 1  ;;  %v328_v25 = vsel %vm326_vm2, %v278_v38, %v312_v36  ;;  %v2917_v36 = vld [vmem:[%s3998_s1 + $0x268] sm:$0xff]  ;;  %v2924_v38 = vld [vmem:[%s3998_s1 + $0x2a0] sm:$0xff] }
  0x46   :  { %v284_v20 = vor.u32 %v282_v2, %v271_v21  ;;  %v2909_v21 = vld [vmem:[%s3998_s1 + $0x228] sm:$0xff] }
  0x47   :  { %1393 = vmatpush.bf16.msra.mxu0 %v2910_v35  ;;  %v320_v35 = vrot.slane %v318_v3, 1 }
  0x48   :  { %1451 = vmatpush.bf16.msra.mxu2 %v2926_v16  ;;  %v281_v16 = vor.u32 %v279_v33, %v263_v17  ;;  %v2925_v17 = vld [vmem:[%s3998_s1 + $0x2a8] sm:$0xff] }
  0x49   :  { %1480 = vmatpush.bf16.msra.mxu3 %v2934_v22  ;;  %1422 = vmatpush.bf16.msra.mxu1 %v2918_v40  ;;  %v316_v22 = vrot.slane %v4009_v31, 1  ;;  %v327_v40 = vsel %vm326_vm2, %v275_v41, %v308_v46  ;;  %v330_v27 = vsel %vm326_vm2, %v284_v20, %v320_v35  ;;  %v2933_v31 = vld [vmem:[%s3998_s1 + $0x2e8] sm:$0xff]  ;;  %v2916_v41 = vld [vmem:[%s3998_s1 + $0x260] sm:$0xff]  ;;  %v2931_v46 = vld [vmem:[%s3998_s1 + $0x2d8] sm:$0xff] }
  0x4a   :  { %v2922_v20 = vld [vmem:[%s3998_s1 + $0x290] sm:$0xff] }
  0x4b   :  { %v329_v23 = vsel %vm326_vm2, %v281_v16, %v316_v22  ;;  %1394 = vmatpush.bf16.msra.mxu0 %v2909_v21  ;;  %v2907_v16 = vld [vmem:[%s3998_s1 + $0x218] sm:$0xff]  ;;  %v2930_v35 = vld [vmem:[%s3998_s1 + $0x2d0] sm:$0xff]  ;;  %v2929_v21 = vld [vmem:[%s3998_s1 + $0x2c8] sm:$0xff] }
  0x4c   :  { %1452 = vmatpush.bf16.msra.mxu2 %v2925_v17  ;;  %v2915_v22 = vld [vmem:[%s3998_s1 + $0x258] sm:$0xff]  ;;  %v2921_v17 = vld [vmem:[%s3998_s1 + $0x288] sm:$0xff] }
  0x4d   :  { %1481 = vmatpush.bf16.msra.mxu3 %v2933_v31  ;;  %1423 = vmatpush.bf16.msra.mxu1 %v2917_v36  ;;  %v2923_v31 = vld [vmem:[%s3998_s1 + $0x298] sm:$0xff]  ;;  %v2905_v36 = vld [vmem:[%s3998_s1 + $0x208] sm:$0xff] }
  0x50   :  { %1453 = vmatpush.bf16.msra.mxu2 %v2924_v38  ;;  %v2913_v38 = vld [vmem:[%s3998_s1 + $0x248] sm:$0xff] }
  0x51   :  { %611 = vmatmul.bf16.gmra.mxu0 %v327_v40  ;;  %1424 = vmatpush.bf16.msra.mxu1 %v2916_v41  ;;  %v2906_v40 = vld [vmem:[%s3998_s1 + $0x210] sm:$0xff]  ;;  %v2904_v41 = vld [vmem:[%s3998_s1 + $0x200] sm:$0xff] }
  0x52   :  { %640 = vmatmul.bf16.gmra.mxu1 %v328_v25  ;;  %v2932_v25 = vld [vmem:[%s3998_s1 + $0x2e0] sm:$0xff] }
  0x53   :  { %669 = vmatmul.bf16.gmra.mxu2 %v329_v23  ;;  %1482 = vmatpush.bf16.msra.mxu3 %v2932_v25  ;;  %v2914_v23 = vld [vmem:[%s3998_s1 + $0x250] sm:$0xff]  ;;  %v2920_v25 = vld [vmem:[%s3998_s1 + $0x280] sm:$0xff] }
  0x54   :  { %698 = vmatmul.bf16.gmra.mxu3 %v330_v27  ;;  %v2908_v27 = vld [vmem:[%s3998_s1 + $0x220] sm:$0xff]  ;;  %1454 = vmatpush.bf16.msra.mxu2 %v2923_v31 }
  0x55   :  { %1395 = vmatpush.bf16.msra.mxu0 %v2908_v27  ;;  %1425 = vmatpush.bf16.msra.mxu1 %v2915_v22  ;;  %v2928_v27 = vld [vmem:[%s3998_s1 + $0x2c0] sm:$0xff]  ;;  %v1036_v22 = vrot.slane %v174_v57, 2  ;;  %v1039_v57 = vrot.slane %v217_v8, 2 }
  0x56   :  { %v2912_v31 = vld [vmem:[%s3998_s1 + $0x240] sm:$0xff] }
  0x57   :  { %1483 = vmatpush.bf16.msra.mxu3 %v2931_v46  ;;  %v1029_v46 = vrot.slane %v162_v56, 2  ;;  %v1032_v56 = vrot.slane %v209_v5, 2  ;;  %v1044_v5 = vrot.slane %v188_v55, 3 }
  0x58   :  { %1455 = vmatpush.bf16.msra.mxu2 %v2922_v20  ;;  %v1040_v20 = vrot.slane %v181_v58, 3  ;;  %v1046_v58 = vrot.slane %v225_v10, 2 }
  0x59   :  { %1396 = vmatpush.bf16.msra.mxu0 %v2907_v16  ;;  %1426 = vmatpush.bf16.msra.mxu1 %v2914_v23  ;;  %v1033_v16 = vrot.slane %v169_v54, 3  ;;  %v1050_v23 = vrot.slane %v198_v6, 2  ;;  %v1054_v54 = vrot.slane %v205_v1, 3  ;;  %v1037_v6 = vrot.slane %v176_v48, 3 }
  0x5a   :  { %v1051_v1 = vrot.slane %v200_v59, 3 }
  0x5b   :  { %1484 = vmatpush.bf16.msra.mxu3 %v2930_v35  ;;  %v1043_v35 = vrot.slane %v186_v4, 2  ;;  %v1053_v4 = vrot.slane %v233_v14, 2  ;;  %v1038_v10 = vor.u32 %v1037_v6, %v1036_v22  ;;  %v2966_v22 = vld [vmem:[%s3998_s1 + $0x3f0] sm:$0xff] }
  0x5c   :  { %1456 = vmatpush.bf16.msra.mxu2 %v2921_v17  ;;  %v3646_v17 = vor.u32 %v1033_v16, %v1032_v56  ;;  %v2958_v16 = vld [vmem:[%s3998_s1 + $0x3b0] sm:$0xff]  ;;  %v2941_v56 = vld [vmem:[%s3998_s1 + $0x328] sm:$0xff] }
  0x5d   :  { %1397 = vmatpush.bf16.msra.mxu0 %v2906_v40  ;;  %1427 = vmatpush.bf16.msra.mxu1 %v2913_v38  ;;  %v1047_v40 = vrot.slane %v193_v0, 3  ;;  %v1030_v0 = vrot.slane %v164_v47, 3  ;;  %v1045_v14 = vor.u32 %v1044_v5, %v1043_v35  ;;  %v1052_v47 = vor.u32 %v1051_v1, %v1050_v23  ;;  %v2950_v35 = vld [vmem:[%s3998_s1 + $0x370] sm:$0xff]  ;;  %v2965_v23 = vld [vmem:[%s3998_s1 + $0x3e8] sm:$0xff]  ;;  %v2940_v5 = vld [vmem:[%s3998_s1 + $0x320] sm:$0xff] }
  0x5e   :  { %v3656_v55 = vor.u32 %v1054_v54, %v1053_v4  ;;  %v2949_v54 = vld [vmem:[%s3998_s1 + $0x368] sm:$0xff]  ;;  %v2948_v1 = vld [vmem:[%s3998_s1 + $0x360] sm:$0xff] }
  0x5f   :  { %1485 = vmatpush.bf16.msra.mxu3 %v2929_v21  ;;  %v1031_v8 = vor.u32 %v1030_v0, %v1029_v46  ;;  %v3648_v21 = vor.u32 %v1040_v20, %v1039_v57  ;;  %v2951_v46 = vld [vmem:[%s3998_s1 + $0x378] sm:$0xff]  ;;  %v2942_v20 = vld [vmem:[%s3998_s1 + $0x330] sm:$0xff]  ;;  %v2956_v57 = vld [vmem:[%s3998_s1 + $0x3a0] sm:$0xff] }
  0x60   :  { %1457 = vmatpush.bf16.msra.mxu2 %v2920_v25  ;;  %v2959_v25 = vld [vmem:[%s3998_s1 + $0x3b8] sm:$0xff] }
  0x61   :  { %920 = vmatmul.bf16.vlgmr.msrb.gmra.mxu0 %v3104_v30  ;;  %1428 = vmatpush.bf16.msra.mxu1 %v2912_v31  ;;  %v1035_v48 = vsel %vm1028_vm3, %v1031_v8, %v3646_v17  ;;  %v1042_v59 = vsel %vm1028_vm3, %v1038_v10, %v3648_v21  ;;  %v2943_v31 = vld [vmem:[%s3998_s1 + $0x338] sm:$0xff] }
  0x62   :  { %949 = vmatmul.bf16.vlgmr.msrb.gmra.mxu1 %v3110_v32  ;;  %1398 = vmatpush.bf16.msra.mxu0 %v2905_v36  ;;  %v3650_v36 = vor.u32 %v1047_v40, %v1046_v58  ;;  %v2957_v40 = vld [vmem:[%s3998_s1 + $0x3a8] sm:$0xff]  ;;  %v2964_v58 = vld [vmem:[%s3998_s1 + $0x3e0] sm:$0xff]  ;;  %v2955_v8 = vld [vmem:[%s3998_s1 + $0x398] sm:$0xff] }
  0x63   :  { %978 = vmatmul.bf16.vlgmr.msrb.gmra.mxu2 %v3146_v49  ;;  %1486 = vmatpush.bf16.msra.mxu3 %v2928_v27  ;;  %v2967_v27 = vld [vmem:[%s3998_s1 + $0x3f8] sm:$0xff] }
  0x64   :  { %1007 = vmatmul.bf16.vlgmr.msrb.gmra.mxu3 %v3157_v53  ;;  %v1049_v38 = vsel %vm1028_vm3, %v1045_v14, %v3650_v36  ;;  %1893 = vmatpush.bf16.msrb.mxu2 %v2959_v25  ;;  %v2963_v10 = vld [vmem:[%s3998_s1 + $0x3d8] sm:$0xff] }
  0x65   :  { %1864 = vmatpush.bf16.msrb.mxu1 %v2951_v46  ;;  %v1065_v46 = vrot.slane %v257_v39, 2  ;;  %v2962_v39 = vld [vmem:[%s3998_s1 + $0x3d0] sm:$0xff] }
  0x66   :  { %1399 = vmatpush.bf16.msra.mxu0 %v2904_v41  ;;  %v1056_v41 = vsel %vm1028_vm3, %v1052_v47, %v3656_v55 }
  0x67   :  { %1922 = vmatpush.bf16.msrb.mxu3 %v2967_v27 }
  0x68   :  { %1894 = vmatpush.bf16.msrb.mxu2 %v2958_v16 }
  0x69   :  { %1865 = vmatpush.bf16.msrb.mxu1 %v2950_v35 }
  0x6a   :  { %1835 = vmatpush.bf16.msrb.mxu0 %v2943_v31  ;;  %v1062_v31 = vrot.slane %v221_v9, 3  ;;  %v2947_v9 = vld [vmem:[%s3998_s1 + $0x358] sm:$0xff] }
  0x6b   :  { %1923 = vmatpush.bf16.msrb.mxu3 %v2966_v22  ;;  %v1066_v22 = vrot.slane %v229_v12, 3  ;;  %v2954_v12 = vld [vmem:[%s3998_s1 + $0x390] sm:$0xff] }
  0x6c   :  { %1895 = vmatpush.bf16.msrb.mxu2 %v2957_v40 }
  0x6d   :  { %1866 = vmatpush.bf16.msrb.mxu1 %v2949_v54  ;;  %v3758_v35 = vor.u32 %v1066_v22, %v1065_v46  ;;  %v4012_v46 = vshll.u32 %v3401_v26, 16  ;;  %v1081_v22 = vrot.slane %v279_v33, 2  ;;  %v2945_v33 = vld [vmem:[%s3998_s1 + $0x348] sm:$0xff] }
  0x6e   :  { %1836 = vmatpush.bf16.msrb.mxu0 %v2942_v20 }
  0x6f   :  { %1924 = vmatpush.bf16.msrb.mxu3 %v2965_v23 }
  0x70   :  { %1896 = vmatpush.bf16.msrb.mxu2 %v2956_v57 }
  0x71   :  { %925 = vmatmul.bf16.gmra.mxu0 %v3131_v42  ;;  %1867 = vmatpush.bf16.msrb.mxu1 %v2948_v1 }
  0x72   :  { %954 = vmatmul.bf16.gmra.mxu1 %v3133_v43  ;;  %1837 = vmatpush.bf16.msrb.mxu0 %v2941_v56 }
  0x73   :  { %983 = vmatmul.bf16.gmra.mxu2 %v3135_v44  ;;  %1925 = vmatpush.bf16.msrb.mxu3 %v2964_v58 }
  0x74   :  { %1012 = vmatmul.bf16.gmra.mxu3 %v3148_v50  ;;  %1897 = vmatpush.bf16.msrb.mxu2 %v2955_v8 }
  0x75   :  { %1868 = vmatpush.bf16.msrb.mxu1 %v2947_v9  ;;  %v4014_v9 = vshll.u32 %v3405_v11, 16 }
  0x76   :  { %1838 = vmatpush.bf16.msrb.mxu0 %v2940_v5  ;;  %v1068_v5 = vsel %vm1028_vm3, %v3650_v36, %v3758_v35  ;;  %v2961_v36 = vld [vmem:[%s3998_s1 + $0x3c8] sm:$0xff] }
  0x77   :  { %1926 = vmatpush.bf16.msrb.mxu3 %v2963_v10  ;;  %v2938_v10 = vld [vmem:[%s3998_s1 + $0x310] sm:$0xff] }
  0x78   :  { %1898 = vmatpush.bf16.msrb.mxu2 %v2954_v12  ;;  %v1086_v12 = vrot.slane %v4014_v9, 3  ;;  %v4016_v9 = vshll.u32 %v3488_v18, 16 }
  0x7b   :  { %1927 = vmatpush.bf16.msrb.mxu3 %v2962_v39 }
  0x7f   :  { %1928 = vmatpush.bf16.msrb.mxu3 %v2961_v36 }
  0x81   :  { %930 = vmatmul.bf16.gmra.mxu0 %v3275_v51 }
  0x82   :  { %959 = vmatmul.bf16.gmra.mxu1 %v3277_v52 }
  0x83   :  { %988 = vmatmul.bf16.gmra.mxu2 %v3285_v62 }
  0x84   :  { %1017 = vmatmul.bf16.gmra.mxu3 %v3287_v63 }
  0x91   :  { %935 = vmatmul.bf16.gmra.mxu0 %v3399_v24 }
  0x92   :  { %964 = vmatmul.bf16.gmra.mxu1 %v3401_v26 }
  0x93   :  { %993 = vmatmul.bf16.gmra.mxu2 %v3403_v28 }
  0x94   :  { %1022 = vmatmul.bf16.gmra.mxu3 %v3405_v11 }
  0x9e   :  { %v597_v4 = vpop.f32.mrf.mxu0 }
  0x9f   :  { %v626_v0 = vpop.f32.mrf.mxu1 }
  0xa0   :  { %v627_v6 = vadd.f32 %v626_v0, %v597_v4 }
  0xa1   :  { %1400 = vmatmul.bf16.vlgmr.msra.gmra.mxu0 %v1035_v48  ;;  %v1057_v48 = vrot.slane %v241_v34, 2  ;;  %v1069_v34 = vrot.slane %v265_v45, 2 }
  0xa2   :  { %1429 = vmatmul.bf16.vlgmr.msra.gmra.mxu1 %v1042_v59  ;;  %v1058_v59 = vrot.slane %v213_v7, 3  ;;  %v1070_v7 = vrot.slane %v237_v15, 3 }
  0xa3   :  { %1458 = vmatmul.bf16.vlgmr.msra.gmra.mxu2 %v1049_v38 }
  0xa4   :  { %1487 = vmatmul.bf16.vlgmr.msra.gmra.mxu3 %v1056_v41  ;;  %v1061_v41 = vrot.slane %v249_v37, 2  ;;  %v2939_v37 = vld [vmem:[%s3998_s1 + $0x318] sm:$0xff]  ;;  %v3754_v45 = vor.u32 %v1058_v59, %v1057_v48  ;;  %v3760_v40 = vor.u32 %v1070_v7, %v1069_v34  ;;  %v4010_v48 = vshll.u32 %v3399_v24, 16 }
  0xa5   :  { %1839 = vmatpush.bf16.msrb.mxu0 %v2939_v37  ;;  %v4013_v7 = vshll.u32 %v3403_v28, 16 }
  0xa6   :  { %v655_v14 = vpop.f32.mrf.mxu2  ;;  %v599_v25 = vpop.f32.mrf.mxu0  ;;  %v3756_v15 = vor.u32 %v1062_v31, %v1061_v41  ;;  %v1060_v4 = vsel %vm1028_vm3, %v3646_v17, %v3754_v45  ;;  %v1072_v1 = vsel %vm1028_vm3, %v3656_v55, %v3760_v40  ;;  %v2946_v17 = vld [vmem:[%s3998_s1 + $0x350] sm:$0xff]  ;;  %v1074_v59 = vrot.slane %v4010_v48, 3 }
  0xa7   :  { %v684_v47 = vpop.f32.mrf.mxu3  ;;  %v656_v38 = vadd.f32 %v655_v14, %v627_v6  ;;  %v628_v27 = vpop.f32.mrf.mxu1  ;;  %1869 = vmatpush.bf16.msrb.mxu1 %v2946_v17  ;;  %v4011_v41 = vshrl.u32 %v3401_v26, 16  ;;  %v1082_v37 = vrot.slane %v4013_v7, 3  ;;  %v1113_v7 = vrot.slane %v310_v29, 3 }
  0xa8   :  { %v629_v16 = vadd.f32 %v628_v27, %v599_v25  ;;  %v1064_v0 = vsel %vm1028_vm3, %v3648_v21, %v3756_v15  ;;  %v2953_v21 = vld [vmem:[%s3998_s1 + $0x388] sm:$0xff] }
  0xa9   :  { %v3740_v20 = vadd.f32 %v684_v47, %v656_v38  ;;  %1840 = vmatpush.bf16.msrb.mxu0 %v2938_v10  ;;  %1899 = vmatpush.bf16.msrb.mxu2 %v2953_v21  ;;  %v1073_v47 = vrot.slane %v273_v13, 2  ;;  %v1077_v31 = vrot.slane %v4011_v41, 2  ;;  %v1085_v13 = vrot.slane %v282_v2, 2  ;;  %v2960_v2 = vld [vmem:[%s3998_s1 + $0x3c0] sm:$0xff] }
  0xaa   :  { %1929 = vmatpush.bf16.msrb.mxu3 %v2960_v2 }
  0xab   :  { %1870 = vmatpush.bf16.msrb.mxu1 %v2945_v33  ;;  %v1123_v33 = vrot.slane %v318_v3, 3 }
  0xae   :  { %v657_v23 = vpop.f32.mrf.mxu2  ;;  %v602_v57 = vpop.f32.mrf.mxu0 }
  0xaf   :  { %v686_v56 = vpop.f32.mrf.mxu3  ;;  %v658_v54 = vadd.f32 %v657_v23, %v629_v16  ;;  %v631_v58 = vpop.f32.mrf.mxu1  ;;  %v1078_v16 = vrot.slane %v4012_v46, 3  ;;  %v2937_v23 = vld [vmem:[%s3998_s1 + $0x308] sm:$0xff] }
  0xb0   :  { %v632_v6 = vadd.f32 %v631_v58, %v602_v57  ;;  %1841 = vmatpush.bf16.msrb.mxu0 %v2937_v23  ;;  %v1083_v58 = vor.u32 %v1082_v37, %v1081_v22 }
  0xb1   :  { %v3774_v8 = vadd.f32 %v686_v56, %v658_v54  ;;  %1405 = vmatmul.bf16.gmra.mxu0 %v1060_v4  ;;  %v2952_v56 = vld [vmem:[%s3998_s1 + $0x380] sm:$0xff]  ;;  %v1075_v54 = vor.u32 %v1074_v59, %v1073_v47  ;;  %v1079_v57 = vor.u32 %v1078_v16, %v1077_v31  ;;  %v1087_v4 = vor.u32 %v1086_v12, %v1085_v13 }
  0xb2   :  { %1434 = vmatmul.bf16.gmra.mxu1 %v1064_v0  ;;  %1900 = vmatpush.bf16.msrb.mxu2 %v2952_v56  ;;  %v1084_v47 = vsel %vm1028_vm3, %v3758_v35, %v1083_v58  ;;  %v1118_v12 = vrot.slane %v4016_v9, 3 }
  0xb3   :  { %1463 = vmatmul.bf16.gmra.mxu2 %v1068_v5  ;;  %v2936_v5 = vld [vmem:[%s3998_s1 + $0x300] sm:$0xff]  ;;  %v1076_v36 = vsel %vm1028_vm3, %v3754_v45, %v1075_v54  ;;  %v1088_v48 = vsel %vm1028_vm3, %v3760_v40, %v1087_v4  ;;  %v1110_v45 = vshrl.u32 %v3475_v61, 16  ;;  %v4015_v40 = vshll.u32 %v3471_v60, 16 }
  0xb4   :  { %1492 = vmatmul.bf16.gmra.mxu3 %v1072_v1  ;;  %v2944_v1 = vld [vmem:[%s3998_s1 + $0x340] sm:$0xff]  ;;  %1842 = vmatpush.bf16.msrb.mxu0 %v2936_v5 }
  0xb5   :  { %1871 = vmatpush.bf16.msrb.mxu1 %v2944_v1  ;;  %v1108_v31 = vrot.slane %v4015_v40, 3  ;;  %v2995_v40 = vmov 0  }
  0xb6   :  { %v660_v55 = vpop.f32.mrf.mxu2  ;;  %v604_v25 = vpop.f32.mrf.mxu0  ;;  %2992 = vset.pattern.permute.xlu0 %v2995_v40  ;;  %2993 = vset.pattern.permute.xlu1 %v2995_v40 }
  0xb7   :  { %v689_v14 = vpop.f32.mrf.mxu3  ;;  %v661_v38 = vadd.f32 %v660_v55, %v632_v6  ;;  %v633_v27 = vpop.f32.mrf.mxu1  ;;  %v1080_v55 = vsel %vm1028_vm3, %v3756_v15, %v1079_v57  ;;  %v1115_v15 = vshrl.u32 %v3488_v18, 16  ;;  %2994 = vset.pattern.permute.xlu2 %v2995_v40 }
  0xb8   :  { %v634_v34 = vadd.f32 %v633_v27, %v604_v25  ;;  %v1120_v25 = vshrl.u32 %v3492_v19, 16 }
  0xb9   :  { %v3804_v39 = vadd.f32 %v689_v14, %v661_v38  ;;  %v1105_v38 = vshrl.u32 %v3471_v60, 16  ;;  %v1117_v37 = vrot.slane %v1115_v15, 2 }
  0xba   :  { %v1122_v23 = vrot.slane %v1120_v25, 2 }
  0xbb   :  { %v1107_v41 = vrot.slane %v1105_v38, 2 }
  0xbc   :  { %v1124_v5 = vor.u32 %v1123_v33, %v1122_v23 }
  0xbd   :  { %v1109_v2 = vor.u32 %v1108_v31, %v1107_v41  ;;  %v1521_v31 = vrot.slane %v3133_v43, 3 }
  0xbe   :  { %v662_v0 = vpop.f32.mrf.mxu2  ;;  %v607_v17 = vpop.f32.mrf.mxu0 }
  0xbf   :  { %v691_v6 = vpop.f32.mrf.mxu3  ;;  %v663_v10 = vadd.f32 %v662_v0, %v634_v34  ;;  %v636_v21 = vpop.f32.mrf.mxu1  ;;  %v1112_v34 = vrot.slane %v1110_v45, 2 }
  0xc0   :  { %v637_v14 = vadd.f32 %v636_v21, %v607_v17 }
  0xc1   :  { %v3832_v59 = vadd.f32 %v691_v6, %v663_v10  ;;  %1410 = vmatmul.bf16.gmra.mxu0 %v1076_v36  ;;  %v1114_v0 = vor.u32 %v1113_v7, %v1112_v34  ;;  %v1119_v6 = vor.u32 %v1118_v12, %v1117_v37  ;;  %v1131_v36 = vsel %vm1130_vm5, %v1075_v54, %v1109_v2  ;;  %v1975_v54 = vld [vmem:[%s4000_s2] sm:$0xff] }
  0xc2   :  { %1439 = vmatmul.bf16.gmra.mxu1 %v1080_v55  ;;  %1985 = vperm.xlu0 %2992, %v1975_v54   ;;  %v1527_v34 = vrot.slane %v3148_v50, 3  ;;  %v1976_v50 = vld [vmem:[%s4000_s2 + $0x8] sm:$0xff] }
  0xc3   :  { %1468 = vmatmul.bf16.gmra.mxu2 %v1084_v47  ;;  %v1132_v55 = vsel %vm1130_vm5, %v1079_v57, %v1114_v0  ;;  %v1133_v47 = vsel %vm1130_vm5, %v1083_v58, %v1119_v6  ;;  %v1517_v57 = vrot.slane %v3104_v30, 3  ;;  %v1518_v58 = vrot.slane %v3131_v42, 3 }
  0xc4   :  { %1497 = vmatmul.bf16.gmra.mxu3 %v1088_v48  ;;  %v1134_v48 = vsel %vm1130_vm5, %v1087_v4, %v1124_v5  ;;  %v1520_v4 = vrot.slane %v3110_v32, 3 }
  0xc5   :  { %v1519_v12 = vsel %vm1516_vm6, %v1517_v57, %v1518_v58 }
  0xc6   :  { %v665_v35 = vpop.f32.mrf.mxu2  ;;  %v609_v16 = vpop.f32.mrf.mxu0  ;;  %v1522_v42 = vsel %vm1516_vm6, %v1520_v4, %v1521_v31 }
  0xc7   :  { %v694_v27 = vpop.f32.mrf.mxu3  ;;  %v666_v46 = vadd.f32 %v665_v35, %v637_v14  ;;  %v638_v22 = vpop.f32.mrf.mxu1 }
  0xc8   :  { %v639_v13 = vadd.f32 %v638_v22, %v609_v16  ;;  %v1524_v16 = vrot.slane %v3135_v44, 3  ;;  %v1526_v22 = vrot.slane %v3157_v53, 3 }
  0xc9   :  { %v3846_v56 = vadd.f32 %v694_v27, %v666_v46  ;;  %v1523_v46 = vrot.slane %v3146_v49, 3 }
  0xca   :  { %v1528_v49 = vsel %vm1516_vm6, %v1526_v22, %v1527_v34  ;;  %1990 = vperm.xlu0 %2992, %v1976_v50   ;;  %v1541_v22 = vrot.slane %v3403_v28, 3  ;;  %v1982_v28 = vld [vmem:[%s4000_s2 + $0x38] sm:$0xff] }
  0xcb   :  { %v1525_v43 = vsel %vm1516_vm6, %v1523_v46, %v1524_v16  ;;  %v1537_v46 = vrot.slane %v3399_v24, 3 }
  0xce   :  { %v667_v1 = vpop.f32.mrf.mxu2  ;;  %v612_v17 = vpop.f32.mrf.mxu0 }
  0xcf   :  { %v696_v29 = vpop.f32.mrf.mxu3  ;;  %v668_v10 = vadd.f32 %v667_v1, %v639_v13  ;;  %v641_v21 = vpop.f32.mrf.mxu1  ;;  %v1977_v1 = vld [vmem:[%s4000_s2 + $0x10] sm:$0xff] }
  0xd0   :  { %v642_v14 = vadd.f32 %v641_v21, %v612_v17  ;;  %1995 = vperm.xlu1 %2993, %v1977_v1   ;;  %v1531_v17 = vrot.slane %v3277_v52, 3  ;;  %v1533_v21 = vrot.slane %v3285_v62, 3  ;;  %v1978_v62 = vld [vmem:[%s4000_s2 + $0x18] sm:$0xff]  ;;  %v1560_v1 = vrot.slane %v3492_v19, 3 }
  0xd1   :  { %v3849_v3 = vadd.f32 %v696_v29, %v668_v10  ;;  %1415 = vmatmul.bf16.gmra.mxu0 %v1131_v36  ;;  %v1529_v10 = vrot.slane %v3275_v51, 3  ;;  %v1535_v36 = vrot.slane %v3287_v63, 3 }
  0xd2   :  { %1444 = vmatmul.bf16.gmra.mxu1 %v1132_v55  ;;  %v1542_v24 = vsel %vm1516_vm6, %v1533_v21, %v1541_v22 }
  0xd3   :  { %1473 = vmatmul.bf16.gmra.mxu2 %v1133_v47  ;;  %v1536_v51 = vsel %vm1516_vm6, %v1527_v34, %v1535_v36  ;;  %v1543_v34 = vrot.slane %v3405_v11, 3 }
  0xd4   :  { %1502 = vmatmul.bf16.gmra.mxu3 %v1134_v48 }
  0xd6   :  { %v670_v38 = vpop.f32.mrf.mxu2  ;;  %v614_v25 = vpop.f32.mrf.mxu0 }
  0xd7   :  { %v699_v45 = vpop.f32.mrf.mxu3  ;;  %v671_v15 = vadd.f32 %v670_v38, %v642_v14  ;;  %v643_v35 = vpop.f32.mrf.mxu1  ;;  %v1530_v38 = vsel %vm1516_vm6, %v1518_v58, %v1529_v10 }
  0xd8   :  { %v644_v27 = vadd.f32 %v643_v35, %v614_v25  ;;  %v1534_v25 = vsel %vm1516_vm6, %v1524_v16, %v1533_v21  ;;  %2000 = vperm.xlu1 %2993, %v1978_v62   ;;  %v1539_v16 = vrot.slane %v3401_v26, 3  ;;  %v1544_v26 = vsel %vm1516_vm6, %v1535_v36, %v1543_v34 }
  0xd9   :  { %v3851_v41 = vadd.f32 %v699_v45, %v671_v15  ;;  %v1532_v45 = vsel %vm1516_vm6, %v1521_v31, %v1531_v17  ;;  %v1981_v31 = vld [vmem:[%s4000_s2 + $0x30] sm:$0xff] }
  0xda   :  { %2015 = vperm.xlu0 %2992, %v1981_v31  }
  0xde   :  { %v672_v7 = vpop.f32.mrf.mxu2  ;;  %v921_v13 = vpop.f32.mrf.mxu0 }
  0xdf   :  { %v701_v37 = vpop.f32.mrf.mxu3  ;;  %v673_v30 = vadd.f32 %v672_v7, %v644_v27  ;;  %v950_v9 = vpop.f32.mrf.mxu1  ;;  %v922_v32 = vadd.f32 %v921_v13, %v3740_v20 }
  0xe0   :  { %2020 = vperm.xlu1 %2993, %v1982_v28  }
  0xe1   :  { %v3869_v44 = vadd.f32 %v701_v37, %v673_v30  ;;  %v951_v53 = vadd.f32 %v950_v9, %v922_v32  ;;  %1843 = vmatmul.bf16.vlgmr.msrb.gmra.mxu0 %v1519_v12  ;;  %v1538_v9 = vsel %vm1516_vm6, %v1529_v10, %v1537_v46  ;;  %v1540_v12 = vsel %vm1516_vm6, %v1531_v17, %v1539_v16 }
  0xe2   :  { %1872 = vmatmul.bf16.vlgmr.msrb.gmra.mxu1 %v1522_v42 }
  0xe3   :  { %1901 = vmatmul.bf16.vlgmr.msrb.gmra.mxu2 %v1525_v43 }
  0xe4   :  { %1930 = vmatmul.bf16.vlgmr.msrb.gmra.mxu3 %v1528_v49 }
  0xe6   :  { %v979_v23 = vpop.f32.mrf.mxu2  ;;  %v923_v20 = vpop.f32.mrf.mxu0 }
  0xe7   :  { %v1008_v33 = vpop.f32.mrf.mxu3  ;;  %v980_v2 = vadd.f32 %v979_v23, %v951_v53  ;;  %v952_v0 = vpop.f32.mrf.mxu1  ;;  %v924_v6 = vadd.f32 %v923_v20, %v3774_v8  ;;  %v1557_v20 = vrot.slane %v3471_v60, 3  ;;  %v1576_v60 = vsel %vm1516_vm6, %v1543_v34, %v1560_v1 }
  0xe9   :  { %v3875_v5 = vadd.f32 %v1008_v33, %v980_v2  ;;  %v953_v29 = vadd.f32 %v952_v0, %v924_v6  ;;  %v1558_v0 = vrot.slane %v3475_v61, 3  ;;  %v1559_v6 = vrot.slane %v3488_v18, 3  ;;  %v1979_v18 = vld [vmem:[%s4000_s2 + $0x20] sm:$0xff] }
  0xea   :  { %2005 = vperm.xlu2 %2994, %v1979_v18  }
  0xee   :  { %v981_v55 = vpop.f32.mrf.mxu2  ;;  %v926_v8 = vpop.f32.mrf.mxu0 }
  0xef   :  { %v1010_v14 = vpop.f32.mrf.mxu3  ;;  %v982_v47 = vadd.f32 %v981_v55, %v953_v29  ;;  %v955_v48 = vpop.f32.mrf.mxu1  ;;  %v927_v15 = vadd.f32 %v926_v8, %v3804_v39  ;;  %v1564_v55 = vsel %vm1516_vm6, %v1537_v46, %v1557_v20 }
  0xf1   :  { %v3889_v52 = vadd.f32 %v1010_v14, %v982_v47  ;;  %v956_v63 = vadd.f32 %v955_v48, %v927_v15  ;;  %1848 = vmatmul.bf16.gmra.mxu0 %v1530_v38  ;;  %v1572_v47 = vsel %vm1516_vm6, %v1541_v22, %v1559_v6 }
  0xf2   :  { %1877 = vmatmul.bf16.gmra.mxu1 %v1532_v45 }
  0xf3   :  { %1906 = vmatmul.bf16.gmra.mxu2 %v1534_v25 }
  0xf4   :  { %1935 = vmatmul.bf16.gmra.mxu3 %v1536_v51  ;;  %v1980_v51 = vld [vmem:[%s4000_s2 + $0x28] sm:$0xff] }
  0xf5   :  { %2010 = vperm.xlu2 %2994, %v1980_v51  }
  0xf6   :  { %v984_v35 = vpop.f32.mrf.mxu2  ;;  %v928_v39 = vpop.f32.mrf.mxu0 }
  0xf7   :  { %v1013_v27 = vpop.f32.mrf.mxu3  ;;  %v985_v40 = vadd.f32 %v984_v35, %v956_v63  ;;  %v957_v54 = vpop.f32.mrf.mxu1  ;;  %v929_v57 = vadd.f32 %v928_v39, %v3832_v59 }
  0xf9   :  { %v3895_v58 = vadd.f32 %v1013_v27, %v985_v40  ;;  %v958_v4 = vadd.f32 %v957_v54, %v929_v57 }
  0xfe   :  { %v986_v7 = vpop.f32.mrf.mxu2  ;;  %v931_v59 = vpop.f32.mrf.mxu0 }
  0xff   :  { %v1015_v37 = vpop.f32.mrf.mxu3  ;;  %v987_v30 = vadd.f32 %v986_v7, %v958_v4  ;;  %v960_v13 = vpop.f32.mrf.mxu1  ;;  %v932_v42 = vadd.f32 %v931_v59, %v3846_v56 }
 0x101   :  { %v3909_v32 = vadd.f32 %v1015_v37, %v987_v30  ;;  %v961_v11 = vadd.f32 %v960_v13, %v932_v42  ;;  %1853 = vmatmul.bf16.gmra.mxu0 %v1538_v9 }
 0x102   :  { %1882 = vmatmul.bf16.gmra.mxu1 %v1540_v12 }
 0x103   :  { %1911 = vmatmul.bf16.gmra.mxu2 %v1542_v24 }
 0x104   :  { %1940 = vmatmul.bf16.gmra.mxu3 %v1544_v26 }
 0x106   :  { %v989_v43 = vpop.f32.mrf.mxu2  ;;  %v933_v56 = vpop.f32.mrf.mxu0 }
 0x107   :  { %v1018_v49 = vpop.f32.mrf.mxu3  ;;  %v990_v50 = vadd.f32 %v989_v43, %v961_v11  ;;  %v962_v53 = vpop.f32.mrf.mxu1  ;;  %v934_v23 = vadd.f32 %v933_v56, %v3849_v3  ;;  %v1568_v3 = vsel %vm1516_vm6, %v1539_v16, %v1558_v0 }
 0x109   :  { %v3915_v33 = vadd.f32 %v1018_v49, %v990_v50  ;;  %v963_v2 = vadd.f32 %v962_v53, %v934_v23 }
 0x10e   :  { %v991_v29 = vpop.f32.mrf.mxu2  ;;  %v936_v21 = vpop.f32.mrf.mxu0 }
 0x10f   :  { %v1020_v10 = vpop.f32.mrf.mxu3  ;;  %v992_v17 = vadd.f32 %v991_v29, %v963_v2  ;;  %v965_v36 = vpop.f32.mrf.mxu1  ;;  %v937_v14 = vadd.f32 %v936_v21, %v3851_v41 }
 0x111   :  { %v3926_v61 = vadd.f32 %v1020_v10, %v992_v17  ;;  %v966_v19 = vadd.f32 %v965_v36, %v937_v14  ;;  %1858 = vmatmul.bf16.gmra.mxu0 %v1564_v55 }
 0x112   :  { %1887 = vmatmul.bf16.gmra.mxu1 %v1568_v3 }
 0x113   :  { %1916 = vmatmul.bf16.gmra.mxu2 %v1572_v47 }
 0x114   :  { %1945 = vmatmul.bf16.gmra.mxu3 %v1576_v60 }
 0x116   :  { %v994_v8 = vpop.f32.mrf.mxu2  ;;  %v938_v41 = vpop.f32.mrf.mxu0 }
 0x117   :  { %v1023_v48 = vpop.f32.mrf.mxu3  ;;  %v995_v38 = vadd.f32 %v994_v8, %v966_v19  ;;  %v967_v45 = vpop.f32.mrf.mxu1  ;;  %v939_v15 = vadd.f32 %v938_v41, %v3869_v44 }
 0x119   :  { %v1024_v25 = vadd.f32 %v1023_v48, %v995_v38  ;;  %v968_v62 = vadd.f32 %v967_v45, %v939_v15 }
 0x11e   :  { %v996_v63 = vpop.f32.mrf.mxu2  ;;  %v1401_v40 = vpop.f32.mrf.mxu0 }
 0x11f   :  { %v1025_v35 = vpop.f32.mrf.mxu3  ;;  %v997_v27 = vadd.f32 %v996_v63, %v968_v62  ;;  %v1430_v39 = vpop.f32.mrf.mxu1 }
 0x120   :  { %v1431_v54 = vadd.f32 %v1430_v39, %v1401_v40 }
 0x121   :  { %v3935_v57 = vadd.f32 %v1025_v35, %v997_v27 }
 0x126   :  { %v1459_v4 = vpop.f32.mrf.mxu2  ;;  %v1403_v16 = vpop.f32.mrf.mxu0 }
 0x127   :  { %v1488_v31 = vpop.f32.mrf.mxu3  ;;  %v1460_v46 = vadd.f32 %v1459_v4, %v1431_v54  ;;  %v1432_v44 = vpop.f32.mrf.mxu1 }
 0x128   :  { %v1433_v15 = vadd.f32 %v1432_v44, %v1403_v16 }
 0x129   :  { %v1489_v22 = vadd.f32 %v1488_v31, %v1460_v46 }
 0x12b   :  { %v1508_v34 = vadd.f32 %v1489_v22, %v3875_v5 }
 0x12e   :  { %v1461_v7 = vpop.f32.mrf.mxu2  ;;  %v1406_v30 = vpop.f32.mrf.mxu0 }
 0x12f   :  { %v1490_v37 = vpop.f32.mrf.mxu3  ;;  %v1435_v59 = vpop.f32.mrf.mxu1  ;;  %v1462_v27 = vadd.f32 %v1461_v7, %v1433_v15 }
 0x130   :  { %v1436_v13 = vadd.f32 %v1435_v59, %v1406_v30 }
 0x131   :  { %v1491_v39 = vadd.f32 %v1490_v37, %v1462_v27 }
 0x133   :  { %v1509_v59 = vadd.f32 %v1491_v39, %v3889_v52 }
 0x134   :  { %v1986_v35 = vpop.permute.xlu0 %1985 }
 0x136   :  { %v1464_v9 = vpop.f32.mrf.mxu2  ;;  %v1408_v24 = vpop.f32.mrf.mxu0 }
 0x137   :  { %v1493_v12 = vpop.f32.mrf.mxu3  ;;  %v1465_v42 = vadd.f32 %v1464_v9, %v1436_v13  ;;  %v1437_v26 = vpop.f32.mrf.mxu1 }
 0x139   :  { %v1494_v28 = vadd.f32 %v1493_v12, %v1465_v42 }
 0x13b   :  { %v3939_v11 = vadd.f32 %v1494_v28, %v3895_v58 }
 0x13c   :  { %v1991_v9 = vpop.permute.xlu0 %1990 }
 0x13e   :  { %v3941_v43 = vpop.f32.mrf.mxu2  ;;  %v1411_v50 = vpop.f32.mrf.mxu0 }
 0x13f   :  { %v3943_v49 = vpop.f32.mrf.mxu3  ;;  %v1440_v5 = vpop.f32.mrf.mxu1 }
 0x140   :  { %v1441_v56 = vadd.f32 %v1440_v5, %v1411_v50  ;;  %v1438_v50 = vadd.f32 %v1437_v26, %v1408_v24 }
 0x146   :  { %v1469_v53 = vpop.f32.mrf.mxu2  ;;  %v3945_v20 = vpop.f32.mrf.mxu0 }
 0x147   :  { %v1498_v23 = vpop.f32.mrf.mxu3  ;;  %v1470_v2 = vadd.f32 %v1469_v53, %v1441_v56  ;;  %v3947_v0 = vpop.f32.mrf.mxu1 }
 0x149   :  { %v1499_v6 = vadd.f32 %v1498_v23, %v1470_v2  ;;  %v1996_v2 = vpop.permute.xlu1 %1995 }
 0x14b   :  { %v3950_v1 = vadd.f32 %v1499_v6, %v3915_v33  ;;  %v1467_v6 = vadd.f32 %v3941_v43, %v1438_v50 }
 0x14d   :  { %v1496_v24 = vadd.f32 %v3943_v49, %v1467_v6 }
 0x14e   :  { %v3952_v58 = vpop.f32.mrf.mxu2  ;;  %v1416_v10 = vpop.f32.mrf.mxu0 }
 0x14f   :  { %v3954_v29 = vpop.f32.mrf.mxu3  ;;  %v1445_v17 = vpop.f32.mrf.mxu1 }
 0x150   :  { %v1446_v21 = vadd.f32 %v1445_v17, %v1416_v10 }
 0x151   :  { %v2001_v43 = vpop.permute.xlu1 %2000 }
 0x156   :  { %v1474_v36 = vpop.f32.mrf.mxu2  ;;  %v3956_v14 = vpop.f32.mrf.mxu0 }
 0x157   :  { %v1503_v55 = vpop.f32.mrf.mxu3  ;;  %v1475_v3 = vadd.f32 %v1474_v36, %v1446_v21  ;;  %v3958_v47 = vpop.f32.mrf.mxu1 }
 0x159   :  { %v1504_v60 = vadd.f32 %v1503_v55, %v1475_v3 }
 0x15b   :  { %v3960_v18 = vadd.f32 %v1504_v60, %v1024_v25 }
 0x15e   :  { %v3962_v19 = vpop.f32.mrf.mxu2  ;;  %v1844_v8 = vpop.f32.mrf.mxu0 }
 0x15f   :  { %v3964_v33 = vpop.f32.mrf.mxu3  ;;  %v1873_v48 = vpop.f32.mrf.mxu1 }
 0x160   :  { %v1874_v38 = vadd.f32 %v1873_v48, %v1844_v8 }
 0x166   :  { %v1902_v41 = vpop.f32.mrf.mxu2  ;;  %v1846_v62 = vpop.f32.mrf.mxu0 }
 0x167   :  { %v1931_v45 = vpop.f32.mrf.mxu3  ;;  %v1903_v51 = vadd.f32 %v1902_v41, %v1874_v38  ;;  %v1875_v63 = vpop.f32.mrf.mxu1 }
 0x168   :  { %v1876_v54 = vadd.f32 %v1875_v63, %v1846_v62 }
 0x169   :  { %v1932_v40 = vadd.f32 %v1931_v45, %v1903_v51  ;;  %v1511_v45 = vadd.f32 %v1496_v24, %v3909_v32 }
 0x16b   :  { %v1951_v31 = vadd.f32 %v1932_v40, %v1508_v34  ;;  %v1443_v40 = vadd.f32 %v3947_v0, %v3945_v20 }
 0x16d   :  { %v2023_v12 = vmul.f32 %v1986_v35, %v1951_v31 }
 0x16e   :  { %v1904_v25 = vpop.f32.mrf.mxu2  ;;  %v1849_v22 = vpop.f32.mrf.mxu0 }
 0x16f   :  { %v1933_v4 = vpop.f32.mrf.mxu3  ;;  %v1905_v46 = vadd.f32 %v1904_v25, %v1876_v54  ;;  %v1878_v30 = vpop.f32.mrf.mxu1  ;;  %v2044_v37 = vmul.f32 %v2023_v12, %v1951_v31 }
 0x170   :  { %v1879_v44 = vadd.f32 %v1878_v30, %v1849_v22 }
 0x171   :  { %v1934_v13 = vadd.f32 %v1933_v4, %v1905_v46  ;;  %v1472_v46 = vadd.f32 %v3952_v58, %v1443_v40 }
 0x173   :  { %v1952_v16 = vadd.f32 %v1934_v13, %v1509_v59  ;;  %v1501_v13 = vadd.f32 %v3954_v29, %v1472_v46 }
 0x175   :  { %v2971_v42 = vpack.c.bf16 %v1952_v16, %v1951_v31  ;;  %v2024_v28 = vmul.f32 %v1991_v9, %v1952_v16  ;;  %v2006_v31 = vpop.permute.xlu2 %2005 }
 0x176   :  { %v1907_v7 = vpop.f32.mrf.mxu2  ;;  %v1851_v23 = vpop.f32.mrf.mxu0 }
 0x177   :  { %v1936_v5 = vpop.f32.mrf.mxu3  ;;  %2972 = vst [vmem:[%s4001_s3] sm:$0xff] %v2971_v42   ;;  %v2031_v34 = vadd.f32 %v2024_v28, %v2023_v12  ;;  %v2045_v56 = vmul.f32 %v2024_v28, %v1952_v16  ;;  %v1908_v53 = vadd.f32 %v1907_v7, %v1879_v44  ;;  %v1880_v52 = vpop.f32.mrf.mxu1  ;;  %v1513_v7 = vadd.f32 %v1501_v13, %v3926_v61 }
 0x178   :  { %v1881_v26 = vadd.f32 %v1880_v52, %v1851_v23  ;;  %v1448_v52 = vadd.f32 %v3958_v47, %v3956_v14 }
 0x179   :  { %v2052_v10 = vadd.f32 %v2045_v56, %v2044_v37  ;;  %v1937_v17 = vadd.f32 %v1936_v5, %v1908_v53 }
 0x17a   :  { %v1477_v61 = vadd.f32 %v3962_v19, %v1448_v52 }
 0x17b   :  { %v1953_v21 = vadd.f32 %v1937_v17, %v3939_v11 }
 0x17d   :  { %v2025_v36 = vmul.f32 %v1996_v2, %v1953_v21  ;;  %v2011_v58 = vpop.permute.xlu2 %2010 }
 0x17e   :  { %v1909_v55 = vpop.f32.mrf.mxu2  ;;  %v1854_v38 = vpop.f32.mrf.mxu0 }
 0x17f   :  { %v1938_v3 = vpop.f32.mrf.mxu3  ;;  %v2032_v60 = vadd.f32 %v2031_v34, %v2025_v36  ;;  %v2046_v8 = vmul.f32 %v2025_v36, %v1953_v21  ;;  %v1910_v48 = vadd.f32 %v1909_v55, %v1881_v26  ;;  %v1883_v41 = vpop.f32.mrf.mxu1 }
 0x180   :  { %v1884_v63 = vadd.f32 %v1883_v41, %v1854_v38  ;;  %v2016_v55 = vpop.permute.xlu0 %2015 }
 0x181   :  { %v2053_v15 = vadd.f32 %v2052_v10, %v2046_v8  ;;  %v1939_v51 = vadd.f32 %v1938_v3, %v1910_v48  ;;  %v1506_v3 = vadd.f32 %v3964_v33, %v1477_v61 }
 0x183   :  { %v1954_v62 = vadd.f32 %v1939_v51, %v1511_v45  ;;  %v1515_v45 = vadd.f32 %v1506_v3, %v3935_v57 }
 0x185   :  { %v2976_v35 = vpack.c.bf16 %v1954_v62, %v1953_v21  ;;  %v2026_v11 = vmul.f32 %v2001_v43, %v1954_v62  ;;  %v2021_v43 = vpop.permute.xlu1 %2020 }
 0x186   :  { %v1912_v27 = vpop.f32.mrf.mxu2  ;;  %v1856_v32 = vpop.f32.mrf.mxu0 }
 0x187   :  { %v1941_v49 = vpop.f32.mrf.mxu3  ;;  %2988 = vst [vmem:[%s4001_s3 + $0x8] sm:$0xff] %v2976_v35   ;;  %v2033_v39 = vadd.f32 %v2032_v60, %v2026_v11  ;;  %v2047_v54 = vmul.f32 %v2026_v11, %v1954_v62  ;;  %v1913_v25 = vadd.f32 %v1912_v27, %v1884_v63  ;;  %v1885_v4 = vpop.f32.mrf.mxu1 }
 0x188   :  { %v1886_v9 = vadd.f32 %v1885_v4, %v1856_v32 }
 0x189   :  { %v2054_v22 = vadd.f32 %v2053_v15, %v2047_v54  ;;  %v1942_v30 = vadd.f32 %v1941_v49, %v1913_v25 }
 0x18b   :  { %v1955_v59 = vadd.f32 %v1942_v30, %v3950_v1 }
 0x18d   :  { %v2027_v20 = vmul.f32 %v2006_v31, %v1955_v59 }
 0x18e   :  { %v1914_v0 = vpop.f32.mrf.mxu2  ;;  %v1859_v28 = vpop.f32.mrf.mxu0 }
 0x18f   :  { %v1943_v12 = vpop.f32.mrf.mxu3  ;;  %v2034_v16 = vadd.f32 %v2033_v39, %v2027_v20  ;;  %v2048_v44 = vmul.f32 %v2027_v20, %v1955_v59  ;;  %v1915_v42 = vadd.f32 %v1914_v0, %v1886_v9  ;;  %v1888_v50 = vpop.f32.mrf.mxu1 }
 0x190   :  { %v1889_v56 = vadd.f32 %v1888_v50, %v1859_v28 }
 0x191   :  { %v2055_v5 = vadd.f32 %v2054_v22, %v2048_v44  ;;  %v1944_v37 = vadd.f32 %v1943_v12, %v1915_v42 }
 0x193   :  { %v1956_v34 = vadd.f32 %v1944_v37, %v1513_v7 }
 0x195   :  { %v2981_v53 = vpack.c.bf16 %v1956_v34, %v1955_v59  ;;  %v2028_v1 = vmul.f32 %v2011_v58, %v1956_v34 }
 0x196   :  { %v1917_v23 = vpop.f32.mrf.mxu2  ;;  %v1861_v24 = vpop.f32.mrf.mxu0 }
 0x197   :  { %v1946_v29 = vpop.f32.mrf.mxu3  ;;  %2989 = vst [vmem:[%s4001_s3 + $0x10] sm:$0xff] %v2981_v53   ;;  %v2035_v2 = vadd.f32 %v2034_v16, %v2028_v1  ;;  %v2049_v6 = vmul.f32 %v2028_v1, %v1956_v34  ;;  %v1918_v10 = vadd.f32 %v1917_v23, %v1889_v56  ;;  %v1890_v26 = vpop.f32.mrf.mxu1 }
 0x198   :  { %v1891_v14 = vadd.f32 %v1890_v26, %v1861_v24 }
 0x199   :  { %v2056_v17 = vadd.f32 %v2055_v5, %v2049_v6  ;;  %v1947_v21 = vadd.f32 %v1946_v29, %v1918_v10 }
 0x19b   :  { %v1957_v36 = vadd.f32 %v1947_v21, %v3960_v18 }
 0x19d   :  { %v2029_v60 = vmul.f32 %v2016_v55, %v1957_v36 }
 0x19e   :  { %v1919_v47 = vpop.f32.mrf.mxu2 }
 0x19f   :  { %v2036_v8 = vadd.f32 %v2035_v2, %v2029_v60  ;;  %v2050_v48 = vmul.f32 %v2029_v60, %v1957_v36  ;;  %v1920_v38 = vadd.f32 %v1919_v47, %v1891_v14  ;;  %v1948_v41 = vpop.f32.mrf.mxu3 }
 0x1a1   :  { %v2057_v15 = vadd.f32 %v2056_v17, %v2050_v48  ;;  %v1949_v19 = vadd.f32 %v1948_v41, %v1920_v38 }
 0x1a3   :  { %v1958_v51 = vadd.f32 %v1949_v19, %v1515_v45 }
 0x1a5   :  { %v2986_v62 = vpack.c.bf16 %v1958_v51, %v1957_v36  ;;  %v2030_v63 = vmul.f32 %v2021_v43, %v1958_v51 }
 0x1a7   :  { %2990 = vst [vmem:[%s4001_s3 + $0x18] sm:$0xff] %v2986_v62   ;;  %v2037_v18 = vadd.f32 %v2036_v8, %v2030_v63  ;;  %v2051_v33 = vmul.f32 %v2030_v63, %v1958_v51 }
 0x1a9   :  { %v2038_v35 = vrot.slane %v2037_v18, 4  ;;  %v2058_v11 = vadd.f32 %v2057_v15, %v2051_v33 }
 0x1ab   :  { %v2039_v27 = vadd.f32 %v2038_v35, %v2037_v18  ;;  %v2059_v49 = vrot.slane %v2058_v11, 4 }
 0x1ad   :  { %v2040_v40 = vrot.slane %v2039_v27, 2  ;;  %v2060_v39 = vadd.f32 %v2059_v49, %v2058_v11 }
 0x1af   :  { %v2041_v54 = vadd.f32 %v2040_v40, %v2039_v27  ;;  %v2061_v57 = vrot.slane %v2060_v39, 2 }
 0x1b1   :  { %v2042_v25 = vrot.slane %v2041_v54, 1  ;;  %v2062_v32 = vadd.f32 %v2061_v57, %v2060_v39 }
 0x1b3   :  { %v2063_v4 = vrot.slane %v2062_v32, 1  ;;  %v2043_v31 = vadd.f32 %v2042_v25, %v2041_v54 }
 0x1b5   :  { %v2064_v46 = vadd.f32 %v2063_v4, %v2062_v32 }
 0x1b7   :  { %v2066_v22 = vsel %vm2065_vm7, %v2043_v31, %v2064_v46 }
 0x1b8   :  { %2067 = vst [vmem:[%s4002_s4] sm:$0x3] %v2066_v22 }

// kernel: _lambda_.11
= control target key start
LH: loop header
LB: loop body
LE: loop exit
PB: predicated region body
PF: predicated region fallthrough
CT: control target
= control target key end

     0   :  { %s2636_s0 = inlined_call_operand.vmem [shape: bf16[2,2048], index: 0, kind: input, shape index: {}]   ;;  %s2637_s1 = inlined_call_operand.vmem [shape: bf16[2048,128], index: 1, kind: input, shape index: {}]   ;;  %s2638_s2 = inlined_call_operand.vmem [shape: f32[1,128], index: 2, kind: input, shape index: {}]   ;;  %s2639_s3 = inlined_call_operand.vmem [shape: f32[1,128], index: 3, kind: input, shape index: {}]   ;;  %s2640_s4 = inlined_call_operand.vmem [shape: bf16[128,128], index: 4, kind: input, shape index: {}]   ;;  %s2641_s5 = inlined_call_operand.vmem [shape: f32[1,128], index: 5, kind: input, shape index: {}]   ;;  %s2642_s6 = inlined_call_operand.hbm [shape: f32[2,128], index: 6, kind: output, shape index: {}]  }
   0x1   :  { %v2007_v0 = vld [vmem:[%s2637_s1 + $0x38] sm:$0xff]  ;;  %v2006_v4 = vld [vmem:[%s2637_s1 + $0x30] sm:$0xff]  ;;  %v2005_v8 = vld [vmem:[%s2637_s1 + $0x28] sm:$0xff] }
   0x2   :  { %v2015_v1 = vld [vmem:[%s2637_s1 + $0x78] sm:$0xff]  ;;  %1092 = vmatpush.bf16.msra.mxu0 %v2007_v0  ;;  %v2014_v5 = vld [vmem:[%s2637_s1 + $0x70] sm:$0xff]  ;;  %v2013_v9 = vld [vmem:[%s2637_s1 + $0x68] sm:$0xff] }
   0x3   :  { %v2023_v2 = vld [vmem:[%s2637_s1 + $0xb8] sm:$0xff]  ;;  %1105 = vmatpush.bf16.msra.mxu1 %v2015_v1  ;;  %v2022_v6 = vld [vmem:[%s2637_s1 + $0xb0] sm:$0xff]  ;;  %v2021_v10 = vld [vmem:[%s2637_s1 + $0xa8] sm:$0xff] }
   0x4   :  { %v2031_v3 = vld [vmem:[%s2637_s1 + $0xf8] sm:$0xff]  ;;  %1118 = vmatpush.bf16.msra.mxu2 %v2023_v2  ;;  %v2030_v7 = vld [vmem:[%s2637_s1 + $0xf0] sm:$0xff]  ;;  %v2029_v11 = vld [vmem:[%s2637_s1 + $0xe8] sm:$0xff] }
   0x5   :  { %1131 = vmatpush.bf16.msra.mxu3 %v2031_v3  ;;  %v2004_v12 = vld [vmem:[%s2637_s1 + $0x20] sm:$0xff]  ;;  %v2003_v16 = vld [vmem:[%s2637_s1 + $0x18] sm:$0xff]  ;;  %v2002_v20 = vld [vmem:[%s2637_s1 + $0x10] sm:$0xff] }
   0x6   :  { %1093 = vmatpush.bf16.msra.mxu0 %v2006_v4  ;;  %v2012_v13 = vld [vmem:[%s2637_s1 + $0x60] sm:$0xff]  ;;  %v2011_v17 = vld [vmem:[%s2637_s1 + $0x58] sm:$0xff]  ;;  %v2010_v21 = vld [vmem:[%s2637_s1 + $0x50] sm:$0xff] }
   0x7   :  { %1106 = vmatpush.bf16.msra.mxu1 %v2014_v5  ;;  %v2020_v14 = vld [vmem:[%s2637_s1 + $0xa0] sm:$0xff]  ;;  %v2019_v18 = vld [vmem:[%s2637_s1 + $0x98] sm:$0xff]  ;;  %v2018_v23 = vld [vmem:[%s2637_s1 + $0x90] sm:$0xff] }
   0x8   :  { %1119 = vmatpush.bf16.msra.mxu2 %v2022_v6  ;;  %v2028_v15 = vld [vmem:[%s2637_s1 + $0xe0] sm:$0xff]  ;;  %v2027_v19 = vld [vmem:[%s2637_s1 + $0xd8] sm:$0xff]  ;;  %v2026_v24 = vld [vmem:[%s2637_s1 + $0xd0] sm:$0xff] }
   0x9   :  { %1132 = vmatpush.bf16.msra.mxu3 %v2030_v7  ;;  %v30_v22 = vld [vmem:[%s2636_s0] sm:$0xff] }
   0xa   :  { %1094 = vmatpush.bf16.msra.mxu0 %v2005_v8  ;;  %289 = vst [vmem:[#allocation1] ss:$9 sm:$0xff] %v30_v22 }
   0xb   :  { %1107 = vmatpush.bf16.msra.mxu1 %v2013_v9 }
   0xc   :  { %1120 = vmatpush.bf16.msra.mxu2 %v2021_v10 }
   0xd   :  { %1133 = vmatpush.bf16.msra.mxu3 %v2029_v11 }
   0xe   :  { %1095 = vmatpush.bf16.msra.mxu0 %v2004_v12 }
   0xf   :  { %1108 = vmatpush.bf16.msra.mxu1 %v2012_v13 }
  0x10   :  { %1121 = vmatpush.bf16.msra.mxu2 %v2020_v14 }
  0x11   :  { %1134 = vmatpush.bf16.msra.mxu3 %v2028_v15 }
  0x12   :  { %1096 = vmatpush.bf16.msra.mxu0 %v2003_v16 }
  0x13   :  { %1109 = vmatpush.bf16.msra.mxu1 %v2011_v17 }
  0x14   :  { %1122 = vmatpush.bf16.msra.mxu2 %v2019_v18 }
  0x15   :  { %1135 = vmatpush.bf16.msra.mxu3 %v2027_v19 }
  0x16   :  { %11 = vsyncpa [#allocation4], 0  ;;  %1097 = vmatpush.bf16.msra.mxu0 %v2002_v20  ;;  %v2001_v25 = vld [vmem:[%s2637_s1 + $0x8] sm:$0xff]  ;;  %v2000_v29 = vld [vmem:[%s2637_s1] sm:$0xff]  ;;  %vm1306_vm0 = vcmask 1041408   ;;  %s2174_s29 = smov [#allocation3]  }
  0x17   :  { %1110 = vmatpush.bf16.msra.mxu1 %v2010_v21  ;;  %v2009_v26 = vld [vmem:[%s2637_s1 + $0x48] sm:$0xff]  ;;  %v2008_v30 = vld [vmem:[%s2637_s1 + $0x40] sm:$0xff]  ;;  %v2039_v33 = vld [vmem:[%s2637_s1 + $0x138] sm:$0xff]  ;;  %s1445_s30 = sshll.u32 %s2174_s29, 4  ;;  %s1446_s30 = int_to_ptr.vmem [resolvable:$true] %s1445_s30 }
  0x18   :  { %1123 = vmatpush.bf16.msra.mxu2 %v2018_v23  ;;  %v2017_v27 = vld [vmem:[%s2637_s1 + $0x88] sm:$0xff]  ;;  %v2016_v31 = vld [vmem:[%s2637_s1 + $0x80] sm:$0xff]  ;;  %v2047_v34 = vld [vmem:[%s2637_s1 + $0x178] sm:$0xff] }
  0x19   :  { %1136 = vmatpush.bf16.msra.mxu3 %v2026_v24  ;;  %v2025_v28 = vld [vmem:[%s2637_s1 + $0xc8] sm:$0xff]  ;;  %v2024_v32 = vld [vmem:[%s2637_s1 + $0xc0] sm:$0xff]  ;;  %v2055_v35 = vld [vmem:[%s2637_s1 + $0x1b8] sm:$0xff] }
  0x1a   :  { %1098 = vmatpush.bf16.msra.mxu0 %v2001_v25  ;;  %v2063_v36 = vld [vmem:[%s2637_s1 + $0x1f8] sm:$0xff]  ;;  %v2038_v37 = vld [vmem:[%s2637_s1 + $0x130] sm:$0xff]  ;;  %v290_v39 = vld [vmem:[#allocation1] sm:$0xff] }
  0x1b   :  { %1111 = vmatpush.bf16.msra.mxu1 %v2009_v26  ;;  %v292_v38 = vld [vmem:[#allocation1 + $0x12] sm:$0xff]  ;;  %v293_v41 = vld [vmem:[#allocation1 + $0x1b] sm:$0xff]  ;;  %v291_v42 = vld [vmem:[#allocation1 + $0x9] sm:$0xff] }
  0x1c   :  { %1124 = vmatpush.bf16.msra.mxu2 %v2017_v27  ;;  %v2046_v40 = vld [vmem:[%s2637_s1 + $0x170] sm:$0xff]  ;;  %v2037_v45 = vld [vmem:[%s2637_s1 + $0x128] sm:$0xff]  ;;  %v297_v51 = vld [vmem:[#allocation1 + $0x3f] sm:$0xff] }
  0x1d   :  { %1137 = vmatpush.bf16.msra.mxu3 %v2025_v28  ;;  %v2054_v43 = vld [vmem:[%s2637_s1 + $0x1b0] sm:$0xff]  ;;  %v2045_v46 = vld [vmem:[%s2637_s1 + $0x168] sm:$0xff]  ;;  %v2036_v54 = vld [vmem:[%s2637_s1 + $0x120] sm:$0xff] }
  0x1e   :  { %1099 = vmatpush.bf16.msra.mxu0 %v2000_v29  ;;  %v2062_v44 = vld [vmem:[%s2637_s1 + $0x1f0] sm:$0xff]  ;;  %v2053_v47 = vld [vmem:[%s2637_s1 + $0x1a8] sm:$0xff]  ;;  %v2044_v55 = vld [vmem:[%s2637_s1 + $0x160] sm:$0xff] }
  0x1f   :  { %1112 = vmatpush.bf16.msra.mxu1 %v2008_v30  ;;  %v2061_v48 = vld [vmem:[%s2637_s1 + $0x1e8] sm:$0xff]  ;;  %v296_v49 = vld [vmem:[#allocation1 + $0x36] sm:$0xff]  ;;  %v2052_v56 = vld [vmem:[%s2637_s1 + $0x1a0] sm:$0xff] }
  0x20   :  { %1125 = vmatpush.bf16.msra.mxu2 %v2016_v31  ;;  %v294_v50 = vld [vmem:[#allocation1 + $0x24] sm:$0xff]  ;;  %v295_v53 = vld [vmem:[#allocation1 + $0x2d] sm:$0xff]  ;;  %v2035_v58 = vld [vmem:[%s2637_s1 + $0x118] sm:$0xff] }
  0x21   :  { %1138 = vmatpush.bf16.msra.mxu3 %v2024_v32  ;;  %1100 = vmatmul.bf16.vlgmr.msra.gmra.mxu0 %v290_v39  ;;  %v31_v52 = vld [vmem:[%s2636_s0 + $0x8] sm:$0xff]  ;;  %v2060_v57 = vld [vmem:[%s2637_s1 + $0x1e0] sm:$0xff]  ;;  %v2043_v59 = vld [vmem:[%s2637_s1 + $0x158] sm:$0xff] }
  0x22   :  { %1144 = vmatpush.bf16.msrb.mxu0 %v2039_v33  ;;  %1113 = vmatmul.bf16.vlgmr.msra.gmra.mxu1 %v291_v42  ;;  %299 = vst [vmem:[#allocation1] ss:$9 sm:$0xff] %v31_v52  ;;  %v2051_v60 = vld [vmem:[%s2637_s1 + $0x198] sm:$0xff]  ;;  %v2034_v62 = vld [vmem:[%s2637_s1 + $0x110] sm:$0xff]  ;;  %v2033_v2 = vld [vmem:[%s2637_s1 + $0x108] sm:$0xff] }
  0x23   :  { %1157 = vmatpush.bf16.msrb.mxu1 %v2047_v34  ;;  %1126 = vmatmul.bf16.vlgmr.msra.gmra.mxu2 %v292_v38  ;;  %v2059_v61 = vld [vmem:[%s2637_s1 + $0x1d8] sm:$0xff]  ;;  %v2042_v63 = vld [vmem:[%s2637_s1 + $0x150] sm:$0xff]  ;;  %v2041_v3 = vld [vmem:[%s2637_s1 + $0x148] sm:$0xff] }
  0x24   :  { %1170 = vmatpush.bf16.msrb.mxu2 %v2055_v35  ;;  %1139 = vmatmul.bf16.vlgmr.msra.gmra.mxu3 %v293_v41  ;;  %v2050_v0 = vld [vmem:[%s2637_s1 + $0x190] sm:$0xff]  ;;  %v2049_v4 = vld [vmem:[%s2637_s1 + $0x188] sm:$0xff]  ;;  %v2032_v6 = vld [vmem:[%s2637_s1 + $0x100] sm:$0xff] }
  0x25   :  { %1183 = vmatpush.bf16.msrb.mxu3 %v2063_v36  ;;  %v2058_v1 = vld [vmem:[%s2637_s1 + $0x1d0] sm:$0xff]  ;;  %v2057_v5 = vld [vmem:[%s2637_s1 + $0x1c8] sm:$0xff]  ;;  %v2040_v7 = vld [vmem:[%s2637_s1 + $0x140] sm:$0xff] }
  0x26   :  { %1145 = vmatpush.bf16.msrb.mxu0 %v2038_v37  ;;  %v2048_v8 = vld [vmem:[%s2637_s1 + $0x180] sm:$0xff]  ;;  %v2071_v10 = vld [vmem:[%s2637_s1 + $0x238] sm:$0xff]  ;;  %v2070_v14 = vld [vmem:[%s2637_s1 + $0x230] sm:$0xff] }
  0x27   :  { %1158 = vmatpush.bf16.msrb.mxu1 %v2046_v40  ;;  %v2056_v9 = vld [vmem:[%s2637_s1 + $0x1c0] sm:$0xff]  ;;  %v2079_v11 = vld [vmem:[%s2637_s1 + $0x278] sm:$0xff]  ;;  %v2078_v15 = vld [vmem:[%s2637_s1 + $0x270] sm:$0xff] }
  0x28   :  { %1171 = vmatpush.bf16.msrb.mxu2 %v2054_v43  ;;  %v2087_v12 = vld [vmem:[%s2637_s1 + $0x2b8] sm:$0xff]  ;;  %v2086_v16 = vld [vmem:[%s2637_s1 + $0x2b0] sm:$0xff]  ;;  %v2069_v18 = vld [vmem:[%s2637_s1 + $0x228] sm:$0xff] }
  0x29   :  { %1184 = vmatpush.bf16.msrb.mxu3 %v2062_v44  ;;  %v2095_v13 = vld [vmem:[%s2637_s1 + $0x2f8] sm:$0xff]  ;;  %v2094_v17 = vld [vmem:[%s2637_s1 + $0x2f0] sm:$0xff]  ;;  %v2077_v19 = vld [vmem:[%s2637_s1 + $0x268] sm:$0xff] }
  0x2a   :  { %1146 = vmatpush.bf16.msrb.mxu0 %v2037_v45  ;;  %v2085_v20 = vld [vmem:[%s2637_s1 + $0x2a8] sm:$0xff]  ;;  %v2068_v22 = vld [vmem:[%s2637_s1 + $0x220] sm:$0xff]  ;;  %v2067_v26 = vld [vmem:[%s2637_s1 + $0x218] sm:$0xff] }
  0x2b   :  { %1159 = vmatpush.bf16.msrb.mxu1 %v2045_v46  ;;  %v2093_v21 = vld [vmem:[%s2637_s1 + $0x2e8] sm:$0xff]  ;;  %v2076_v23 = vld [vmem:[%s2637_s1 + $0x260] sm:$0xff]  ;;  %v2075_v27 = vld [vmem:[%s2637_s1 + $0x258] sm:$0xff] }
  0x2c   :  { %1172 = vmatpush.bf16.msrb.mxu2 %v2053_v47  ;;  %v2084_v24 = vld [vmem:[%s2637_s1 + $0x2a0] sm:$0xff]  ;;  %v2083_v28 = vld [vmem:[%s2637_s1 + $0x298] sm:$0xff]  ;;  %v2066_v30 = vld [vmem:[%s2637_s1 + $0x210] sm:$0xff] }
  0x2d   :  { %1185 = vmatpush.bf16.msrb.mxu3 %v2061_v48  ;;  %v2092_v25 = vld [vmem:[%s2637_s1 + $0x2e0] sm:$0xff]  ;;  %v2091_v29 = vld [vmem:[%s2637_s1 + $0x2d8] sm:$0xff]  ;;  %v2074_v31 = vld [vmem:[%s2637_s1 + $0x250] sm:$0xff] }
  0x2e   :  { %1147 = vmatpush.bf16.msrb.mxu0 %v2036_v54  ;;  %v2082_v32 = vld [vmem:[%s2637_s1 + $0x290] sm:$0xff]  ;;  %v2065_v34 = vld [vmem:[%s2637_s1 + $0x208] sm:$0xff]  ;;  %v2064_v38 = vld [vmem:[%s2637_s1 + $0x200] sm:$0xff] }
  0x2f   :  { %1160 = vmatpush.bf16.msrb.mxu1 %v2044_v55  ;;  %v2090_v33 = vld [vmem:[%s2637_s1 + $0x2d0] sm:$0xff]  ;;  %v2073_v35 = vld [vmem:[%s2637_s1 + $0x248] sm:$0xff]  ;;  %v2072_v39 = vld [vmem:[%s2637_s1 + $0x240] sm:$0xff] }
  0x30   :  { %1173 = vmatpush.bf16.msrb.mxu2 %v2052_v56  ;;  %v2081_v36 = vld [vmem:[%s2637_s1 + $0x288] sm:$0xff]  ;;  %v2080_v40 = vld [vmem:[%s2637_s1 + $0x280] sm:$0xff]  ;;  %v2103_v42 = vld [vmem:[%s2637_s1 + $0x338] sm:$0xff] }
  0x31   :  { %1186 = vmatpush.bf16.msrb.mxu3 %v2060_v57  ;;  %v2089_v37 = vld [vmem:[%s2637_s1 + $0x2c8] sm:$0xff]  ;;  %v2088_v41 = vld [vmem:[%s2637_s1 + $0x2c0] sm:$0xff]  ;;  %v2111_v43 = vld [vmem:[%s2637_s1 + $0x378] sm:$0xff] }
  0x32   :  { %1148 = vmatpush.bf16.msrb.mxu0 %v2035_v58  ;;  %v2119_v44 = vld [vmem:[%s2637_s1 + $0x3b8] sm:$0xff]  ;;  %v300_v46 = vld [vmem:[#allocation1] sm:$0xff]  ;;  %v301_v48 = vld [vmem:[#allocation1 + $0x9] sm:$0xff] }
  0x33   :  { %1161 = vmatpush.bf16.msrb.mxu1 %v2043_v59  ;;  %v2127_v45 = vld [vmem:[%s2637_s1 + $0x3f8] sm:$0xff]  ;;  %v2118_v52 = vld [vmem:[%s2637_s1 + $0x3b0] sm:$0xff]  ;;  %v2101_v54 = vld [vmem:[%s2637_s1 + $0x328] sm:$0xff] }
  0x34   :  { %1174 = vmatpush.bf16.msrb.mxu2 %v2051_v60  ;;  %v302_v47 = vld [vmem:[#allocation1 + $0x12] sm:$0xff]  ;;  %v2109_v55 = vld [vmem:[%s2637_s1 + $0x368] sm:$0xff]  ;;  %v2100_v58 = vld [vmem:[%s2637_s1 + $0x320] sm:$0xff] }
  0x35   :  { %1187 = vmatpush.bf16.msrb.mxu3 %v2059_v61  ;;  %v2117_v56 = vld [vmem:[%s2637_s1 + $0x3a8] sm:$0xff]  ;;  %v2108_v59 = vld [vmem:[%s2637_s1 + $0x360] sm:$0xff] }
  0x36   :  { %1149 = vmatpush.bf16.msrb.mxu0 %v2034_v62  ;;  %v2125_v57 = vld [vmem:[%s2637_s1 + $0x3e8] sm:$0xff]  ;;  %v2116_v60 = vld [vmem:[%s2637_s1 + $0x3a0] sm:$0xff]  ;;  %v2099_v62 = vld [vmem:[%s2637_s1 + $0x318] sm:$0xff] }
  0x37   :  { %1162 = vmatpush.bf16.msrb.mxu1 %v2042_v63  ;;  %v2124_v61 = vld [vmem:[%s2637_s1 + $0x3e0] sm:$0xff]  ;;  %v2107_v63 = vld [vmem:[%s2637_s1 + $0x358] sm:$0xff] }
  0x38   :  { %1175 = vmatpush.bf16.msrb.mxu2 %v2050_v0  ;;  %v2115_v0 = vld [vmem:[%s2637_s1 + $0x398] sm:$0xff] }
  0x39   :  { %1188 = vmatpush.bf16.msrb.mxu3 %v2058_v1  ;;  %v2123_v1 = vld [vmem:[%s2637_s1 + $0x3d8] sm:$0xff] }
  0x3a   :  { %1150 = vmatpush.bf16.msrb.mxu0 %v2033_v2  ;;  %v2098_v2 = vld [vmem:[%s2637_s1 + $0x310] sm:$0xff] }
  0x3b   :  { %1163 = vmatpush.bf16.msrb.mxu1 %v2041_v3  ;;  %v2106_v3 = vld [vmem:[%s2637_s1 + $0x350] sm:$0xff] }
  0x3c   :  { %1176 = vmatpush.bf16.msrb.mxu2 %v2049_v4  ;;  %v2114_v4 = vld [vmem:[%s2637_s1 + $0x390] sm:$0xff] }
  0x3d   :  { %1189 = vmatpush.bf16.msrb.mxu3 %v2057_v5  ;;  %v2122_v5 = vld [vmem:[%s2637_s1 + $0x3d0] sm:$0xff] }
  0x3e   :  { %1151 = vmatpush.bf16.msrb.mxu0 %v2032_v6  ;;  %v2097_v6 = vld [vmem:[%s2637_s1 + $0x308] sm:$0xff] }
  0x3f   :  { %1164 = vmatpush.bf16.msrb.mxu1 %v2040_v7  ;;  %v2105_v7 = vld [vmem:[%s2637_s1 + $0x348] sm:$0xff] }
  0x40   :  { %1177 = vmatpush.bf16.msrb.mxu2 %v2048_v8  ;;  %v2113_v8 = vld [vmem:[%s2637_s1 + $0x388] sm:$0xff] }
  0x41   :  { %1190 = vmatpush.bf16.msrb.mxu3 %v2056_v9  ;;  %1152 = vmatmul.bf16.vlgmr.msrb.gmra.mxu0 %v294_v50  ;;  %v2102_v50 = vld [vmem:[%s2637_s1 + $0x330] sm:$0xff]  ;;  %v2121_v9 = vld [vmem:[%s2637_s1 + $0x3c8] sm:$0xff] }
  0x42   :  { %1196 = vmatpush.bf16.msra.mxu0 %v2071_v10  ;;  %1165 = vmatmul.bf16.vlgmr.msrb.gmra.mxu1 %v295_v53  ;;  %v2126_v53 = vld [vmem:[%s2637_s1 + $0x3f0] sm:$0xff]  ;;  %v2096_v10 = vld [vmem:[%s2637_s1 + $0x300] sm:$0xff] }
  0x43   :  { %1209 = vmatpush.bf16.msra.mxu1 %v2079_v11  ;;  %1178 = vmatmul.bf16.vlgmr.msrb.gmra.mxu2 %v296_v49  ;;  %v303_v49 = vld [vmem:[#allocation1 + $0x1b] sm:$0xff] }
  0x44   :  { %1222 = vmatpush.bf16.msra.mxu2 %v2087_v12  ;;  %1191 = vmatmul.bf16.vlgmr.msrb.gmra.mxu3 %v297_v51  ;;  %v2110_v51 = vld [vmem:[%s2637_s1 + $0x370] sm:$0xff]  ;;  %v2104_v11 = vld [vmem:[%s2637_s1 + $0x340] sm:$0xff] }
  0x45   :  { %1235 = vmatpush.bf16.msra.mxu3 %v2095_v13  ;;  %v2112_v12 = vld [vmem:[%s2637_s1 + $0x380] sm:$0xff] }
  0x46   :  { %1197 = vmatpush.bf16.msra.mxu0 %v2070_v14  ;;  %v2120_v13 = vld [vmem:[%s2637_s1 + $0x3c0] sm:$0xff] }
  0x47   :  { %1210 = vmatpush.bf16.msra.mxu1 %v2078_v15  ;;  %v304_v14 = vld [vmem:[#allocation1 + $0x24] sm:$0xff]  ;;  %v305_v15 = vld [vmem:[#allocation1 + $0x2d] sm:$0xff] }
  0x48   :  { %1223 = vmatpush.bf16.msra.mxu2 %v2086_v16  ;;  %v306_v16 = vld [vmem:[#allocation1 + $0x36] sm:$0xff] }
  0x49   :  { %1236 = vmatpush.bf16.msra.mxu3 %v2094_v17  ;;  %v307_v17 = vld [vmem:[#allocation1 + $0x3f] sm:$0xff] }
  0x4a   :  { %1198 = vmatpush.bf16.msra.mxu0 %v2069_v18 }
  0x4b   :  { %1211 = vmatpush.bf16.msra.mxu1 %v2077_v19 }
  0x4c   :  { %1224 = vmatpush.bf16.msra.mxu2 %v2085_v20 }
  0x4d   :  { %1237 = vmatpush.bf16.msra.mxu3 %v2093_v21 }
  0x4e   :  { %1199 = vmatpush.bf16.msra.mxu0 %v2068_v22 }
  0x4f   :  { %1212 = vmatpush.bf16.msra.mxu1 %v2076_v23 }
  0x50   :  { %1225 = vmatpush.bf16.msra.mxu2 %v2084_v24 }
  0x51   :  { %1238 = vmatpush.bf16.msra.mxu3 %v2092_v25 }
  0x52   :  { %1200 = vmatpush.bf16.msra.mxu0 %v2067_v26 }
  0x53   :  { %1213 = vmatpush.bf16.msra.mxu1 %v2075_v27 }
  0x54   :  { %1226 = vmatpush.bf16.msra.mxu2 %v2083_v28 }
  0x55   :  { %1239 = vmatpush.bf16.msra.mxu3 %v2091_v29 }
  0x56   :  { %1201 = vmatpush.bf16.msra.mxu0 %v2066_v30 }
  0x57   :  { %1214 = vmatpush.bf16.msra.mxu1 %v2074_v31 }
  0x58   :  { %1227 = vmatpush.bf16.msra.mxu2 %v2082_v32 }
  0x59   :  { %1240 = vmatpush.bf16.msra.mxu3 %v2090_v33 }
  0x5a   :  { %1202 = vmatpush.bf16.msra.mxu0 %v2065_v34 }
  0x5b   :  { %1215 = vmatpush.bf16.msra.mxu1 %v2073_v35 }
  0x5c   :  { %1228 = vmatpush.bf16.msra.mxu2 %v2081_v36 }
  0x5d   :  { %1241 = vmatpush.bf16.msra.mxu3 %v2089_v37 }
  0x5e   :  { %1203 = vmatpush.bf16.msra.mxu0 %v2064_v38 }
  0x5f   :  { %1216 = vmatpush.bf16.msra.mxu1 %v2072_v39  ;;  %v2172_v39 = vmov 0.0  }
  0x60   :  { %1229 = vmatpush.bf16.msra.mxu2 %v2080_v40  ;;  %28 = vst [vmem:[#allocation2] sm:$0x3] %v2172_v39 }
  0x61   :  { %1242 = vmatpush.bf16.msra.mxu3 %v2088_v41  ;;  %1204 = vmatmul.bf16.vlgmr.msra.gmra.mxu0 %v300_v46  ;;  %v2135_v46 = vld [vmem:[%s2640_s4 + $0x38] sm:$0xff] }
  0x62   :  { %1248 = vmatpush.bf16.msrb.mxu0 %v2103_v42  ;;  %1217 = vmatmul.bf16.vlgmr.msra.gmra.mxu1 %v301_v48 }
  0x63   :  { %1261 = vmatpush.bf16.msrb.mxu1 %v2111_v43  ;;  %1230 = vmatmul.bf16.vlgmr.msra.gmra.mxu2 %v302_v47 }
  0x64   :  { %1274 = vmatpush.bf16.msrb.mxu2 %v2119_v44  ;;  %1243 = vmatmul.bf16.vlgmr.msra.gmra.mxu3 %v303_v49  ;;  %v2134_v49 = vld [vmem:[%s2640_s4 + $0x30] sm:$0xff] }
  0x65   :  { %1287 = vmatpush.bf16.msrb.mxu3 %v2127_v45 }
  0x66   :  { %1249 = vmatpush.bf16.msrb.mxu0 %v2102_v50 }
  0x67   :  { %1262 = vmatpush.bf16.msrb.mxu1 %v2110_v51 }
  0x68   :  { %1275 = vmatpush.bf16.msrb.mxu2 %v2118_v52  ;;  %v2133_v52 = vld [vmem:[%s2640_s4 + $0x28] sm:$0xff] }
  0x69   :  { %1288 = vmatpush.bf16.msrb.mxu3 %v2126_v53 }
  0x6a   :  { %1250 = vmatpush.bf16.msrb.mxu0 %v2101_v54  ;;  %v2132_v54 = vld [vmem:[%s2640_s4 + $0x20] sm:$0xff] }
  0x6b   :  { %1263 = vmatpush.bf16.msrb.mxu1 %v2109_v55 }
  0x6c   :  { %1276 = vmatpush.bf16.msrb.mxu2 %v2117_v56 }
  0x6d   :  { %1289 = vmatpush.bf16.msrb.mxu3 %v2125_v57  ;;  %v2131_v57 = vld [vmem:[%s2640_s4 + $0x18] sm:$0xff] }
  0x6e   :  { %1251 = vmatpush.bf16.msrb.mxu0 %v2100_v58 }
  0x6f   :  { %1264 = vmatpush.bf16.msrb.mxu1 %v2108_v59 }
  0x70   :  { %1277 = vmatpush.bf16.msrb.mxu2 %v2116_v60 }
  0x71   :  { %1290 = vmatpush.bf16.msrb.mxu3 %v2124_v61  ;;  %v2130_v61 = vld [vmem:[%s2640_s4 + $0x10] sm:$0xff] }
  0x72   :  { %1252 = vmatpush.bf16.msrb.mxu0 %v2099_v62 }
  0x73   :  { %1265 = vmatpush.bf16.msrb.mxu1 %v2107_v63  ;;  %v2129_v63 = vld [vmem:[%s2640_s4 + $0x8] sm:$0xff] }
  0x74   :  { %1278 = vmatpush.bf16.msrb.mxu2 %v2115_v0 }
  0x75   :  { %1291 = vmatpush.bf16.msrb.mxu3 %v2123_v1 }
  0x76   :  { %1253 = vmatpush.bf16.msrb.mxu0 %v2098_v2 }
  0x77   :  { %1266 = vmatpush.bf16.msrb.mxu1 %v2106_v3  ;;  %v2173_v3 = vmov 2.0  }
  0x78   :  { %1279 = vmatpush.bf16.msrb.mxu2 %v2114_v4  ;;  %2142 = vrcp.f32 %v2173_v3 }
  0x79   :  { %1292 = vmatpush.bf16.msrb.mxu3 %v2122_v5 }
  0x7a   :  { %1254 = vmatpush.bf16.msrb.mxu0 %v2097_v6 }
  0x7b   :  { %1267 = vmatpush.bf16.msrb.mxu1 %v2105_v7  ;;  %v29_v7 = vld [vmem:[#allocation2] sm:$0x3] }
  0x7c   :  { %1280 = vmatpush.bf16.msrb.mxu2 %v2113_v8  ;;  %v2128_v8 = vld [vmem:[%s2640_s4] sm:$0xff] }
  0x7d   :  { %1293 = vmatpush.bf16.msrb.mxu3 %v2121_v9 }
  0x7e   :  { %1255 = vmatpush.bf16.msrb.mxu0 %v2096_v10 }
  0x7f   :  { %1268 = vmatpush.bf16.msrb.mxu1 %v2104_v11  ;;  %v2143_v11 = vpop.eup %2142 }
  0x80   :  { %1281 = vmatpush.bf16.msrb.mxu2 %v2112_v12  ;;  %vm1319_vm1 = vweird.f32 %v2143_v11 }
  0x81   :  { %1294 = vmatpush.bf16.msrb.mxu3 %v2120_v13  ;;  %1256 = vmatmul.bf16.vlgmr.msrb.gmra.mxu0 %v304_v14  ;;  %v1315_v14 = vmul.f32 2.0, %v2143_v11 }
  0x82   :  { %1269 = vmatmul.bf16.vlgmr.msrb.gmra.mxu1 %v305_v15  ;;  %1426 = vmatpush.bf16.msra.mxu0 %v2135_v46 }
  0x83   :  { %1282 = vmatmul.bf16.vlgmr.msrb.gmra.mxu2 %v306_v16  ;;  %v1316_v15 = vsub.f32 1.0, %v1315_v14 }
  0x84   :  { %1295 = vmatmul.bf16.vlgmr.msrb.gmra.mxu3 %v307_v17 }
  0x86   :  { %1427 = vmatpush.bf16.msra.mxu0 %v2134_v49 }
  0x8a   :  { %1428 = vmatpush.bf16.msra.mxu0 %v2133_v52 }
  0x8e   :  { %1429 = vmatpush.bf16.msra.mxu0 %v2132_v54 }
  0x92   :  { %1430 = vmatpush.bf16.msra.mxu0 %v2131_v57 }
  0x96   :  { %1431 = vmatpush.bf16.msra.mxu0 %v2130_v61 }
  0x9a   :  { %1432 = vmatpush.bf16.msra.mxu0 %v2129_v63 }
  0x9e   :  { %v1101_v18 = vpop.f32.mrf.mxu0  ;;  %1433 = vmatpush.bf16.msra.mxu0 %v2128_v8 }
  0x9f   :  { %v1114_v19 = vpop.f32.mrf.mxu1 }
  0xa0   :  { %v1115_v20 = vadd.f32 %v1114_v19, %v1101_v18 }
  0xa6   :  { %v1127_v21 = vpop.f32.mrf.mxu2  ;;  %v1103_v24 = vpop.f32.mrf.mxu0 }
  0xa7   :  { %v1128_v22 = vadd.f32 %v1127_v21, %v1115_v20  ;;  %v1140_v23 = vpop.f32.mrf.mxu3  ;;  %v1116_v26 = vpop.f32.mrf.mxu1  ;;  %v1317_v20 = vmul.f32 %v2143_v11, %v1316_v15 }
  0xa9   :  { %v1141_v25 = vadd.f32 %v1140_v23, %v1128_v22  ;;  %v1318_v26 = vadd.f32 %v2143_v11, %v1317_v20 }
  0xae   :  { %v1129_v27 = vpop.f32.mrf.mxu2 }
  0xaf   :  { %v1142_v28 = vpop.f32.mrf.mxu3 }
  0xbe   :  { %v1153_v29 = vpop.f32.mrf.mxu0 }
  0xbf   :  { %v1166_v30 = vpop.f32.mrf.mxu1  ;;  %v1154_v40 = vadd.f32 %v1153_v29, %v1141_v25 }
  0xc1   :  { %v1167_v44 = vadd.f32 %v1166_v30, %v1154_v40 }
  0xc6   :  { %v1179_v31 = vpop.f32.mrf.mxu2  ;;  %v1155_v33 = vpop.f32.mrf.mxu0 }
  0xc7   :  { %v1192_v32 = vpop.f32.mrf.mxu3  ;;  %v1168_v34 = vpop.f32.mrf.mxu1  ;;  %v1180_v47 = vadd.f32 %v1179_v31, %v1167_v44  ;;  %v1320_v31 = vsel %vm1319_vm1, %v2143_v11, %v1318_v26 }
  0xc9   :  { %v1193_v51 = vadd.f32 %v1192_v32, %v1180_v47  ;;  %v2139_v47 = vld [vmem:[%s2638_s2] ss:$0 sm:$0xff]  ;;  %s1447_s2 = sshll.u32 %s2642_s6, 4  ;;  %s1448_s2 = int_to_ptr.hbm [resolvable:$true] %s1447_s2 }
  0xce   :  { %v1181_v35 = vpop.f32.mrf.mxu2 }
  0xcf   :  { %v1194_v36 = vpop.f32.mrf.mxu3 }
  0xde   :  { %v1205_v37 = vpop.f32.mrf.mxu0 }
  0xdf   :  { %v1218_v38 = vpop.f32.mrf.mxu1  ;;  %v1206_v53 = vadd.f32 %v1205_v37, %v1193_v51 }
  0xe1   :  { %v1219_v55 = vadd.f32 %v1218_v38, %v1206_v53 }
  0xe6   :  { %v1231_v41 = vpop.f32.mrf.mxu2  ;;  %v1207_v43 = vpop.f32.mrf.mxu0 }
  0xe7   :  { %v1244_v42 = vpop.f32.mrf.mxu3  ;;  %v1220_v45 = vpop.f32.mrf.mxu1  ;;  %v1232_v56 = vadd.f32 %v1231_v41, %v1219_v55  ;;  %v2141_v55 = vld [vmem:[%s2641_s5] ss:$0 sm:$0xff] }
  0xe9   :  { %v1245_v58 = vadd.f32 %v1244_v42, %v1232_v56 }
  0xee   :  { %v1233_v48 = vpop.f32.mrf.mxu2 }
  0xef   :  { %v1246_v50 = vpop.f32.mrf.mxu3 }
  0xf0   :  { %v2140_v50 = vld [vmem:[%s2639_s3] ss:$0 sm:$0xff] }
  0xfe   :  { %v1257_v59 = vpop.f32.mrf.mxu0 }
  0xff   :  { %v1270_v60 = vpop.f32.mrf.mxu1  ;;  %v1258_v62 = vadd.f32 %v1257_v59, %v1245_v58 }
 0x101   :  { %v1271_v0 = vadd.f32 %v1270_v60, %v1258_v62 }
 0x106   :  { %v1283_v1 = vpop.f32.mrf.mxu2  ;;  %v1259_v5 = vpop.f32.mrf.mxu0 }
 0x107   :  { %v1296_v2 = vpop.f32.mrf.mxu3  ;;  %v1284_v4 = vadd.f32 %v1283_v1, %v1271_v0  ;;  %v1272_v6 = vpop.f32.mrf.mxu1 }
 0x109   :  { %v1297_v9 = vadd.f32 %v1296_v2, %v1284_v4 }
 0x10b   :  { %v1300_v10 = vadd.f32 %v1297_v9, %v29_v7 }
 0x10d   :  { %1301 = vst [vmem:[#allocation2] sm:$0x3] %v1300_v10 }
 0x10e   :  { %v1285_v12 = vpop.f32.mrf.mxu2 }
 0x10f   :  { %v1298_v13 = vpop.f32.mrf.mxu3 }
 0x114   :  { %v1305_v16 = vld [vmem:[#allocation2] sm:$0x3] }
 0x115   :  { %v1307_v17 = vsel %vm1306_vm0, %v1305_v16, 0.0  ;;  %v1322_v18 = vmul.f32 %v1305_v16, %v1305_v16 }
 0x116   :  { %v1308_v19 = vrot.slane %v1307_v17, 4 }
 0x117   :  { %v1323_v21 = vsel %vm1306_vm0, %v1322_v18, 0.0 }
 0x118   :  { %v1309_v22 = vadd.f32 %v1308_v19, %v1307_v17  ;;  %v1324_v23 = vrot.slane %v1323_v21, 4 }
 0x11a   :  { %v1310_v24 = vrot.slane %v1309_v22, 2  ;;  %v1325_v25 = vadd.f32 %v1324_v23, %v1323_v21 }
 0x11c   :  { %v1311_v27 = vadd.f32 %v1310_v24, %v1309_v22  ;;  %v1326_v28 = vrot.slane %v1325_v25, 2 }
 0x11e   :  { %v1312_v29 = vrot.slane %v1311_v27, 1  ;;  %v1327_v30 = vadd.f32 %v1326_v28, %v1325_v25 }
 0x120   :  { %v1313_v32 = vadd.f32 %v1312_v29, %v1311_v27  ;;  %v1328_v33 = vrot.slane %v1327_v30, 1 }
 0x122   :  { %v1321_v34 = vmul.f32 %v1320_v31, %v1313_v32  ;;  %v1329_v35 = vadd.f32 %v1328_v33, %v1327_v30 }
 0x124   :  { %v1330_v36 = vmul.f32 %v1329_v35, %v1320_v31  ;;  %v1331_v37 = vmul.f32 %v1321_v34, %v1321_v34  ;;  %v1333_v46 = vsub.f32 %v1305_v16, %v1321_v34 }
 0x126   :  { %v1332_v38 = vsub.f32 %v1330_v36, %v1331_v37 }
 0x128   :  { %v1334_v39 = vadd.f32 1e-05, %v1332_v38 }
 0x12a   :  { %2144 = vrsqrt.f32 %v1334_v39  ;;  %vm1341_vm3 = vweird.f32 %v1334_v39 }
 0x130   :  { %v2145_v40 = vpop.eup %2144 }
 0x131   :  { %v1336_v41 = vmul.f32 %v2145_v40, %v1334_v39  ;;  %vm1342_vm2 = vweird.f32 %v2145_v40 }
 0x132   :  { %vm1343_vm4 = vmor %vm1341_vm3, %vm1342_vm2 }
 0x133   :  { %v1337_v42 = vmul.f32 %v2145_v40, %v1336_v41 }
 0x135   :  { %v1338_v43 = vmul.f32 0.5, %v1337_v42 }
 0x137   :  { %v1339_v44 = vsub.f32 1.5, %v1338_v43 }
 0x139   :  { %v1340_v45 = vmul.f32 %v2145_v40, %v1339_v44 }
 0x13b   :  { %v1344_v48 = vsel %vm1343_vm4, %v2145_v40, %v1340_v45 }
 0x13c   :  { %v1345_v49 = vmul.f32 %v1344_v48, %v1333_v46 }
 0x13e   :  { %v1350_v51 = vmul.f32 %v2139_v47, %v1345_v49 }
 0x140   :  { %v1355_v52 = vadd.f32 %v2140_v50, %v1350_v51 }
 0x142   :  { %v1356_v53 = vmax.f32 %v1355_v52, 0.0 }
 0x144   :  { %v1357_v54 = vpack.c.bf16 %v1356_v53, %v1356_v53 }
 0x146   :  { %1434 = vmatmul.bf16.vlgmr.msra.gmra.mxu0 %v1357_v54 }
 0x1c3   :  { %v1435_v56 = vpop.f32.mrf.mxu0 }
 0x1c4   :  { %v1436_v57 = vadd.f32 %v2141_v55, %v1435_v56 }
 0x1c6   :  { %1439 = vst [vmem:[#allocation3] sm:$0x3] %v1436_v57 }
 0x1c7   :  { %1450 = dma.vmem_to_hbm [thread:$0]  %s1446_s30, 32, %s1448_s2, [#allocation4]  }
 0x1cb   :  { %v1437_v58 = vpop.f32.mrf.mxu0 }
 0x1cc   :  { %2170 = dma.done.wait [#allocation4], 32  }
 0x1cd   :  { %2171 = vsyncadd [#allocation4], 4294967264 }
 0x1ce   :  { %1455 = vsyncpa [#allocation4], 1 }

// kernel: _lambda_.9
= control target key start
LH: loop header
LB: loop body
LE: loop exit
PB: predicated region body
PF: predicated region fallthrough
CT: control target
= control target key end

     0   :  { %vm120_vm0 = vsmask.f32 7424  ;;  %vm213_vm1 = vcmask 1047552   ;;  %vm828_vm3 = vsmask.f32 6400  ;;  %vm889_vm4 = vcmask 1046528   ;;  %s3246_s1 = inlined_call_operand.vmem [shape: bf16[4,512,128], index: 1, kind: input, shape index: {}]   ;;  %s3247_s0 = inlined_call_operand.vmem [shape: bf16[32,512], index: 0, kind: input, shape index: {}]   ;;  %s3248_s2 = inlined_call_operand.vmem [shape: f32[32,1], index: 2, kind: input, shape index: {}]   ;;  %s3249_s3 = inlined_call_operand.vmem [shape: bf16[32,128], index: 3, kind: output, shape index: {0}]   ;;  %s3250_s4 = inlined_call_operand.vmem [shape: f32[1,2,128], index: 4, kind: output, shape index: {1}]  }
   0x1   :  { %v2439_v0 = vld [vmem:[%s3246_s1 + $0x138] sm:$0xff]  ;;  %v2438_v4 = vld [vmem:[%s3246_s1 + $0x130] sm:$0xff]  ;;  %v2437_v8 = vld [vmem:[%s3246_s1 + $0x128] sm:$0xff]  ;;  %vm1232_vm6 = vcmask 1045504   ;;  %vm1665_vm7 = vcmask 1040384  }
   0x2   :  { %v2447_v1 = vld [vmem:[%s3246_s1 + $0x178] sm:$0xff]  ;;  %476 = vmatpush.bf16.msra.mxu0 %v2439_v0  ;;  %v2446_v5 = vld [vmem:[%s3246_s1 + $0x170] sm:$0xff]  ;;  %v2445_v9 = vld [vmem:[%s3246_s1 + $0x168] sm:$0xff] }
   0x3   :  { %v2455_v2 = vld [vmem:[%s3246_s1 + $0x1b8] sm:$0xff]  ;;  %495 = vmatpush.bf16.msra.mxu1 %v2447_v1  ;;  %v2454_v6 = vld [vmem:[%s3246_s1 + $0x1b0] sm:$0xff]  ;;  %v2453_v10 = vld [vmem:[%s3246_s1 + $0x1a8] sm:$0xff] }
   0x4   :  { %v2463_v3 = vld [vmem:[%s3246_s1 + $0x1f8] sm:$0xff]  ;;  %514 = vmatpush.bf16.msra.mxu2 %v2455_v2  ;;  %v2462_v7 = vld [vmem:[%s3246_s1 + $0x1f0] sm:$0xff]  ;;  %v2461_v11 = vld [vmem:[%s3246_s1 + $0x1e8] sm:$0xff] }
   0x5   :  { %533 = vmatpush.bf16.msra.mxu3 %v2463_v3  ;;  %v2436_v12 = vld [vmem:[%s3246_s1 + $0x120] sm:$0xff]  ;;  %v18_v17 = vld [vmem:[%s3247_s0 + $0x10] sm:$0xff]  ;;  %v2435_v20 = vld [vmem:[%s3246_s1 + $0x118] sm:$0xff] }
   0x6   :  { %477 = vmatpush.bf16.msra.mxu0 %v2438_v4  ;;  %v2444_v13 = vld [vmem:[%s3246_s1 + $0x160] sm:$0xff]  ;;  %v2443_v21 = vld [vmem:[%s3246_s1 + $0x158] sm:$0xff]  ;;  %v100_v23 = vunpack.c.l.b16 %v18_v17  ;;  %v101_v24 = vunpack.c.h.b16 %v18_v17  ;;  %v17_v25 = vld [vmem:[%s3247_s0 + $0x8] sm:$0xff] }
   0x7   :  { %496 = vmatpush.bf16.msra.mxu1 %v2446_v5  ;;  %v16_v14 = vld [vmem:[%s3247_s0] sm:$0xff]  ;;  %v2451_v26 = vld [vmem:[%s3246_s1 + $0x198] sm:$0xff]  ;;  %v2398_v27 = vld [vmem:[%s3247_s0 + $0x2c] sm:$0xf0]  ;;  %v2665_v35 = vunpack.c.l.b16 %v17_v25  ;;  %v2676_v40 = vunpack.c.h.b16 %v17_v25 }
   0x8   :  { %515 = vmatpush.bf16.msra.mxu2 %v2454_v6  ;;  %v2452_v15 = vld [vmem:[%s3246_s1 + $0x1a0] sm:$0xff]  ;;  %v2622_v18 = vunpack.c.l.b16 %v16_v14  ;;  %v2624_v19 = vunpack.c.h.b16 %v16_v14  ;;  %v19_v29 = vld [vmem:[%s3247_s0 + $0x18] sm:$0xff]  ;;  %v1680_v31 = vld [vmem:[%s3247_s0 + $0x30] sm:$0xf0] }
   0x9   :  { %534 = vmatpush.bf16.msra.mxu3 %v2462_v7  ;;  %v2460_v16 = vld [vmem:[%s3246_s1 + $0x1e0] sm:$0xff]  ;;  %v1686_v33 = vld [vmem:[%s3247_s0 + $0x28] sm:$0xf]  ;;  %v2399_v34 = vld [vmem:[%s3247_s0 + $0x34] sm:$0xf0]  ;;  %v102_v36 = vunpack.c.l.b16 %v19_v29  ;;  %v103_v41 = vunpack.c.h.b16 %v19_v29 }
   0xa   :  { %478 = vmatpush.bf16.msra.mxu0 %v2437_v8  ;;  %v1678_v22 = vld [vmem:[%s3247_s0 + $0x20] sm:$0xf]  ;;  %v2396_v28 = vld [vmem:[%s3247_s0 + $0x24] sm:$0xf]  ;;  %v2651_v30 = vpack.c.b16 %v100_v23, %v2622_v18  ;;  %v2657_v32 = vpack.c.b16 %v101_v24, %v2624_v19  ;;  %v2459_v37 = vld [vmem:[%s3246_s1 + $0x1d8] sm:$0xff]  ;;  %v2682_v44 = vor.u32 %v2399_v34, %v1686_v33  ;;  %v2788_v34 = vpack.c.b16 %v2622_v18, %v2622_v18 }
   0xb   :  { %497 = vmatpush.bf16.msra.mxu1 %v2445_v9  ;;  %v2397_v38 = vld [vmem:[%s3247_s0 + $0x2c] sm:$0xf]  ;;  %v1688_v39 = vld [vmem:[%s3247_s0 + $0x38] sm:$0xf0]  ;;  %v2678_v42 = vor.u32 %v2398_v27, %v1678_v22  ;;  %v2680_v43 = vor.u32 %v2396_v28, %v1680_v31  ;;  %v2434_v45 = vld [vmem:[%s3246_s1 + $0x110] sm:$0xff]  ;;  %v2693_v49 = vpack.c.b16 %v102_v36, %v2665_v35  ;;  %v2704_v53 = vpack.c.b16 %v103_v41, %v2676_v40 }
   0xc   :  { %516 = vmatpush.bf16.msra.mxu2 %v2453_v10  ;;  %v2442_v46 = vld [vmem:[%s3246_s1 + $0x150] sm:$0xff]  ;;  %v124_v47 = vshll.u32 %v2651_v30, 16  ;;  %v136_v48 = vshll.u32 %v2657_v32, 16  ;;  %v2695_v50 = vor.u32 %v2397_v38, %v1688_v39  ;;  %v122_v56 = vshrl.u32 %v2651_v30, 16  ;;  %v2433_v60 = vld [vmem:[%s3246_s1 + $0x108] sm:$0xff]  ;;  %v2432_v8 = vld [vmem:[%s3246_s1 + $0x100] sm:$0xff] }
   0xd   :  { %535 = vmatpush.bf16.msra.mxu3 %v2461_v11  ;;  %v2450_v51 = vld [vmem:[%s3246_s1 + $0x190] sm:$0xff]  ;;  %v129_v54 = vshll.u32 %v2678_v42, 16  ;;  %v148_v55 = vshll.u32 %v2693_v49, 16  ;;  %v134_v57 = vshrl.u32 %v2657_v32, 16  ;;  %v141_v58 = vshll.u32 %v2680_v43, 16  ;;  %v2441_v61 = vld [vmem:[%s3246_s1 + $0x148] sm:$0xff]  ;;  %vm2849_vm2 = vmand %vm213_vm1, %vm120_vm0 }
   0xe   :  { %479 = vmatpush.bf16.msra.mxu0 %v2436_v12  ;;  %v2458_v52 = vld [vmem:[%s3246_s1 + $0x1d0] sm:$0xff]  ;;  %v160_v59 = vshll.u32 %v2704_v53, 16  ;;  %v126_v62 = vrot.slane %v124_v47, 1  ;;  %v138_v63 = vrot.slane %v136_v48, 1  ;;  %v153_v0 = vshll.u32 %v2682_v44, 16  ;;  %v2449_v2 = vld [vmem:[%s3246_s1 + $0x188] sm:$0xff]  ;;  %vm3014_vm5 = vmand %vm889_vm4, %vm828_vm3 }
   0xf   :  { %498 = vmatpush.bf16.msra.mxu1 %v2444_v13  ;;  %v165_v1 = vshll.u32 %v2695_v50, 16  ;;  %v2457_v3 = vld [vmem:[%s3246_s1 + $0x1c8] sm:$0xff]  ;;  %v146_v4 = vshrl.u32 %v2693_v49, 16  ;;  %v150_v5 = vrot.slane %v148_v55, 1  ;;  %v158_v6 = vshrl.u32 %v2704_v53, 16  ;;  %v2440_v9 = vld [vmem:[%s3246_s1 + $0x140] sm:$0xff] }
  0x10   :  { %517 = vmatpush.bf16.msra.mxu2 %v2452_v15  ;;  %v162_v7 = vrot.slane %v160_v59, 1  ;;  %v127_v10 = vor.u32 %v126_v62, %v122_v56  ;;  %v131_v11 = vrot.slane %v129_v54, 1  ;;  %v139_v12 = vor.u32 %v138_v63, %v134_v57  ;;  %v2448_v14 = vld [vmem:[%s3246_s1 + $0x180] sm:$0xff]  ;;  %v2423_v22 = vld [vmem:[%s3246_s1 + $0xb8] sm:$0xff]  ;;  %v2422_v31 = vld [vmem:[%s3246_s1 + $0xb0] sm:$0xff] }
  0x11   :  { %536 = vmatpush.bf16.msra.mxu3 %v2460_v16  ;;  %v143_v13 = vrot.slane %v141_v58, 1  ;;  %v2456_v15 = vld [vmem:[%s3246_s1 + $0x1c0] sm:$0xff]  ;;  %v151_v16 = vor.u32 %v150_v5, %v146_v4  ;;  %v155_v17 = vrot.slane %v153_v0, 1  ;;  %v2407_v23 = vld [vmem:[%s3246_s1 + $0x38] sm:$0xff]  ;;  %v2406_v33 = vld [vmem:[%s3246_s1 + $0x30] sm:$0xff]  ;;  %v2792_v36 = vpack.c.b16 %v2624_v19, %v2624_v19 }
  0x12   :  { %480 = vmatpush.bf16.msra.mxu0 %v2435_v20  ;;  %v163_v20 = vor.u32 %v162_v7, %v158_v6  ;;  %v132_v24 = vsel %vm120_vm0, %v127_v10, %v131_v11  ;;  %v2415_v28 = vld [vmem:[%s3246_s1 + $0x78] sm:$0xff]  ;;  %v2430_v38 = vld [vmem:[%s3246_s1 + $0xf0] sm:$0xff]  ;;  %v2802_v39 = vpack.c.b16 %v2665_v35, %v2665_v35  ;;  %v2806_v18 = vpack.c.b16 %v2676_v40, %v2676_v40  ;;  %v2421_v19 = vld [vmem:[%s3246_s1 + $0xa8] sm:$0xff] }
  0x13   :  { %499 = vmatpush.bf16.msra.mxu1 %v2443_v21  ;;  %v167_v21 = vrot.slane %v165_v1, 1  ;;  %v144_v25 = vsel %vm120_vm0, %v139_v12, %v143_v13  ;;  %v2431_v29 = vld [vmem:[%s3246_s1 + $0xf8] sm:$0xff]  ;;  %v2405_v41 = vld [vmem:[%s3246_s1 + $0x28] sm:$0xff]  ;;  %v172_v35 = vshrl.u32 %v2680_v43, 16  ;;  %v178_v62 = vshrl.u32 %v2695_v50, 16  ;;  %v2412_v10 = vld [vmem:[%s3246_s1 + $0x60] sm:$0xff] }
  0x14   :  { %518 = vmatpush.bf16.msra.mxu2 %v2451_v26  ;;  %v156_v26 = vsel %vm120_vm0, %v151_v16, %v155_v17  ;;  %v2413_v40 = vld [vmem:[%s3246_s1 + $0x68] sm:$0xff]  ;;  %v206_v63 = vshll.u32 %v2806_v18, 16  ;;  %v2428_v12 = vld [vmem:[%s3246_s1 + $0xe0] sm:$0xff] }
  0x15   :  { %537 = vmatpush.bf16.msra.mxu3 %v2459_v37  ;;  %v168_v27 = vsel %vm120_vm0, %v163_v20, %v167_v21  ;;  %v2414_v37 = vld [vmem:[%s3246_s1 + $0x70] sm:$0xff]  ;;  %v2419_v20 = vld [vmem:[%s3246_s1 + $0x98] sm:$0xff] }
  0x16   :  { %481 = vmatpush.bf16.msra.mxu0 %v2434_v45  ;;  %v169_v45 = vshrl.u32 %v2678_v42, 16  ;;  %v208_v16 = vrot.slane %v206_v63, 1 }
  0x17   :  { %500 = vmatpush.bf16.msra.mxu1 %v2442_v46  ;;  %v194_v46 = vshll.u32 %v2788_v34, 16 }
  0x18   :  { %519 = vmatpush.bf16.msra.mxu2 %v2450_v51  ;;  %v198_v51 = vshll.u32 %v2792_v36, 16  ;;  %v171_v5 = vor.u32 %v169_v45, %v131_v11  ;;  %v850_v11 = vrot.slane %v158_v6, 1  ;;  %v2470_v6 = vld [vmem:[%s3246_s1 + $0x230] sm:$0xff] }
  0x19   :  { %538 = vmatpush.bf16.msra.mxu3 %v2458_v52  ;;  %v2429_v52 = vld [vmem:[%s3246_s1 + $0xe8] sm:$0xff]  ;;  %v196_v7 = vrot.slane %v194_v46, 1 }
  0x1a   :  { %482 = vmatpush.bf16.msra.mxu0 %v2433_v60  ;;  %v175_v60 = vshrl.u32 %v2682_v44, 16 }
  0x1b   :  { %501 = vmatpush.bf16.msra.mxu1 %v2441_v61  ;;  %v202_v61 = vshll.u32 %v2802_v39, 16 }
  0x1c   :  { %520 = vmatpush.bf16.msra.mxu2 %v2449_v2  ;;  %v2420_v2 = vld [vmem:[%s3246_s1 + $0xa0] sm:$0xff] }
  0x1d   :  { %539 = vmatpush.bf16.msra.mxu3 %v2457_v3  ;;  %v2404_v3 = vld [vmem:[%s3246_s1 + $0x20] sm:$0xff] }
  0x1e   :  { %483 = vmatpush.bf16.msra.mxu0 %v2432_v8  ;;  %v174_v8 = vor.u32 %v172_v35, %v143_v13  ;;  %v177_v13 = vor.u32 %v175_v60, %v155_v17  ;;  %v215_v17 = vsel %vm2849_vm2, %v171_v5, %v196_v7  ;;  %v2424_v5 = vld [vmem:[%s3246_s1 + $0xc0] sm:$0xff]  ;;  %v836_v7 = vrot.slane %v134_v57, 1  ;;  %v2486_v57 = vld [vmem:[%s3246_s1 + $0x2b0] sm:$0xff] }
  0x1f   :  { %502 = vmatpush.bf16.msra.mxu1 %v2440_v9  ;;  %v200_v9 = vrot.slane %v198_v51, 1 }
  0x20   :  { %521 = vmatpush.bf16.msra.mxu2 %v2448_v14  ;;  %v204_v14 = vrot.slane %v202_v61, 1 }
  0x21   :  { %540 = vmatpush.bf16.msra.mxu3 %v2456_v15  ;;  %484 = vmatmul.bf16.vlgmr.msra.gmra.mxu0 %v132_v24  ;;  %v180_v15 = vor.u32 %v178_v62, %v167_v21 }
  0x22   :  { %752 = vmatpush.bf16.msrb.mxu0 %v2407_v23  ;;  %503 = vmatmul.bf16.vlgmr.msra.gmra.mxu1 %v144_v25  ;;  %v216_v23 = vsel %vm2849_vm2, %v174_v8, %v200_v9  ;;  %v217_v21 = vsel %vm2849_vm2, %v177_v13, %v204_v14  ;;  %v2411_v25 = vld [vmem:[%s3246_s1 + $0x58] sm:$0xff]  ;;  %v840_v8 = vrot.slane %v141_v58, 2  ;;  %v839_v9 = vrot.slane %v172_v35, 1 }
  0x23   :  { %522 = vmatmul.bf16.vlgmr.msra.gmra.mxu2 %v156_v26  ;;  %771 = vmatpush.bf16.msrb.mxu1 %v2415_v28  ;;  %v218_v24 = vsel %vm2849_vm2, %v180_v15, %v208_v16  ;;  %v2427_v26 = vld [vmem:[%s3246_s1 + $0xd8] sm:$0xff]  ;;  %v2402_v28 = vld [vmem:[%s3246_s1 + $0x10] sm:$0xff]  ;;  %v854_v58 = vrot.slane %v165_v1, 2  ;;  %v853_v35 = vrot.slane %v178_v62, 1  ;;  %v837_v13 = vrot.slane %v136_v48, 2 }
  0x24   :  { %790 = vmatpush.bf16.msrb.mxu2 %v2423_v22  ;;  %541 = vmatmul.bf16.vlgmr.msra.gmra.mxu3 %v168_v27  ;;  %v2403_v22 = vld [vmem:[%s3246_s1 + $0x18] sm:$0xff]  ;;  %v2418_v27 = vld [vmem:[%s3246_s1 + $0x90] sm:$0xff]  ;;  %v851_v14 = vrot.slane %v160_v59, 2  ;;  %v841_v15 = vor.u32 %v840_v8, %v839_v9  ;;  %v2485_v59 = vld [vmem:[%s3246_s1 + $0x2a8] sm:$0xff] }
  0x25   :  { %809 = vmatpush.bf16.msrb.mxu3 %v2431_v29  ;;  %v2410_v29 = vld [vmem:[%s3246_s1 + $0x50] sm:$0xff]  ;;  %v838_v62 = vor.u32 %v837_v13, %v836_v7  ;;  %v883_v7 = vrot.slane %v206_v63, 2  ;;  %v2480_v13 = vld [vmem:[%s3246_s1 + $0x280] sm:$0xff] }
  0x26   :  { %753 = vmatpush.bf16.msrb.mxu0 %v2406_v33  ;;  %v2417_v33 = vld [vmem:[%s3246_s1 + $0x88] sm:$0xff]  ;;  %v2478_v1 = vld [vmem:[%s3246_s1 + $0x270] sm:$0xff]  ;;  %v852_v16 = vor.u32 %v851_v14, %v850_v11  ;;  %v829_v14 = vrot.slane %v122_v56, 1  ;;  %v846_v56 = vrot.slane %v175_v60, 1  ;;  %v2511_v60 = vld [vmem:[%s3246_s1 + $0x378] sm:$0xff] }
  0x27   :  { %772 = vmatpush.bf16.msrb.mxu1 %v2414_v37  ;;  %v2401_v37 = vld [vmem:[%s3246_s1 + $0x8] sm:$0xff]  ;;  %v2494_v48 = vld [vmem:[%s3246_s1 + $0x2f0] sm:$0xff] }
  0x28   :  { %791 = vmatpush.bf16.msrb.mxu2 %v2422_v31  ;;  %v2426_v31 = vld [vmem:[%s3246_s1 + $0xd0] sm:$0xff]  ;;  %v2465_v11 = vld [vmem:[%s3246_s1 + $0x208] sm:$0xff] }
  0x29   :  { %810 = vmatpush.bf16.msrb.mxu3 %v2430_v38  ;;  %v2409_v38 = vld [vmem:[%s3246_s1 + $0x48] sm:$0xff]  ;;  %v2490_v8 = vld [vmem:[%s3246_s1 + $0x2d0] sm:$0xff] }
  0x2a   :  { %754 = vmatpush.bf16.msrb.mxu0 %v2405_v41  ;;  %v2416_v41 = vld [vmem:[%s3246_s1 + $0x80] sm:$0xff] }
  0x2b   :  { %773 = vmatpush.bf16.msrb.mxu1 %v2413_v40  ;;  %v2400_v40 = vld [vmem:[%s3246_s1] sm:$0xff] }
  0x2c   :  { %792 = vmatpush.bf16.msrb.mxu2 %v2421_v19  ;;  %v2425_v19 = vld [vmem:[%s3246_s1 + $0xc8] sm:$0xff] }
  0x2d   :  { %811 = vmatpush.bf16.msrb.mxu3 %v2429_v52  ;;  %v2487_v52 = vld [vmem:[%s3246_s1 + $0x2b8] sm:$0xff] }
  0x2e   :  { %755 = vmatpush.bf16.msrb.mxu0 %v2404_v3  ;;  %v2408_v3 = vld [vmem:[%s3246_s1 + $0x40] sm:$0xff] }
  0x2f   :  { %774 = vmatpush.bf16.msrb.mxu1 %v2412_v10  ;;  %v2479_v10 = vld [vmem:[%s3246_s1 + $0x278] sm:$0xff] }
  0x30   :  { %793 = vmatpush.bf16.msrb.mxu2 %v2420_v2  ;;  %v2471_v2 = vld [vmem:[%s3246_s1 + $0x238] sm:$0xff] }
  0x31   :  { %812 = vmatpush.bf16.msrb.mxu3 %v2428_v12  ;;  %489 = vmatmul.bf16.gmra.mxu0 %v215_v17  ;;  %v2495_v12 = vld [vmem:[%s3246_s1 + $0x2f8] sm:$0xff]  ;;  %v2469_v17 = vld [vmem:[%s3246_s1 + $0x228] sm:$0xff] }
  0x32   :  { %756 = vmatpush.bf16.msrb.mxu0 %v2403_v22  ;;  %508 = vmatmul.bf16.gmra.mxu1 %v216_v23  ;;  %v855_v22 = vor.u32 %v854_v58, %v853_v35  ;;  %v2477_v23 = vld [vmem:[%s3246_s1 + $0x268] sm:$0xff] }
  0x33   :  { %527 = vmatmul.bf16.gmra.mxu2 %v217_v21  ;;  %775 = vmatpush.bf16.msrb.mxu1 %v2411_v25  ;;  %v2493_v21 = vld [vmem:[%s3246_s1 + $0x2e8] sm:$0xff]  ;;  %v2484_v25 = vld [vmem:[%s3246_s1 + $0x2a0] sm:$0xff] }
  0x34   :  { %794 = vmatpush.bf16.msrb.mxu2 %v2419_v20  ;;  %546 = vmatmul.bf16.gmra.mxu3 %v218_v24  ;;  %v2964_v20 = vsel %vm828_vm3, %v838_v62, %v841_v15  ;;  %v2977_v24 = vsel %vm828_vm3, %v852_v16, %v855_v22  ;;  %v2473_v58 = vld [vmem:[%s3246_s1 + $0x248] sm:$0xff]  ;;  %v2519_v62 = vld [vmem:[%s3246_s1 + $0x3b8] sm:$0xff] }
  0x35   :  { %813 = vmatpush.bf16.msrb.mxu3 %v2427_v26  ;;  %v2468_v26 = vld [vmem:[%s3246_s1 + $0x220] sm:$0xff]  ;;  %v2489_v35 = vld [vmem:[%s3246_s1 + $0x2c8] sm:$0xff] }
  0x36   :  { %757 = vmatpush.bf16.msrb.mxu0 %v2402_v28  ;;  %v2492_v28 = vld [vmem:[%s3246_s1 + $0x2e0] sm:$0xff] }
  0x37   :  { %776 = vmatpush.bf16.msrb.mxu1 %v2410_v29  ;;  %v2483_v29 = vld [vmem:[%s3246_s1 + $0x298] sm:$0xff] }
  0x38   :  { %795 = vmatpush.bf16.msrb.mxu2 %v2418_v27  ;;  %v2476_v27 = vld [vmem:[%s3246_s1 + $0x260] sm:$0xff] }
  0x39   :  { %814 = vmatpush.bf16.msrb.mxu3 %v2426_v31  ;;  %v2467_v31 = vld [vmem:[%s3246_s1 + $0x218] sm:$0xff] }
  0x3a   :  { %758 = vmatpush.bf16.msrb.mxu0 %v2401_v37  ;;  %v2491_v37 = vld [vmem:[%s3246_s1 + $0x2d8] sm:$0xff] }
  0x3b   :  { %777 = vmatpush.bf16.msrb.mxu1 %v2409_v38  ;;  %v870_v38 = vshrl.u32 %v2792_v36, 16 }
  0x3c   :  { %796 = vmatpush.bf16.msrb.mxu2 %v2417_v33  ;;  %v2475_v33 = vld [vmem:[%s3246_s1 + $0x258] sm:$0xff] }
  0x3d   :  { %815 = vmatpush.bf16.msrb.mxu3 %v2425_v19  ;;  %v2482_v19 = vld [vmem:[%s3246_s1 + $0x290] sm:$0xff] }
  0x3e   :  { %759 = vmatpush.bf16.msrb.mxu0 %v2400_v40  ;;  %v872_v40 = vrot.slane %v870_v38, 1  ;;  %v2501_v38 = vld [vmem:[%s3246_s1 + $0x328] sm:$0xff] }
  0x3f   :  { %778 = vmatpush.bf16.msrb.mxu1 %v2408_v3  ;;  %v2505_v3 = vld [vmem:[%s3246_s1 + $0x348] sm:$0xff] }
  0x40   :  { %797 = vmatpush.bf16.msrb.mxu2 %v2416_v41  ;;  %v880_v41 = vshrl.u32 %v2806_v18, 16 }
  0x41   :  { %816 = vmatpush.bf16.msrb.mxu3 %v2424_v5  ;;  %760 = vmatmul.bf16.vlgmr.msrb.gmra.mxu0 %v2651_v30 }
  0x42   :  { %1152 = vmatpush.bf16.msra.mxu0 %v2471_v2  ;;  %779 = vmatmul.bf16.vlgmr.msrb.gmra.mxu1 %v2657_v32  ;;  %v2466_v2 = vld [vmem:[%s3246_s1 + $0x210] sm:$0xff]  ;;  %v882_v5 = vrot.slane %v880_v41, 1  ;;  %v2525_v41 = vld [vmem:[%s3246_s1 + $0x3e8] sm:$0xff] }
  0x43   :  { %1171 = vmatpush.bf16.msra.mxu1 %v2479_v10  ;;  %798 = vmatmul.bf16.vlgmr.msrb.gmra.mxu2 %v2693_v49  ;;  %v2481_v10 = vld [vmem:[%s3246_s1 + $0x288] sm:$0xff] }
  0x44   :  { %1190 = vmatpush.bf16.msra.mxu2 %v2487_v52  ;;  %817 = vmatmul.bf16.vlgmr.msrb.gmra.mxu3 %v2704_v53  ;;  %v873_v52 = vrot.slane %v198_v51, 2  ;;  %v2474_v51 = vld [vmem:[%s3246_s1 + $0x250] sm:$0xff] }
  0x45   :  { %1209 = vmatpush.bf16.msra.mxu3 %v2495_v12  ;;  %v884_v12 = vor.u32 %v883_v7, %v882_v5  ;;  %v878_v7 = vrot.slane %v202_v61, 2  ;;  %v2499_v61 = vld [vmem:[%s3246_s1 + $0x318] sm:$0xff] }
  0x46   :  { %1153 = vmatpush.bf16.msra.mxu0 %v2470_v6  ;;  %v874_v9 = vor.u32 %v873_v52, %v872_v40  ;;  %v833_v6 = vrot.slane %v129_v54, 2  ;;  %v2464_v54 = vld [vmem:[%s3246_s1 + $0x200] sm:$0xff]  ;;  %v868_v52 = vrot.slane %v194_v46, 2  ;;  %v2507_v46 = vld [vmem:[%s3246_s1 + $0x358] sm:$0xff] }
  0x47   :  { %1172 = vmatpush.bf16.msra.mxu1 %v2478_v1  ;;  %v832_v1 = vrot.slane %v169_v45, 1  ;;  %v2503_v45 = vld [vmem:[%s3246_s1 + $0x338] sm:$0xff] }
  0x48   :  { %1191 = vmatpush.bf16.msra.mxu2 %v2486_v57  ;;  %v3034_v63 = vsel %vm3014_vm5, %v841_v15, %v874_v9  ;;  %v3042_v57 = vsel %vm3014_vm5, %v855_v22, %v884_v12  ;;  %v843_v15 = vrot.slane %v146_v4, 1  ;;  %v2472_v4 = vld [vmem:[%s3246_s1 + $0x240] sm:$0xff]  ;;  %v2527_v22 = vld [vmem:[%s3246_s1 + $0x3f8] sm:$0xff] }
  0x49   :  { %1210 = vmatpush.bf16.msra.mxu3 %v2494_v48  ;;  %v830_v48 = vrot.slane %v124_v47, 2  ;;  %v844_v47 = vrot.slane %v148_v55, 2  ;;  %v834_v16 = vor.u32 %v833_v6, %v832_v1  ;;  %v2523_v12 = vld [vmem:[%s3246_s1 + $0x3d8] sm:$0xff]  ;;  %v2522_v6 = vld [vmem:[%s3246_s1 + $0x3d0] sm:$0xff]  ;;  %v2513_v1 = vld [vmem:[%s3246_s1 + $0x388] sm:$0xff] }
  0x4a   :  { %1154 = vmatpush.bf16.msra.mxu0 %v2469_v17  ;;  %v2518_v17 = vld [vmem:[%s3246_s1 + $0x3b0] sm:$0xff] }
  0x4b   :  { %1173 = vmatpush.bf16.msra.mxu1 %v2477_v23  ;;  %v831_v55 = vor.u32 %v830_v48, %v829_v14  ;;  %v845_v23 = vor.u32 %v844_v47, %v843_v15  ;;  %v2498_v14 = vld [vmem:[%s3246_s1 + $0x310] sm:$0xff]  ;;  %v2497_v48 = vld [vmem:[%s3246_s1 + $0x308] sm:$0xff]  ;;  %v1233_v47 = vrot.slane %v2651_v30, 2 }
  0x4c   :  { %1192 = vmatpush.bf16.msra.mxu2 %v2485_v59  ;;  %v847_v59 = vrot.slane %v153_v0, 2  ;;  %v2488_v0 = vld [vmem:[%s3246_s1 + $0x2c0] sm:$0xff]  ;;  %v2521_v15 = vld [vmem:[%s3246_s1 + $0x3c8] sm:$0xff] }
  0x4d   :  { %1211 = vmatpush.bf16.msra.mxu3 %v2493_v21 }
  0x4e   :  { %1155 = vmatpush.bf16.msra.mxu0 %v2468_v26  ;;  %v848_v21 = vor.u32 %v847_v59, %v846_v56  ;;  %v835_v26 = vsel %vm828_vm3, %v831_v55, %v834_v16  ;;  %v2542_v59 = vmov 0   ;;  %v2496_v56 = vld [vmem:[%s3246_s1 + $0x300] sm:$0xff]  ;;  %v1240_v55 = vrot.slane %v2682_v44, 2 }
  0x4f   :  { %1174 = vmatpush.bf16.msra.mxu1 %v2476_v27  ;;  %2540 = vset.pattern.permute.xlu0 %v2542_v59 }
  0x50   :  { %1193 = vmatpush.bf16.msra.mxu2 %v2484_v25  ;;  %v2510_v25 = vld [vmem:[%s3246_s1 + $0x370] sm:$0xff]  ;;  %v849_v27 = vsel %vm828_vm3, %v845_v23, %v848_v21  ;;  %2541 = vset.pattern.permute.xlu1 %v2542_v59  ;;  %v1251_v23 = vrot.slane %v2802_v39, 2 }
  0x51   :  { %1212 = vmatpush.bf16.msra.mxu3 %v2492_v28  ;;  %765 = vmatmul.bf16.gmra.mxu0 %v2678_v42  ;;  %v2502_v28 = vld [vmem:[%s3246_s1 + $0x330] sm:$0xff] }
  0x52   :  { %1156 = vmatpush.bf16.msra.mxu0 %v2467_v31  ;;  %784 = vmatmul.bf16.gmra.mxu1 %v2680_v43  ;;  %v2517_v31 = vld [vmem:[%s3246_s1 + $0x3a8] sm:$0xff] }
  0x53   :  { %1175 = vmatpush.bf16.msra.mxu1 %v2475_v33  ;;  %803 = vmatmul.bf16.gmra.mxu2 %v2682_v44  ;;  %v2509_v33 = vld [vmem:[%s3246_s1 + $0x368] sm:$0xff] }
  0x54   :  { %1194 = vmatpush.bf16.msra.mxu2 %v2483_v29  ;;  %822 = vmatmul.bf16.gmra.mxu3 %v2695_v50  ;;  %v2526_v29 = vld [vmem:[%s3246_s1 + $0x3f0] sm:$0xff] }
  0x55   :  { %1213 = vmatpush.bf16.msra.mxu3 %v2491_v37  ;;  %v865_v37 = vshrl.u32 %v2788_v34, 16 }
  0x56   :  { %1157 = vmatpush.bf16.msra.mxu0 %v2466_v2  ;;  %v2500_v2 = vld [vmem:[%s3246_s1 + $0x320] sm:$0xff] }
  0x57   :  { %1176 = vmatpush.bf16.msra.mxu1 %v2474_v51  ;;  %v867_v40 = vrot.slane %v865_v37, 1  ;;  %v2524_v51 = vld [vmem:[%s3246_s1 + $0x3e0] sm:$0xff] }
  0x58   :  { %1195 = vmatpush.bf16.msra.mxu2 %v2482_v19  ;;  %v875_v19 = vshrl.u32 %v2802_v39, 16 }
  0x59   :  { %1214 = vmatpush.bf16.msra.mxu3 %v2490_v8  ;;  %v2515_v8 = vld [vmem:[%s3246_s1 + $0x398] sm:$0xff]  ;;  %v869_v9 = vor.u32 %v868_v52, %v867_v40 }
  0x5a   :  { %1158 = vmatpush.bf16.msra.mxu0 %v2465_v11  ;;  %v877_v5 = vrot.slane %v875_v19, 1  ;;  %v2514_v11 = vld [vmem:[%s3246_s1 + $0x390] sm:$0xff] }
  0x5b   :  { %1177 = vmatpush.bf16.msra.mxu1 %v2473_v58  ;;  %v2506_v58 = vld [vmem:[%s3246_s1 + $0x350] sm:$0xff] }
  0x5c   :  { %1196 = vmatpush.bf16.msra.mxu2 %v2481_v10  ;;  %v879_v10 = vor.u32 %v878_v7, %v877_v5 }
  0x5d   :  { %1215 = vmatpush.bf16.msra.mxu3 %v2489_v35  ;;  %v891_v35 = vsel %vm3014_vm5, %v834_v16, %v869_v9  ;;  %v1242_v16 = vrot.slane %v2704_v53, 2  ;;  %v1250_v53 = vrot.slane %v2792_v36, 2 }
  0x5e   :  { %1159 = vmatpush.bf16.msra.mxu0 %v2464_v54  ;;  %v2520_v54 = vld [vmem:[%s3246_s1 + $0x3c0] sm:$0xff] }
  0x5f   :  { %1178 = vmatpush.bf16.msra.mxu1 %v2472_v4  ;;  %v1234_v4 = vrot.slane %v2678_v42, 2 }
  0x60   :  { %1197 = vmatpush.bf16.msra.mxu2 %v2480_v13  ;;  %v893_v13 = vsel %vm3014_vm5, %v848_v21, %v879_v10  ;;  %v1252_v21 = vrot.slane %v2806_v18, 2 }
  0x61   :  { %1216 = vmatpush.bf16.msra.mxu3 %v2488_v0  ;;  %1160 = vmatmul.bf16.vlgmr.msra.gmra.mxu0 %v835_v26  ;;  %v1236_v0 = vrot.slane %v2657_v32, 2  ;;  %v1617_v32 = vld [vmem:[%s3248_s2 + $0x10] sm:$0xff] }
  0x62   :  { %1527 = vmatpush.bf16.msrb.mxu0 %v2503_v45  ;;  %1179 = vmatmul.bf16.vlgmr.msra.gmra.mxu1 %v2964_v20  ;;  %v2516_v20 = vld [vmem:[%s3246_s1 + $0x3a0] sm:$0xff]  ;;  %v1237_v45 = vrot.slane %v2680_v43, 2  ;;  %v1616_v43 = vld [vmem:[%s3248_s2 + $0x8] sm:$0xff] }
  0x63   :  { %1546 = vmatpush.bf16.msrb.mxu1 %v2511_v60  ;;  %1198 = vmatmul.bf16.vlgmr.msra.gmra.mxu2 %v849_v27  ;;  %v1239_v60 = vrot.slane %v2693_v49, 2  ;;  %v1618_v49 = vld [vmem:[%s3248_s2 + $0x18] sm:$0xff]  ;;  %v1264_v27 = vsel %vm1232_vm6, %v1240_v55, %v1251_v23 }
  0x64   :  { %1565 = vmatpush.bf16.msrb.mxu2 %v2519_v62  ;;  %1217 = vmatmul.bf16.vlgmr.msra.gmra.mxu3 %v2977_v24  ;;  %v2508_v24 = vld [vmem:[%s3246_s1 + $0x360] sm:$0xff]  ;;  %v1238_v30 = vsel %vm1232_vm6, %v1236_v0, %v1237_v45  ;;  %v1260_v26 = vsel %vm1232_vm6, %v1237_v45, %v1250_v53 }
  0x65   :  { %1584 = vmatpush.bf16.msrb.mxu3 %v2527_v22  ;;  %v1615_v62 = vld [vmem:[%s3248_s2] sm:$0xff]  ;;  %v1243_v22 = vrot.slane %v2695_v50, 2  ;;  %v1241_v42 = vsel %vm1232_vm6, %v1239_v60, %v1240_v55  ;;  %1631 = vperm.xlu1 %2541, %v1617_v32   ;;  %v1249_v50 = vrot.slane %v2788_v34, 2 }
  0x66   :  { %1528 = vmatpush.bf16.msrb.mxu0 %v2502_v28  ;;  %1621 = vperm.xlu0 %2540, %v1615_v62  }
  0x67   :  { %1547 = vmatpush.bf16.msrb.mxu1 %v2510_v25  ;;  %v1244_v44 = vsel %vm1232_vm6, %v1242_v16, %v1243_v22  ;;  %v1256_v25 = vsel %vm1232_vm6, %v1234_v4, %v1249_v50  ;;  %v1268_v28 = vsel %vm1232_vm6, %v1243_v22, %v1252_v21 }
  0x68   :  { %1566 = vmatpush.bf16.msrb.mxu2 %v2518_v17  ;;  %v1235_v17 = vsel %vm1232_vm6, %v1233_v47, %v1234_v4 }
  0x69   :  { %1585 = vmatpush.bf16.msrb.mxu3 %v2526_v29 }
  0x6a   :  { %1529 = vmatpush.bf16.msrb.mxu0 %v2501_v38 }
  0x6b   :  { %1548 = vmatpush.bf16.msrb.mxu1 %v2509_v33 }
  0x6c   :  { %1567 = vmatpush.bf16.msrb.mxu2 %v2517_v31 }
  0x6d   :  { %1586 = vmatpush.bf16.msrb.mxu3 %v2525_v41  ;;  %1636 = vperm.xlu1 %2541, %v1618_v49  }
  0x6e   :  { %1530 = vmatpush.bf16.msrb.mxu0 %v2500_v2  ;;  %1626 = vperm.xlu0 %2540, %v1616_v43  }
  0x6f   :  { %1549 = vmatpush.bf16.msrb.mxu1 %v2508_v24 }
  0x70   :  { %1568 = vmatpush.bf16.msrb.mxu2 %v2516_v20 }
  0x71   :  { %1587 = vmatpush.bf16.msrb.mxu3 %v2524_v51  ;;  %1165 = vmatmul.bf16.gmra.mxu0 %v891_v35 }
  0x72   :  { %1531 = vmatpush.bf16.msrb.mxu0 %v2499_v61  ;;  %1184 = vmatmul.bf16.gmra.mxu1 %v3034_v63  ;;  %v2512_v63 = vld [vmem:[%s3246_s1 + $0x380] sm:$0xff] }
  0x73   :  { %1550 = vmatpush.bf16.msrb.mxu1 %v2507_v46  ;;  %1203 = vmatmul.bf16.gmra.mxu2 %v893_v13 }
  0x74   :  { %1569 = vmatpush.bf16.msrb.mxu2 %v2515_v8  ;;  %1222 = vmatmul.bf16.gmra.mxu3 %v3042_v57  ;;  %v2504_v57 = vld [vmem:[%s3246_s1 + $0x340] sm:$0xff] }
  0x75   :  { %1588 = vmatpush.bf16.msrb.mxu3 %v2523_v12 }
  0x76   :  { %1532 = vmatpush.bf16.msrb.mxu0 %v2498_v14 }
  0x77   :  { %1551 = vmatpush.bf16.msrb.mxu1 %v2506_v58 }
  0x78   :  { %1570 = vmatpush.bf16.msrb.mxu2 %v2514_v11 }
  0x79   :  { %1589 = vmatpush.bf16.msrb.mxu3 %v2522_v6 }
  0x7a   :  { %1533 = vmatpush.bf16.msrb.mxu0 %v2497_v48 }
  0x7b   :  { %1552 = vmatpush.bf16.msrb.mxu1 %v2505_v3 }
  0x7c   :  { %1571 = vmatpush.bf16.msrb.mxu2 %v2513_v1 }
  0x7d   :  { %1590 = vmatpush.bf16.msrb.mxu3 %v2521_v15 }
  0x7e   :  { %1534 = vmatpush.bf16.msrb.mxu0 %v2496_v56 }
  0x7f   :  { %1553 = vmatpush.bf16.msrb.mxu1 %v2504_v57 }
  0x80   :  { %1572 = vmatpush.bf16.msrb.mxu2 %v2512_v63 }
  0x81   :  { %1591 = vmatpush.bf16.msrb.mxu3 %v2520_v54  ;;  %1535 = vmatmul.bf16.vlgmr.msrb.gmra.mxu0 %v1235_v17 }
  0x82   :  { %1554 = vmatmul.bf16.vlgmr.msrb.gmra.mxu1 %v1238_v30 }
  0x83   :  { %1573 = vmatmul.bf16.vlgmr.msrb.gmra.mxu2 %v1241_v42 }
  0x84   :  { %1592 = vmatmul.bf16.vlgmr.msrb.gmra.mxu3 %v1244_v44 }
  0x91   :  { %1540 = vmatmul.bf16.gmra.mxu0 %v1256_v25 }
  0x92   :  { %1559 = vmatmul.bf16.gmra.mxu1 %v1260_v26 }
  0x93   :  { %1578 = vmatmul.bf16.gmra.mxu2 %v1264_v27 }
  0x94   :  { %1597 = vmatmul.bf16.gmra.mxu3 %v1268_v28 }
  0x9e   :  { %v485_v29 = vpop.f32.mrf.mxu0 }
  0x9f   :  { %v504_v34 = vpop.f32.mrf.mxu1 }
  0xa0   :  { %v505_v31 = vadd.f32 %v504_v34, %v485_v29 }
  0xa6   :  { %v523_v36 = vpop.f32.mrf.mxu2  ;;  %v487_v37 = vpop.f32.mrf.mxu0 }
  0xa7   :  { %v542_v33 = vpop.f32.mrf.mxu3  ;;  %v524_v39 = vadd.f32 %v523_v36, %v505_v31  ;;  %v506_v18 = vpop.f32.mrf.mxu1 }
  0xa8   :  { %v507_v38 = vadd.f32 %v506_v18, %v487_v37 }
  0xa9   :  { %v543_v19 = vadd.f32 %v542_v33, %v524_v39 }
  0xae   :  { %v525_v41 = vpop.f32.mrf.mxu2  ;;  %v490_v40 = vpop.f32.mrf.mxu0 }
  0xaf   :  { %v544_v20 = vpop.f32.mrf.mxu3  ;;  %v526_v24 = vadd.f32 %v525_v41, %v507_v38  ;;  %v509_v52 = vpop.f32.mrf.mxu1 }
  0xb0   :  { %v510_v2 = vadd.f32 %v509_v52, %v490_v40 }
  0xb1   :  { %v545_v5 = vadd.f32 %v544_v20, %v526_v24 }
  0xb6   :  { %v528_v7 = vpop.f32.mrf.mxu2  ;;  %v492_v46 = vpop.f32.mrf.mxu0 }
  0xb7   :  { %v547_v51 = vpop.f32.mrf.mxu3  ;;  %v529_v8 = vadd.f32 %v528_v7, %v510_v2  ;;  %v511_v9 = vpop.f32.mrf.mxu1 }
  0xb8   :  { %v512_v10 = vadd.f32 %v511_v9, %v492_v46 }
  0xb9   :  { %v548_v61 = vadd.f32 %v547_v51, %v529_v8 }
  0xbe   :  { %v530_v12 = vpop.f32.mrf.mxu2  ;;  %v761_v35 = vpop.f32.mrf.mxu0 }
  0xbf   :  { %v549_v11 = vpop.f32.mrf.mxu3  ;;  %v531_v58 = vadd.f32 %v530_v12, %v512_v10  ;;  %v762_v13 = vadd.f32 %v761_v35, %v543_v19  ;;  %v780_v14 = vpop.f32.mrf.mxu1 }
  0xc1   :  { %v3222_v6 = vadd.f32 %v549_v11, %v531_v58  ;;  %v781_v1 = vadd.f32 %v780_v14, %v762_v13 }
  0xc6   :  { %v799_v3 = vpop.f32.mrf.mxu2  ;;  %v763_v15 = vpop.f32.mrf.mxu0 }
  0xc7   :  { %v800_v48 = vadd.f32 %v799_v3, %v781_v1  ;;  %v818_v62 = vpop.f32.mrf.mxu3  ;;  %v782_v63 = vpop.f32.mrf.mxu1  ;;  %v764_v38 = vadd.f32 %v763_v15, %v545_v5 }
  0xc9   :  { %v819_v57 = vadd.f32 %v818_v62, %v800_v48  ;;  %v783_v51 = vadd.f32 %v782_v63, %v764_v38 }
  0xce   :  { %v801_v59 = vpop.f32.mrf.mxu2  ;;  %v766_v54 = vpop.f32.mrf.mxu0 }
  0xcf   :  { %v820_v56 = vpop.f32.mrf.mxu3  ;;  %v767_v47 = vadd.f32 %v766_v54, %v548_v61  ;;  %v785_v4 = vpop.f32.mrf.mxu1  ;;  %v802_v9 = vadd.f32 %v801_v59, %v783_v51 }
  0xd1   :  { %v786_v0 = vadd.f32 %v785_v4, %v767_v47  ;;  %v821_v13 = vadd.f32 %v820_v56, %v802_v9 }
  0xd6   :  { %v804_v45 = vpop.f32.mrf.mxu2  ;;  %v768_v16 = vpop.f32.mrf.mxu0 }
  0xd7   :  { %v805_v60 = vadd.f32 %v804_v45, %v786_v0  ;;  %v823_v55 = vpop.f32.mrf.mxu3  ;;  %v3224_v22 = vpop.f32.mrf.mxu1  ;;  %v769_v59 = vadd.f32 %v768_v16, %v3222_v6 }
  0xd8   :  { %v1622_v7 = vpop.permute.xlu0 %1621  ;;  %v1632_v6 = vpop.permute.xlu1 %1631 }
  0xd9   :  { %v3226_v17 = vadd.f32 %v823_v55, %v805_v60 }
  0xde   :  { %v3228_v30 = vpop.f32.mrf.mxu2  ;;  %v1161_v32 = vpop.f32.mrf.mxu0 }
  0xdf   :  { %v3230_v42 = vpop.f32.mrf.mxu3  ;;  %v1180_v43 = vpop.f32.mrf.mxu1 }
  0xe0   :  { %v1181_v37 = vadd.f32 %v1180_v43, %v1161_v32  ;;  %v1627_v47 = vpop.permute.xlu0 %1626 }
  0xe6   :  { %v1199_v44 = vpop.f32.mrf.mxu2  ;;  %v1163_v50 = vpop.f32.mrf.mxu0 }
  0xe7   :  { %v1218_v49 = vpop.f32.mrf.mxu3  ;;  %v1182_v53 = vpop.f32.mrf.mxu1  ;;  %v1200_v19 = vadd.f32 %v1199_v44, %v1181_v37 }
  0xe8   :  { %v1183_v20 = vadd.f32 %v1182_v53, %v1163_v50  ;;  %v788_v53 = vadd.f32 %v3224_v22, %v769_v59 }
  0xe9   :  { %v1219_v8 = vadd.f32 %v1218_v49, %v1200_v19 }
  0xeb   :  { %v1228_v61 = vadd.f32 %v1219_v8, %v819_v57 }
  0xee   :  { %v1201_v23 = vpop.f32.mrf.mxu2  ;;  %v1166_v25 = vpop.f32.mrf.mxu0 }
  0xef   :  { %v1220_v21 = vpop.f32.mrf.mxu3  ;;  %v1185_v26 = vpop.f32.mrf.mxu1  ;;  %v1202_v46 = vadd.f32 %v1201_v23, %v1183_v20 }
  0xf0   :  { %v1186_v11 = vadd.f32 %v1185_v26, %v1166_v25 }
  0xf1   :  { %v1221_v12 = vadd.f32 %v1220_v21, %v1202_v46 }
  0xf3   :  { %v1229_v62 = vadd.f32 %v1221_v12, %v821_v13 }
  0xf6   :  { %v1204_v27 = vpop.f32.mrf.mxu2  ;;  %v1168_v29 = vpop.f32.mrf.mxu0 }
  0xf7   :  { %v1223_v28 = vpop.f32.mrf.mxu3  ;;  %v1187_v34 = vpop.f32.mrf.mxu1  ;;  %v1205_v15 = vadd.f32 %v1204_v27, %v1186_v11 }
  0xf8   :  { %v1188_v55 = vadd.f32 %v1187_v34, %v1168_v29 }
  0xf9   :  { %v1224_v57 = vadd.f32 %v1223_v28, %v1205_v15  ;;  %v807_v28 = vadd.f32 %v3228_v30, %v788_v53 }
  0xfb   :  { %v1230_v23 = vadd.f32 %v1224_v57, %v3226_v17 }
  0xfe   :  { %v1206_v31 = vpop.f32.mrf.mxu2  ;;  %v1536_v33 = vpop.f32.mrf.mxu0 }
  0xff   :  { %v1225_v36 = vpop.f32.mrf.mxu3  ;;  %v1555_v39 = vpop.f32.mrf.mxu1  ;;  %v1207_v21 = vadd.f32 %v1206_v31, %v1188_v55 }
 0x100   :  { %v1556_v18 = vadd.f32 %v1555_v39, %v1536_v33 }
 0x101   :  { %v1226_v34 = vadd.f32 %v1225_v36, %v1207_v21 }
 0x106   :  { %v1574_v41 = vpop.f32.mrf.mxu2  ;;  %v1538_v52 = vpop.f32.mrf.mxu0 }
 0x107   :  { %v1575_v24 = vadd.f32 %v1574_v41, %v1556_v18  ;;  %v1593_v40 = vpop.f32.mrf.mxu3  ;;  %v1557_v2 = vpop.f32.mrf.mxu1  ;;  %v826_v18 = vadd.f32 %v3230_v42, %v807_v28 }
 0x108   :  { %v1558_v58 = vadd.f32 %v1557_v2, %v1538_v52 }
 0x109   :  { %v1594_v10 = vadd.f32 %v1593_v40, %v1575_v24  ;;  %v1231_v17 = vadd.f32 %v1226_v34, %v826_v18  ;;  %v1637_v40 = vpop.permute.xlu1 %1636 }
 0x10b   :  { %v1603_v5 = vadd.f32 %v1594_v10, %v1228_v61 }
 0x10d   :  { %v1639_v63 = vmul.f32 %v1622_v7, %v1603_v5 }
 0x10e   :  { %v1576_v35 = vpop.f32.mrf.mxu2  ;;  %v1541_v3 = vpop.f32.mrf.mxu0 }
 0x10f   :  { %v1577_v14 = vadd.f32 %v1576_v35, %v1558_v58  ;;  %v1595_v1 = vpop.f32.mrf.mxu3  ;;  %v1560_v48 = vpop.f32.mrf.mxu1  ;;  %v1652_v56 = vmul.f32 %v1639_v63, %v1603_v5 }
 0x110   :  { %v1561_v0 = vadd.f32 %v1560_v48, %v1541_v3 }
 0x111   :  { %v1596_v54 = vadd.f32 %v1595_v1, %v1577_v14 }
 0x113   :  { %v1604_v4 = vadd.f32 %v1596_v54, %v1229_v62 }
 0x115   :  { %v2531_v45 = vpack.c.bf16 %v1604_v4, %v1603_v5  ;;  %v1640_v60 = vmul.f32 %v1627_v47, %v1604_v4 }
 0x116   :  { %v1579_v32 = vpop.f32.mrf.mxu2  ;;  %v1543_v26 = vpop.f32.mrf.mxu0 }
 0x117   :  { %2532 = vst [vmem:[%s3249_s3] sm:$0xff] %v2531_v45   ;;  %v1643_v43 = vadd.f32 %v1640_v60, %v1639_v63  ;;  %v1653_v44 = vmul.f32 %v1640_v60, %v1604_v4  ;;  %v1580_v49 = vadd.f32 %v1579_v32, %v1561_v0  ;;  %v1598_v50 = vpop.f32.mrf.mxu3  ;;  %v1562_v27 = vpop.f32.mrf.mxu1 }
 0x118   :  { %v1563_v39 = vadd.f32 %v1562_v27, %v1543_v26 }
 0x119   :  { %v1656_v16 = vadd.f32 %v1653_v44, %v1652_v56  ;;  %v1599_v25 = vadd.f32 %v1598_v50, %v1580_v49 }
 0x11b   :  { %v1605_v29 = vadd.f32 %v1599_v25, %v1230_v23 }
 0x11d   :  { %v1641_v33 = vmul.f32 %v1632_v6, %v1605_v29 }
 0x11e   :  { %v1581_v37 = vpop.f32.mrf.mxu2 }
 0x11f   :  { %v1644_v38 = vadd.f32 %v1643_v43, %v1641_v33  ;;  %v1654_v19 = vmul.f32 %v1641_v33, %v1605_v29  ;;  %v1582_v22 = vadd.f32 %v1581_v37, %v1563_v39  ;;  %v1600_v41 = vpop.f32.mrf.mxu3 }
 0x121   :  { %v1657_v31 = vadd.f32 %v1656_v16, %v1654_v19  ;;  %v1601_v20 = vadd.f32 %v1600_v41, %v1582_v22 }
 0x123   :  { %v1606_v24 = vadd.f32 %v1601_v20, %v1231_v17 }
 0x125   :  { %v2536_v52 = vpack.c.bf16 %v1606_v24, %v1605_v29  ;;  %v1642_v2 = vmul.f32 %v1637_v40, %v1606_v24 }
 0x127   :  { %2538 = vst [vmem:[%s3249_s3 + $0x8] sm:$0xff] %v2536_v52   ;;  %v1645_v30 = vadd.f32 %v1644_v38, %v1642_v2  ;;  %v1655_v36 = vmul.f32 %v1642_v2, %v1606_v24 }
 0x129   :  { %v1646_v7 = vrot.slane %v1645_v30, 4  ;;  %v1658_v51 = vadd.f32 %v1657_v31, %v1655_v36 }
 0x12b   :  { %v1647_v42 = vadd.f32 %v1646_v7, %v1645_v30  ;;  %v1659_v8 = vrot.slane %v1658_v51, 4 }
 0x12d   :  { %v1648_v46 = vrot.slane %v1647_v42, 2  ;;  %v1660_v9 = vadd.f32 %v1659_v8, %v1658_v51 }
 0x12f   :  { %v1649_v10 = vadd.f32 %v1648_v46, %v1647_v42  ;;  %v1661_v61 = vrot.slane %v1660_v9, 2 }
 0x131   :  { %v1650_v12 = vrot.slane %v1649_v10, 1  ;;  %v1662_v11 = vadd.f32 %v1661_v61, %v1660_v9 }
 0x133   :  { %v1663_v58 = vrot.slane %v1662_v11, 1  ;;  %v1651_v35 = vadd.f32 %v1650_v12, %v1649_v10 }
 0x135   :  { %v1664_v13 = vadd.f32 %v1663_v58, %v1662_v11 }
 0x137   :  { %v1666_v5 = vsel %vm1665_vm7, %v1651_v35, %v1664_v13 }
 0x138   :  { %1667 = vst [vmem:[%s3250_s4] sm:$0x3] %v1666_v5 }

</bundles_post_ra>
